<compile_context>
chip_gen: v7x
topology: tpu7x:2x2x1
jax: 0.10.0
libtpu: 0.0.40
codegen_flags: <defaults>
</compile_context>

<pallas_src>
import functools

import numpy as np
import jax
import jax.numpy as jnp
from jax import lax
from jax.experimental import pallas as pl
from jax.experimental.pallas import tpu as pltpu


# ------------------------------ Pallas kernel -------------------------------

def _fused_attention_kernel(x_ref, w_ref, b_ref, wpg_ref, tsel_ref, bp_ref,
                            o_ref, *, head_dim, bpb):
    """Fused qkv conv + attention + (scrambled) proj conv.

    Per grid step:
      x_ref    : (bpb, C, N)  input, channel-major, N = H*W on lanes
      w_ref    : (3C, C)      merged q|k|v conv rows (q rows pre-scaled),
                              row order within each third is j = 3*d + s
      b_ref    : (3C, 1)      merged biases (q part pre-scaled)
      wpg_ref  : (C, C, N)    wpg[j, o, n] = w_proj[o, (C*n + j) // N]
      tsel_ref : (C, N, N)    tsel[j, n, p] = 1 iff p == (C*n + j) % N
      bp_ref   : (C, 1)       proj bias
      o_ref    : (bpb, C, N)  final output, channel-major (lane-dense store)
    """
    C = w_ref.shape[1]
    N = x_ref.shape[-1]

    w = w_ref[...]
    b = b_ref[...]
    bp = bp_ref[...]
    ones_row = jnp.ones((1, N), jnp.float32)

    # --- merged qkv 1x1 conv over all bpb batch elements (bpb*N lanes) ------
    if bpb > 1:
        x_wide = jnp.concatenate([x_ref[bi] for bi in range(bpb)], axis=1)
    else:
        x_wide = x_ref[0]
    qkv_wide = jnp.dot(w, x_wide, preferred_element_type=jnp.float32) + b

    for bi in range(bpb):                      # bpb is tiny and static: unroll
        qkv = qkv_wide[:, bi * N:(bi + 1) * N]             # (3C, N)
        q = qkv[0:C, :]                                    # scale already folded
        k = qkv[C:2 * C, :]
        v = qkv[2 * C:3 * C, :]

        # --- scores for all heads (MXU, K=3), stacked on sublanes ----------
        scores = []
        for d in range(head_dim):
            r = 3 * d
            s_d = lax.dot_general(q[r:r + 3, :], k[r:r + 3, :],
                                  (((0,), (0,)), ((), ())),
                                  preferred_element_type=jnp.float32)  # (N, N)
            scores.append(s_d)
        s_all = jnp.concatenate(scores, axis=0)            # (head_dim*N, N)
        s_all = s_all - jnp.max(s_all, axis=-1, keepdims=True)
        e_all = jnp.exp(s_all)

        # --- PV + row-sum per head; lane-dense (3, N) rows, stacked (C, N) --
        # Appending a ones-row to v gives the softmax denominator from the
        # same matmul, already oriented (1, N) for the transposed output.
        a_rows = []
        for d in range(head_dim):
            r = 3 * d
            vv = jnp.concatenate([v[r:r + 3, :], ones_row], axis=0)   # (4, N)
            e_d = e_all[d * N:(d + 1) * N, :]                         # (N, N)
            pv = lax.dot_general(vv, e_d, (((1,), (1,)), ((), ())),
                                 preferred_element_type=jnp.float32)  # (4, N)
            inv_l = pl.reciprocal(pv[3:4, :], approx=False)           # (1, N)
            a_rows.append(pv[0:3, :] * inv_l)
        a = jnp.concatenate(a_rows, axis=0)                           # (C, N)

        # --- fused "transpose(1,2).reshape(B,C,H,W)" + proj 1x1 conv --------
        # y[o,p] = bp[o] + sum_j sum_n w_proj[o,(C*n+j)//N] * a[j,n]
        #                              * [p == (C*n+j)%N]
        acc = jnp.zeros((C, N), jnp.float32)
        for j in range(C):
            m_j = wpg_ref[j] * a[j:j + 1, :]                          # (C, N)
            acc = acc + jnp.dot(m_j, tsel_ref[j],
                                preferred_element_type=jnp.float32)   # (C, N)
        o_ref[bi] = (acc + bp).astype(o_ref.dtype)


# ------------------------------ forward pass --------------------------------

def _tensorcores_per_chip():
    """2 on v7x-class chips (two TensorCores), else 1 (v5e / v6e)."""
    try:
        kind = jax.devices()[0].device_kind.lower()
    except Exception:
        return 1
    return 2 if ("v7" in kind or "7x" in kind) else 1


def self_attention_forward(x, w_qkv, b_qkv, w_proj, b_proj, num_heads):
    B, C, H, W = x.shape
    D = C // num_heads
    # The module's permute/reshape is only self-consistent for num_heads == 3
    # (q/k/v come from heads 0/1/2 and 3*head_dim must equal C).
    assert num_heads == 3 and 3 * D == C, "module semantics require num_heads == 3"
    N = H * W
    scale = float(D) ** -0.5

    # --- weight prep (folds into weights, tiny / one-off) -------------------
    # Reorder the qkv conv rows so that row index is j = d*3 + s, matching the
    # module's head-0/1/2 gather; fold `scale` into the q rows and bias.
    w2 = w_qkv[:, :, 0, 0].reshape(3, num_heads, D, C)     # [s, head, d, c]
    b2 = b_qkv.reshape(3, num_heads, D)                    # [s, head, d]

    def pick(h, fold):
        wsel = jnp.transpose(w2[:, h], (1, 0, 2)).reshape(3 * D, C) * fold
        bsel = jnp.transpose(b2[:, h], (1, 0)).reshape(3 * D) * fold
        return wsel, bsel

    wq, bq = pick(0, scale)      # scale folded into q
    wk, bk = pick(1, 1.0)
    wv, bv = pick(2, 1.0)
    w_all = jnp.concatenate([wq, wk, wv], axis=0)          # (3C, C)
    b_all = jnp.concatenate([bq, bk, bv], axis=0).reshape(3 * C, 1)

    # Constants that fold the (attn@v).transpose(1,2).reshape relayout into the
    # proj conv: for each source row j of the lane-dense attention output
    # A[j, n], flat position f = C*n + j lands at output channel f//N, pixel f%N.
    jj, nn = np.meshgrid(np.arange(C), np.arange(N), indexing="ij")   # (C, N)
    flat = nn * C + jj
    c_of = flat // N                                        # (C, N) ints
    p_of = flat % N
    t_np = np.zeros((C, N, N), np.float32)
    t_np[jj, nn, p_of] = 1.0                                # T[j, n, p_of] = 1
    wp2 = w_proj[:, :, 0, 0]                                # (C, C)
    wpg = jnp.transpose(wp2[:, c_of], (1, 0, 2))            # (C_j, C_o, N)
    tsel = jnp.asarray(t_np)                                # (C, N, N)
    bp = b_proj.reshape(C, 1)

    # NCHW -> (B, C, N): free reshape (same row-major order).
    x_cn = x.reshape(B, C, N)

    # Single-TC chips (v5e/v6e): collapse the grid to one step and run the qkv
    # GEMM over all batch elements' pixels at once (bpb*N lanes).  Multi-TC
    # chips (v7x): keep the batch-parallel grid so it shards across cores.
    bpb = 1 if _tensorcores_per_chip() > 1 else B
    if B % bpb != 0:
        bpb = 1
    grid = (B // bpb,)

    y = pl.pallas_call(
        functools.partial(_fused_attention_kernel, head_dim=D, bpb=bpb),
        grid=grid,
        in_specs=[
            pl.BlockSpec((bpb, C, N), lambda i: (i, 0, 0)),   # x
            pl.BlockSpec((3 * C, C), lambda i: (0, 0)),       # merged qkv weights
            pl.BlockSpec((3 * C, 1), lambda i: (0, 0)),       # merged qkv bias
            pl.BlockSpec((C, C, N), lambda i: (0, 0, 0)),     # gathered proj weights
            pl.BlockSpec((C, N, N), lambda i: (0, 0, 0)),     # 0/1 placement mats
            pl.BlockSpec((C, 1), lambda i: (0, 0)),           # proj bias
        ],
        out_specs=pl.BlockSpec((bpb, C, N), lambda i: (i, 0, 0)),
        out_shape=jax.ShapeDtypeStruct((B, C, N), jnp.float32),
        compiler_params=pltpu.CompilerParams(
            dimension_semantics=("parallel",)),
    )(x_cn, w_all, b_all, wpg, tsel, bp)

    return y.reshape(B, C, H, W)


# ----------------------------- pure-JAX reference ---------------------------

def reference_forward(x, w_qkv, b_qkv, w_proj, b_proj, num_heads):
    B, C, H, W = x.shape
    head_dim = C // num_heads
    scale = head_dim ** (-0.5)
    hp = jax.lax.Precision.HIGHEST

    def conv1x1_ref(t, w, b):
        return (jnp.einsum('bchw,oc->bohw', t, w[:, :, 0, 0], precision=hp)
                + b[None, :, None, None])

    qkv = conv1x1_ref(x, w_qkv, b_qkv)
    qkv = qkv.reshape(B, 3, num_heads, head_dim, H * W)
    qkv = jnp.transpose(qkv, (2, 0, 3, 4, 1))
    q, k, v = qkv[0], qkv[1], qkv[2]
    attn = jnp.einsum('bdnt,bdmt->bdnm', q, k, precision=hp) * scale
    attn = jax.nn.softmax(attn, axis=-1)
    out = jnp.einsum('bdnm,bdmt->bdnt', attn, v, precision=hp)
    out = jnp.transpose(out, (0, 2, 1, 3)).reshape(B, C, H, W)
    return conv1x1_ref(out, w_proj, b_proj)


# ------------------------------- parameters ---------------------------------

def init_params(key, in_channels):
    C = in_channels
    k1, k2, k3, k4 = jax.random.split(key, 4)
    bound = 1.0 / np.sqrt(C)   # PyTorch Conv2d default init bound (fan_in = C)
    w_qkv = jax.random.uniform(k1, (3 * C, C, 1, 1), jnp.float32, -bound, bound)
    b_qkv = jax.random.uniform(k2, (3 * C,), jnp.float32, -bound, bound)
    w_proj = jax.random.uniform(k3, (C, C, 1, 1), jnp.float32, -bound, bound)
    b_proj = jax.random.uniform(k4, (C,), jnp.float32, -bound, bound)
    return w_qkv, b_qkv, w_proj, b_proj


if __name__ == "__main__":
    key = jax.random.PRNGKey(0)
    kx, kp = jax.random.split(key)

    B, C, H, W = 2, 12, 8, 8
    num_heads = 3   # only value for which the module's permute/reshape is consistent

    x = jax.random.normal(kx, (B, C, H, W), jnp.float32)
    w_qkv, b_qkv, w_proj, b_proj = init_params(kp, C)

    fwd = jax.jit(self_attention_forward, static_argnums=(5,))
    y = jax.block_until_ready(fwd(x, w_qkv, b_qkv, w_proj, b_proj, num_heads))
    y_ref = jax.block_until_ready(
        reference_forward(x, w_qkv, b_qkv, w_proj, b_proj, num_heads))

    assert y.shape == (B, C, H, W)
    # Exact (non-approx) softmax normalization; remaining tolerance covers MXU
    # accumulation-order / multi-pass differences vs the f32 reference.
    np.testing.assert_allclose(np.asarray(y), np.asarray(y_ref),
                               rtol=5e-3, atol=5e-3)
    print("KERNEL_OK")
</pallas_src>

<mosaic_0001>
module attributes {stable_mosaic.version = 11 : i64} {
  func.func @_fused_attention_kernel(%arg0: i32, %arg1: memref<2x12x64xf32, #tpu.memory_space<vmem>>, %arg2: memref<36x12xf32, #tpu.memory_space<vmem>>, %arg3: memref<36x1xf32, #tpu.memory_space<vmem>>, %arg4: memref<12x12x64xf32, #tpu.memory_space<vmem>>, %arg5: memref<12x64x64xf32, #tpu.memory_space<vmem>>, %arg6: memref<12x1xf32, #tpu.memory_space<vmem>>, %arg7: memref<2x12x64xf32, #tpu.memory_space<vmem>>) attributes {dimension_semantics = [#tpu.dimension_semantics<parallel>], iteration_bounds = array<i64: 1>, scalar_prefetch = 0 : i64, scratch_operands = 0 : i64, tpu.core_type = #tpu.core_type<tc>, window_params = [{transform_indices = @transform_0, window_bounds = array<i64: 2, 12, 64>}, {pipeline_mode = #tpu.pipeline_mode<synchronous>, transform_indices = @transform_1, window_bounds = array<i64: 36, 12>}, {pipeline_mode = #tpu.pipeline_mode<synchronous>, transform_indices = @transform_2, window_bounds = array<i64: 36, 1>}, {pipeline_mode = #tpu.pipeline_mode<synchronous>, transform_indices = @transform_3, window_bounds = array<i64: 12, 12, 64>}, {pipeline_mode = #tpu.pipeline_mode<synchronous>, transform_indices = @transform_4, window_bounds = array<i64: 12, 64, 64>}, {pipeline_mode = #tpu.pipeline_mode<synchronous>, transform_indices = @transform_5, window_bounds = array<i64: 12, 1>}, {transform_indices = @transform_6, window_bounds = array<i64: 2, 12, 64>}]} {
    %c0 = arith.constant 0 : index
    %c0_0 = arith.constant 0 : index
    %0 = vector.load %arg2[%c0, %c0_0] : memref<36x12xf32, #tpu.memory_space<vmem>>, vector<36x12xf32>
    %c0_1 = arith.constant 0 : index
    %c0_2 = arith.constant 0 : index
    %1 = vector.load %arg3[%c0_1, %c0_2] : memref<36x1xf32, #tpu.memory_space<vmem>>, vector<36x1xf32>
    %c0_3 = arith.constant 0 : index
    %c0_4 = arith.constant 0 : index
    %2 = vector.load %arg6[%c0_3, %c0_4] : memref<12x1xf32, #tpu.memory_space<vmem>>, vector<12x1xf32>
    %cst = arith.constant 1.000000e+00 : f32
    %3 = vector.broadcast %cst : f32 to vector<1x64xf32>
    %c0_5 = arith.constant 0 : index
    %c0_6 = arith.constant 0 : index
    %c0_7 = arith.constant 0 : index
    %4 = vector.load %arg1[%c0_5, %c0_6, %c0_7] : memref<2x12x64xf32, #tpu.memory_space<vmem>>, vector<1x12x64xf32>
    %5 = vector.shape_cast %4 : vector<1x12x64xf32> to vector<12x64xf32>
    %c1 = arith.constant 1 : index
    %c0_8 = arith.constant 0 : index
    %c0_9 = arith.constant 0 : index
    %6 = vector.load %arg1[%c1, %c0_8, %c0_9] : memref<2x12x64xf32, #tpu.memory_space<vmem>>, vector<1x12x64xf32>
    %7 = vector.shape_cast %6 : vector<1x12x64xf32> to vector<12x64xf32>
    %8 = tpu.concatenate %5, %7 in 1 : vector<12x64xf32>, vector<12x64xf32> -> vector<12x128xf32>
    %cst_10 = arith.constant dense<0.000000e+00> : vector<36x128xf32>
    %9 = tpu.matmul %0, %8, %cst_10 {dimension_numbers = #tpu.dot_dimension_numbers<[1], [0], [0], [1], [0, 0, 1, 1], [], []>} : vector<36x12xf32>, vector<12x128xf32>, vector<36x128xf32> -> vector<36x128xf32>
    %10 = vector.broadcast %1 : vector<36x1xf32> to vector<36x128xf32>
    %11 = arith.addf %9, %10 : vector<36x128xf32>
    %12 = vector.extract_strided_slice %11 {offsets = [0, 0], sizes = [36, 64], strides = [1, 1]} : vector<36x128xf32> to vector<36x64xf32>
    %13 = vector.extract_strided_slice %12 {offsets = [0, 0], sizes = [12, 64], strides = [1, 1]} : vector<36x64xf32> to vector<12x64xf32>
    %14 = vector.extract_strided_slice %12 {offsets = [12, 0], sizes = [12, 64], strides = [1, 1]} : vector<36x64xf32> to vector<12x64xf32>
    %15 = vector.extract_strided_slice %12 {offsets = [24, 0], sizes = [12, 64], strides = [1, 1]} : vector<36x64xf32> to vector<12x64xf32>
    %16 = vector.extract_strided_slice %13 {offsets = [0, 0], sizes = [3, 64], strides = [1, 1]} : vector<12x64xf32> to vector<3x64xf32>
    %17 = vector.extract_strided_slice %14 {offsets = [0, 0], sizes = [3, 64], strides = [1, 1]} : vector<12x64xf32> to vector<3x64xf32>
    %cst_11 = arith.constant dense<0.000000e+00> : vector<64x64xf32>
    %18 = tpu.matmul %16, %17, %cst_11 {dimension_numbers = #tpu.dot_dimension_numbers<[0], [0], [1], [1], [0, 1, 1, 1], [], []>} : vector<3x64xf32>, vector<3x64xf32>, vector<64x64xf32> -> vector<64x64xf32>
    %19 = vector.extract_strided_slice %13 {offsets = [3, 0], sizes = [3, 64], strides = [1, 1]} : vector<12x64xf32> to vector<3x64xf32>
    %20 = vector.extract_strided_slice %14 {offsets = [3, 0], sizes = [3, 64], strides = [1, 1]} : vector<12x64xf32> to vector<3x64xf32>
    %cst_12 = arith.constant dense<0.000000e+00> : vector<64x64xf32>
    %21 = tpu.matmul %19, %20, %cst_12 {dimension_numbers = #tpu.dot_dimension_numbers<[0], [0], [1], [1], [0, 1, 1, 1], [], []>} : vector<3x64xf32>, vector<3x64xf32>, vector<64x64xf32> -> vector<64x64xf32>
    %22 = vector.extract_strided_slice %13 {offsets = [6, 0], sizes = [3, 64], strides = [1, 1]} : vector<12x64xf32> to vector<3x64xf32>
    %23 = vector.extract_strided_slice %14 {offsets = [6, 0], sizes = [3, 64], strides = [1, 1]} : vector<12x64xf32> to vector<3x64xf32>
    %cst_13 = arith.constant dense<0.000000e+00> : vector<64x64xf32>
    %24 = tpu.matmul %22, %23, %cst_13 {dimension_numbers = #tpu.dot_dimension_numbers<[0], [0], [1], [1], [0, 1, 1, 1], [], []>} : vector<3x64xf32>, vector<3x64xf32>, vector<64x64xf32> -> vector<64x64xf32>
    %25 = vector.extract_strided_slice %13 {offsets = [9, 0], sizes = [3, 64], strides = [1, 1]} : vector<12x64xf32> to vector<3x64xf32>
    %26 = vector.extract_strided_slice %14 {offsets = [9, 0], sizes = [3, 64], strides = [1, 1]} : vector<12x64xf32> to vector<3x64xf32>
    %cst_14 = arith.constant dense<0.000000e+00> : vector<64x64xf32>
    %27 = tpu.matmul %25, %26, %cst_14 {dimension_numbers = #tpu.dot_dimension_numbers<[0], [0], [1], [1], [0, 1, 1, 1], [], []>} : vector<3x64xf32>, vector<3x64xf32>, vector<64x64xf32> -> vector<64x64xf32>
    %28 = tpu.concatenate %18, %21, %24, %27 in 0 : vector<64x64xf32>, vector<64x64xf32>, vector<64x64xf32>, vector<64x64xf32> -> vector<256x64xf32>
    %cst_15 = arith.constant dense<0xFF800000> : vector<256xf32>
    %29 = vector.multi_reduction <maximumf>, %28, %cst_15 [1] : vector<256x64xf32> to vector<256xf32>
    %30 = vector.shape_cast %29 : vector<256xf32> to vector<256x1xf32>
    %31 = vector.broadcast %30 : vector<256x1xf32> to vector<256x64xf32>
    %32 = arith.subf %28, %31 : vector<256x64xf32>
    %33 = math.exp %32 : vector<256x64xf32>
    %34 = vector.extract_strided_slice %15 {offsets = [0, 0], sizes = [3, 64], strides = [1, 1]} : vector<12x64xf32> to vector<3x64xf32>
    %35 = tpu.concatenate %34, %3 in 0 : vector<3x64xf32>, vector<1x64xf32> -> vector<4x64xf32>
    %36 = vector.extract_strided_slice %33 {offsets = [0, 0], sizes = [64, 64], strides = [1, 1]} : vector<256x64xf32> to vector<64x64xf32>
    %cst_16 = arith.constant dense<0.000000e+00> : vector<4x64xf32>
    %37 = tpu.matmul %35, %36, %cst_16 {dimension_numbers = #tpu.dot_dimension_numbers<[1], [1], [0], [0], [0, 0, 1, 0], [], []>} : vector<4x64xf32>, vector<64x64xf32>, vector<4x64xf32> -> vector<4x64xf32>
    %38 = vector.extract_strided_slice %37 {offsets = [3, 0], sizes = [1, 64], strides = [1, 1]} : vector<4x64xf32> to vector<1x64xf32>
    %39 = tpu.reciprocal %38 : vector<1x64xf32> -> vector<1x64xf32>
    %40 = vector.extract_strided_slice %37 {offsets = [0, 0], sizes = [3, 64], strides = [1, 1]} : vector<4x64xf32> to vector<3x64xf32>
    %41 = vector.broadcast %39 : vector<1x64xf32> to vector<3x64xf32>
    %42 = arith.mulf %40, %41 : vector<3x64xf32>
    %43 = vector.extract_strided_slice %15 {offsets = [3, 0], sizes = [3, 64], strides = [1, 1]} : vector<12x64xf32> to vector<3x64xf32>
    %44 = tpu.concatenate %43, %3 in 0 : vector<3x64xf32>, vector<1x64xf32> -> vector<4x64xf32>
    %45 = vector.extract_strided_slice %33 {offsets = [64, 0], sizes = [64, 64], strides = [1, 1]} : vector<256x64xf32> to vector<64x64xf32>
    %cst_17 = arith.constant dense<0.000000e+00> : vector<4x64xf32>
    %46 = tpu.matmul %44, %45, %cst_17 {dimension_numbers = #tpu.dot_dimension_numbers<[1], [1], [0], [0], [0, 0, 1, 0], [], []>} : vector<4x64xf32>, vector<64x64xf32>, vector<4x64xf32> -> vector<4x64xf32>
    %47 = vector.extract_strided_slice %46 {offsets = [3, 0], sizes = [1, 64], strides = [1, 1]} : vector<4x64xf32> to vector<1x64xf32>
    %48 = tpu.reciprocal %47 : vector<1x64xf32> -> vector<1x64xf32>
    %49 = vector.extract_strided_slice %46 {offsets = [0, 0], sizes = [3, 64], strides = [1, 1]} : vector<4x64xf32> to vector<3x64xf32>
    %50 = vector.broadcast %48 : vector<1x64xf32> to vector<3x64xf32>
    %51 = arith.mulf %49, %50 : vector<3x64xf32>
    %52 = vector.extract_strided_slice %15 {offsets = [6, 0], sizes = [3, 64], strides = [1, 1]} : vector<12x64xf32> to vector<3x64xf32>
    %53 = tpu.concatenate %52, %3 in 0 : vector<3x64xf32>, vector<1x64xf32> -> vector<4x64xf32>
    %54 = vector.extract_strided_slice %33 {offsets = [128, 0], sizes = [64, 64], strides = [1, 1]} : vector<256x64xf32> to vector<64x64xf32>
    %cst_18 = arith.constant dense<0.000000e+00> : vector<4x64xf32>
    %55 = tpu.matmul %53, %54, %cst_18 {dimension_numbers = #tpu.dot_dimension_numbers<[1], [1], [0], [0], [0, 0, 1, 0], [], []>} : vector<4x64xf32>, vector<64x64xf32>, vector<4x64xf32> -> vector<4x64xf32>
    %56 = vector.extract_strided_slice %55 {offsets = [3, 0], sizes = [1, 64], strides = [1, 1]} : vector<4x64xf32> to vector<1x64xf32>
    %57 = tpu.reciprocal %56 : vector<1x64xf32> -> vector<1x64xf32>
    %58 = vector.extract_strided_slice %55 {offsets = [0, 0], sizes = [3, 64], strides = [1, 1]} : vector<4x64xf32> to vector<3x64xf32>
    %59 = vector.broadcast %57 : vector<1x64xf32> to vector<3x64xf32>
    %60 = arith.mulf %58, %59 : vector<3x64xf32>
    %61 = vector.extract_strided_slice %15 {offsets = [9, 0], sizes = [3, 64], strides = [1, 1]} : vector<12x64xf32> to vector<3x64xf32>
    %62 = tpu.concatenate %61, %3 in 0 : vector<3x64xf32>, vector<1x64xf32> -> vector<4x64xf32>
    %63 = vector.extract_strided_slice %33 {offsets = [192, 0], sizes = [64, 64], strides = [1, 1]} : vector<256x64xf32> to vector<64x64xf32>
    %cst_19 = arith.constant dense<0.000000e+00> : vector<4x64xf32>
    %64 = tpu.matmul %62, %63, %cst_19 {dimension_numbers = #tpu.dot_dimension_numbers<[1], [1], [0], [0], [0, 0, 1, 0], [], []>} : vector<4x64xf32>, vector<64x64xf32>, vector<4x64xf32> -> vector<4x64xf32>
    %65 = vector.extract_strided_slice %64 {offsets = [3, 0], sizes = [1, 64], strides = [1, 1]} : vector<4x64xf32> to vector<1x64xf32>
    %66 = tpu.reciprocal %65 : vector<1x64xf32> -> vector<1x64xf32>
    %67 = vector.extract_strided_slice %64 {offsets = [0, 0], sizes = [3, 64], strides = [1, 1]} : vector<4x64xf32> to vector<3x64xf32>
    %68 = vector.broadcast %66 : vector<1x64xf32> to vector<3x64xf32>
    %69 = arith.mulf %67, %68 : vector<3x64xf32>
    %70 = tpu.concatenate %42, %51, %60, %69 in 0 : vector<3x64xf32>, vector<3x64xf32>, vector<3x64xf32>, vector<3x64xf32> -> vector<12x64xf32>
    %cst_20 = arith.constant 0.000000e+00 : f32
    %71 = vector.broadcast %cst_20 : f32 to vector<12x64xf32>
    %c0_21 = arith.constant 0 : index
    %c0_22 = arith.constant 0 : index
    %c0_23 = arith.constant 0 : index
    %72 = vector.load %arg4[%c0_21, %c0_22, %c0_23] : memref<12x12x64xf32, #tpu.memory_space<vmem>>, vector<1x12x64xf32>
    %73 = vector.shape_cast %72 : vector<1x12x64xf32> to vector<12x64xf32>
    %74 = vector.extract_strided_slice %70 {offsets = [0, 0], sizes = [1, 64], strides = [1, 1]} : vector<12x64xf32> to vector<1x64xf32>
    %75 = vector.broadcast %74 : vector<1x64xf32> to vector<12x64xf32>
    %76 = arith.mulf %73, %75 : vector<12x64xf32>
    %c0_24 = arith.constant 0 : index
    %c0_25 = arith.constant 0 : index
    %c0_26 = arith.constant 0 : index
    %77 = vector.load %arg5[%c0_24, %c0_25, %c0_26] : memref<12x64x64xf32, #tpu.memory_space<vmem>>, vector<1x64x64xf32>
    %78 = vector.shape_cast %77 : vector<1x64x64xf32> to vector<64x64xf32>
    %cst_27 = arith.constant dense<0.000000e+00> : vector<12x64xf32>
    %79 = tpu.matmul %76, %78, %cst_27 {dimension_numbers = #tpu.dot_dimension_numbers<[1], [0], [0], [1], [0, 0, 1, 1], [], []>} : vector<12x64xf32>, vector<64x64xf32>, vector<12x64xf32> -> vector<12x64xf32>
    %80 = arith.addf %71, %79 : vector<12x64xf32>
    %c1_28 = arith.constant 1 : index
    %c0_29 = arith.constant 0 : index
    %c0_30 = arith.constant 0 : index
    %81 = vector.load %arg4[%c1_28, %c0_29, %c0_30] : memref<12x12x64xf32, #tpu.memory_space<vmem>>, vector<1x12x64xf32>
    %82 = vector.shape_cast %81 : vector<1x12x64xf32> to vector<12x64xf32>
    %83 = vector.extract_strided_slice %70 {offsets = [1, 0], sizes = [1, 64], strides = [1, 1]} : vector<12x64xf32> to vector<1x64xf32>
    %84 = vector.broadcast %83 : vector<1x64xf32> to vector<12x64xf32>
    %85 = arith.mulf %82, %84 : vector<12x64xf32>
    %c1_31 = arith.constant 1 : index
    %c0_32 = arith.constant 0 : index
    %c0_33 = arith.constant 0 : index
    %86 = vector.load %arg5[%c1_31, %c0_32, %c0_33] : memref<12x64x64xf32, #tpu.memory_space<vmem>>, vector<1x64x64xf32>
    %87 = vector.shape_cast %86 : vector<1x64x64xf32> to vector<64x64xf32>
    %cst_34 = arith.constant dense<0.000000e+00> : vector<12x64xf32>
    %88 = tpu.matmul %85, %87, %cst_34 {dimension_numbers = #tpu.dot_dimension_numbers<[1], [0], [0], [1], [0, 0, 1, 1], [], []>} : vector<12x64xf32>, vector<64x64xf32>, vector<12x64xf32> -> vector<12x64xf32>
    %89 = arith.addf %80, %88 : vector<12x64xf32>
    %c2 = arith.constant 2 : index
    %c0_35 = arith.constant 0 : index
    %c0_36 = arith.constant 0 : index
    %90 = vector.load %arg4[%c2, %c0_35, %c0_36] : memref<12x12x64xf32, #tpu.memory_space<vmem>>, vector<1x12x64xf32>
    %91 = vector.shape_cast %90 : vector<1x12x64xf32> to vector<12x64xf32>
    %92 = vector.extract_strided_slice %70 {offsets = [2, 0], sizes = [1, 64], strides = [1, 1]} : vector<12x64xf32> to vector<1x64xf32>
    %93 = vector.broadcast %92 : vector<1x64xf32> to vector<12x64xf32>
    %94 = arith.mulf %91, %93 : vector<12x64xf32>
    %c2_37 = arith.constant 2 : index
    %c0_38 = arith.constant 0 : index
    %c0_39 = arith.constant 0 : index
    %95 = vector.load %arg5[%c2_37, %c0_38, %c0_39] : memref<12x64x64xf32, #tpu.memory_space<vmem>>, vector<1x64x64xf32>
    %96 = vector.shape_cast %95 : vector<1x64x64xf32> to vector<64x64xf32>
    %cst_40 = arith.constant dense<0.000000e+00> : vector<12x64xf32>
    %97 = tpu.matmul %94, %96, %cst_40 {dimension_numbers = #tpu.dot_dimension_numbers<[1], [0], [0], [1], [0, 0, 1, 1], [], []>} : vector<12x64xf32>, vector<64x64xf32>, vector<12x64xf32> -> vector<12x64xf32>
    %98 = arith.addf %89, %97 : vector<12x64xf32>
    %c3 = arith.constant 3 : index
    %c0_41 = arith.constant 0 : index
    %c0_42 = arith.constant 0 : index
    %99 = vector.load %arg4[%c3, %c0_41, %c0_42] : memref<12x12x64xf32, #tpu.memory_space<vmem>>, vector<1x12x64xf32>
    %100 = vector.shape_cast %99 : vector<1x12x64xf32> to vector<12x64xf32>
    %101 = vector.extract_strided_slice %70 {offsets = [3, 0], sizes = [1, 64], strides = [1, 1]} : vector<12x64xf32> to vector<1x64xf32>
    %102 = vector.broadcast %101 : vector<1x64xf32> to vector<12x64xf32>
    %103 = arith.mulf %100, %102 : vector<12x64xf32>
    %c3_43 = arith.constant 3 : index
    %c0_44 = arith.constant 0 : index
    %c0_45 = arith.constant 0 : index
    %104 = vector.load %arg5[%c3_43, %c0_44, %c0_45] : memref<12x64x64xf32, #tpu.memory_space<vmem>>, vector<1x64x64xf32>
    %105 = vector.shape_cast %104 : vector<1x64x64xf32> to vector<64x64xf32>
    %cst_46 = arith.constant dense<0.000000e+00> : vector<12x64xf32>
    %106 = tpu.matmul %103, %105, %cst_46 {dimension_numbers = #tpu.dot_dimension_numbers<[1], [0], [0], [1], [0, 0, 1, 1], [], []>} : vector<12x64xf32>, vector<64x64xf32>, vector<12x64xf32> -> vector<12x64xf32>
    %107 = arith.addf %98, %106 : vector<12x64xf32>
    %c4 = arith.constant 4 : index
    %c0_47 = arith.constant 0 : index
    %c0_48 = arith.constant 0 : index
    %108 = vector.load %arg4[%c4, %c0_47, %c0_48] : memref<12x12x64xf32, #tpu.memory_space<vmem>>, vector<1x12x64xf32>
    %109 = vector.shape_cast %108 : vector<1x12x64xf32> to vector<12x64xf32>
    %110 = vector.extract_strided_slice %70 {offsets = [4, 0], sizes = [1, 64], strides = [1, 1]} : vector<12x64xf32> to vector<1x64xf32>
    %111 = vector.broadcast %110 : vector<1x64xf32> to vector<12x64xf32>
    %112 = arith.mulf %109, %111 : vector<12x64xf32>
    %c4_49 = arith.constant 4 : index
    %c0_50 = arith.constant 0 : index
    %c0_51 = arith.constant 0 : index
    %113 = vector.load %arg5[%c4_49, %c0_50, %c0_51] : memref<12x64x64xf32, #tpu.memory_space<vmem>>, vector<1x64x64xf32>
    %114 = vector.shape_cast %113 : vector<1x64x64xf32> to vector<64x64xf32>
    %cst_52 = arith.constant dense<0.000000e+00> : vector<12x64xf32>
    %115 = tpu.matmul %112, %114, %cst_52 {dimension_numbers = #tpu.dot_dimension_numbers<[1], [0], [0], [1], [0, 0, 1, 1], [], []>} : vector<12x64xf32>, vector<64x64xf32>, vector<12x64xf32> -> vector<12x64xf32>
    %116 = arith.addf %107, %115 : vector<12x64xf32>
    %c5 = arith.constant 5 : index
    %c0_53 = arith.constant 0 : index
    %c0_54 = arith.constant 0 : index
    %117 = vector.load %arg4[%c5, %c0_53, %c0_54] : memref<12x12x64xf32, #tpu.memory_space<vmem>>, vector<1x12x64xf32>
    %118 = vector.shape_cast %117 : vector<1x12x64xf32> to vector<12x64xf32>
    %119 = vector.extract_strided_slice %70 {offsets = [5, 0], sizes = [1, 64], strides = [1, 1]} : vector<12x64xf32> to vector<1x64xf32>
    %120 = vector.broadcast %119 : vector<1x64xf32> to vector<12x64xf32>
    %121 = arith.mulf %118, %120 : vector<12x64xf32>
    %c5_55 = arith.constant 5 : index
    %c0_56 = arith.constant 0 : index
    %c0_57 = arith.constant 0 : index
    %122 = vector.load %arg5[%c5_55, %c0_56, %c0_57] : memref<12x64x64xf32, #tpu.memory_space<vmem>>, vector<1x64x64xf32>
    %123 = vector.shape_cast %122 : vector<1x64x64xf32> to vector<64x64xf32>
    %cst_58 = arith.constant dense<0.000000e+00> : vector<12x64xf32>
    %124 = tpu.matmul %121, %123, %cst_58 {dimension_numbers = #tpu.dot_dimension_numbers<[1], [0], [0], [1], [0, 0, 1, 1], [], []>} : vector<12x64xf32>, vector<64x64xf32>, vector<12x64xf32> -> vector<12x64xf32>
    %125 = arith.addf %116, %124 : vector<12x64xf32>
    %c6 = arith.constant 6 : index
    %c0_59 = arith.constant 0 : index
    %c0_60 = arith.constant 0 : index
    %126 = vector.load %arg4[%c6, %c0_59, %c0_60] : memref<12x12x64xf32, #tpu.memory_space<vmem>>, vector<1x12x64xf32>
    %127 = vector.shape_cast %126 : vector<1x12x64xf32> to vector<12x64xf32>
    %128 = vector.extract_strided_slice %70 {offsets = [6, 0], sizes = [1, 64], strides = [1, 1]} : vector<12x64xf32> to vector<1x64xf32>
    %129 = vector.broadcast %128 : vector<1x64xf32> to vector<12x64xf32>
    %130 = arith.mulf %127, %129 : vector<12x64xf32>
    %c6_61 = arith.constant 6 : index
    %c0_62 = arith.constant 0 : index
    %c0_63 = arith.constant 0 : index
    %131 = vector.load %arg5[%c6_61, %c0_62, %c0_63] : memref<12x64x64xf32, #tpu.memory_space<vmem>>, vector<1x64x64xf32>
    %132 = vector.shape_cast %131 : vector<1x64x64xf32> to vector<64x64xf32>
    %cst_64 = arith.constant dense<0.000000e+00> : vector<12x64xf32>
    %133 = tpu.matmul %130, %132, %cst_64 {dimension_numbers = #tpu.dot_dimension_numbers<[1], [0], [0], [1], [0, 0, 1, 1], [], []>} : vector<12x64xf32>, vector<64x64xf32>, vector<12x64xf32> -> vector<12x64xf32>
    %134 = arith.addf %125, %133 : vector<12x64xf32>
    %c7 = arith.constant 7 : index
    %c0_65 = arith.constant 0 : index
    %c0_66 = arith.constant 0 : index
    %135 = vector.load %arg4[%c7, %c0_65, %c0_66] : memref<12x12x64xf32, #tpu.memory_space<vmem>>, vector<1x12x64xf32>
    %136 = vector.shape_cast %135 : vector<1x12x64xf32> to vector<12x64xf32>
    %137 = vector.extract_strided_slice %70 {offsets = [7, 0], sizes = [1, 64], strides = [1, 1]} : vector<12x64xf32> to vector<1x64xf32>
    %138 = vector.broadcast %137 : vector<1x64xf32> to vector<12x64xf32>
    %139 = arith.mulf %136, %138 : vector<12x64xf32>
    %c7_67 = arith.constant 7 : index
    %c0_68 = arith.constant 0 : index
    %c0_69 = arith.constant 0 : index
    %140 = vector.load %arg5[%c7_67, %c0_68, %c0_69] : memref<12x64x64xf32, #tpu.memory_space<vmem>>, vector<1x64x64xf32>
    %141 = vector.shape_cast %140 : vector<1x64x64xf32> to vector<64x64xf32>
    %cst_70 = arith.constant dense<0.000000e+00> : vector<12x64xf32>
    %142 = tpu.matmul %139, %141, %cst_70 {dimension_numbers = #tpu.dot_dimension_numbers<[1], [0], [0], [1], [0, 0, 1, 1], [], []>} : vector<12x64xf32>, vector<64x64xf32>, vector<12x64xf32> -> vector<12x64xf32>
    %143 = arith.addf %134, %142 : vector<12x64xf32>
    %c8 = arith.constant 8 : index
    %c0_71 = arith.constant 0 : index
    %c0_72 = arith.constant 0 : index
    %144 = vector.load %arg4[%c8, %c0_71, %c0_72] : memref<12x12x64xf32, #tpu.memory_space<vmem>>, vector<1x12x64xf32>
    %145 = vector.shape_cast %144 : vector<1x12x64xf32> to vector<12x64xf32>
    %146 = vector.extract_strided_slice %70 {offsets = [8, 0], sizes = [1, 64], strides = [1, 1]} : vector<12x64xf32> to vector<1x64xf32>
    %147 = vector.broadcast %146 : vector<1x64xf32> to vector<12x64xf32>
    %148 = arith.mulf %145, %147 : vector<12x64xf32>
    %c8_73 = arith.constant 8 : index
    %c0_74 = arith.constant 0 : index
    %c0_75 = arith.constant 0 : index
    %149 = vector.load %arg5[%c8_73, %c0_74, %c0_75] : memref<12x64x64xf32, #tpu.memory_space<vmem>>, vector<1x64x64xf32>
    %150 = vector.shape_cast %149 : vector<1x64x64xf32> to vector<64x64xf32>
    %cst_76 = arith.constant dense<0.000000e+00> : vector<12x64xf32>
    %151 = tpu.matmul %148, %150, %cst_76 {dimension_numbers = #tpu.dot_dimension_numbers<[1], [0], [0], [1], [0, 0, 1, 1], [], []>} : vector<12x64xf32>, vector<64x64xf32>, vector<12x64xf32> -> vector<12x64xf32>
    %152 = arith.addf %143, %151 : vector<12x64xf32>
    %c9 = arith.constant 9 : index
    %c0_77 = arith.constant 0 : index
    %c0_78 = arith.constant 0 : index
    %153 = vector.load %arg4[%c9, %c0_77, %c0_78] : memref<12x12x64xf32, #tpu.memory_space<vmem>>, vector<1x12x64xf32>
    %154 = vector.shape_cast %153 : vector<1x12x64xf32> to vector<12x64xf32>
    %155 = vector.extract_strided_slice %70 {offsets = [9, 0], sizes = [1, 64], strides = [1, 1]} : vector<12x64xf32> to vector<1x64xf32>
    %156 = vector.broadcast %155 : vector<1x64xf32> to vector<12x64xf32>
    %157 = arith.mulf %154, %156 : vector<12x64xf32>
    %c9_79 = arith.constant 9 : index
    %c0_80 = arith.constant 0 : index
    %c0_81 = arith.constant 0 : index
    %158 = vector.load %arg5[%c9_79, %c0_80, %c0_81] : memref<12x64x64xf32, #tpu.memory_space<vmem>>, vector<1x64x64xf32>
    %159 = vector.shape_cast %158 : vector<1x64x64xf32> to vector<64x64xf32>
    %cst_82 = arith.constant dense<0.000000e+00> : vector<12x64xf32>
    %160 = tpu.matmul %157, %159, %cst_82 {dimension_numbers = #tpu.dot_dimension_numbers<[1], [0], [0], [1], [0, 0, 1, 1], [], []>} : vector<12x64xf32>, vector<64x64xf32>, vector<12x64xf32> -> vector<12x64xf32>
    %161 = arith.addf %152, %160 : vector<12x64xf32>
    %c10 = arith.constant 10 : index
    %c0_83 = arith.constant 0 : index
    %c0_84 = arith.constant 0 : index
    %162 = vector.load %arg4[%c10, %c0_83, %c0_84] : memref<12x12x64xf32, #tpu.memory_space<vmem>>, vector<1x12x64xf32>
    %163 = vector.shape_cast %162 : vector<1x12x64xf32> to vector<12x64xf32>
    %164 = vector.extract_strided_slice %70 {offsets = [10, 0], sizes = [1, 64], strides = [1, 1]} : vector<12x64xf32> to vector<1x64xf32>
    %165 = vector.broadcast %164 : vector<1x64xf32> to vector<12x64xf32>
    %166 = arith.mulf %163, %165 : vector<12x64xf32>
    %c10_85 = arith.constant 10 : index
    %c0_86 = arith.constant 0 : index
    %c0_87 = arith.constant 0 : index
    %167 = vector.load %arg5[%c10_85, %c0_86, %c0_87] : memref<12x64x64xf32, #tpu.memory_space<vmem>>, vector<1x64x64xf32>
    %168 = vector.shape_cast %167 : vector<1x64x64xf32> to vector<64x64xf32>
    %cst_88 = arith.constant dense<0.000000e+00> : vector<12x64xf32>
    %169 = tpu.matmul %166, %168, %cst_88 {dimension_numbers = #tpu.dot_dimension_numbers<[1], [0], [0], [1], [0, 0, 1, 1], [], []>} : vector<12x64xf32>, vector<64x64xf32>, vector<12x64xf32> -> vector<12x64xf32>
    %170 = arith.addf %161, %169 : vector<12x64xf32>
    %c11 = arith.constant 11 : index
    %c0_89 = arith.constant 0 : index
    %c0_90 = arith.constant 0 : index
    %171 = vector.load %arg4[%c11, %c0_89, %c0_90] : memref<12x12x64xf32, #tpu.memory_space<vmem>>, vector<1x12x64xf32>
    %172 = vector.shape_cast %171 : vector<1x12x64xf32> to vector<12x64xf32>
    %173 = vector.extract_strided_slice %70 {offsets = [11, 0], sizes = [1, 64], strides = [1, 1]} : vector<12x64xf32> to vector<1x64xf32>
    %174 = vector.broadcast %173 : vector<1x64xf32> to vector<12x64xf32>
    %175 = arith.mulf %172, %174 : vector<12x64xf32>
    %c11_91 = arith.constant 11 : index
    %c0_92 = arith.constant 0 : index
    %c0_93 = arith.constant 0 : index
    %176 = vector.load %arg5[%c11_91, %c0_92, %c0_93] : memref<12x64x64xf32, #tpu.memory_space<vmem>>, vector<1x64x64xf32>
    %177 = vector.shape_cast %176 : vector<1x64x64xf32> to vector<64x64xf32>
    %cst_94 = arith.constant dense<0.000000e+00> : vector<12x64xf32>
    %178 = tpu.matmul %175, %177, %cst_94 {dimension_numbers = #tpu.dot_dimension_numbers<[1], [0], [0], [1], [0, 0, 1, 1], [], []>} : vector<12x64xf32>, vector<64x64xf32>, vector<12x64xf32> -> vector<12x64xf32>
    %179 = arith.addf %170, %178 : vector<12x64xf32>
    %180 = vector.broadcast %2 : vector<12x1xf32> to vector<12x64xf32>
    %181 = arith.addf %179, %180 : vector<12x64xf32>
    %c0_95 = arith.constant 0 : index
    %c0_96 = arith.constant 0 : index
    %c0_97 = arith.constant 0 : index
    %182 = vector.load %arg7[%c0_95, %c0_96, %c0_97] : memref<2x12x64xf32, #tpu.memory_space<vmem>>, vector<1x12x64xf32>
    %183 = vector.shape_cast %182 : vector<1x12x64xf32> to vector<12x64xf32>
    %184 = vector.shape_cast %181 : vector<12x64xf32> to vector<1x12x64xf32>
    tpu.vector_store %arg7[%c0_95, %c0_96, %c0_97], %184 {strides = array<i32>} : memref<2x12x64xf32, #tpu.memory_space<vmem>>, vector<1x12x64xf32>,
    %185 = vector.extract_strided_slice %11 {offsets = [0, 64], sizes = [36, 64], strides = [1, 1]} : vector<36x128xf32> to vector<36x64xf32>
    %186 = vector.extract_strided_slice %185 {offsets = [0, 0], sizes = [12, 64], strides = [1, 1]} : vector<36x64xf32> to vector<12x64xf32>
    %187 = vector.extract_strided_slice %185 {offsets = [12, 0], sizes = [12, 64], strides = [1, 1]} : vector<36x64xf32> to vector<12x64xf32>
    %188 = vector.extract_strided_slice %185 {offsets = [24, 0], sizes = [12, 64], strides = [1, 1]} : vector<36x64xf32> to vector<12x64xf32>
    %189 = vector.extract_strided_slice %186 {offsets = [0, 0], sizes = [3, 64], strides = [1, 1]} : vector<12x64xf32> to vector<3x64xf32>
    %190 = vector.extract_strided_slice %187 {offsets = [0, 0], sizes = [3, 64], strides = [1, 1]} : vector<12x64xf32> to vector<3x64xf32>
    %cst_98 = arith.constant dense<0.000000e+00> : vector<64x64xf32>
    %191 = tpu.matmul %189, %190, %cst_98 {dimension_numbers = #tpu.dot_dimension_numbers<[0], [0], [1], [1], [0, 1, 1, 1], [], []>} : vector<3x64xf32>, vector<3x64xf32>, vector<64x64xf32> -> vector<64x64xf32>
    %192 = vector.extract_strided_slice %186 {offsets = [3, 0], sizes = [3, 64], strides = [1, 1]} : vector<12x64xf32> to vector<3x64xf32>
    %193 = vector.extract_strided_slice %187 {offsets = [3, 0], sizes = [3, 64], strides = [1, 1]} : vector<12x64xf32> to vector<3x64xf32>
    %cst_99 = arith.constant dense<0.000000e+00> : vector<64x64xf32>
    %194 = tpu.matmul %192, %193, %cst_99 {dimension_numbers = #tpu.dot_dimension_numbers<[0], [0], [1], [1], [0, 1, 1, 1], [], []>} : vector<3x64xf32>, vector<3x64xf32>, vector<64x64xf32> -> vector<64x64xf32>
    %195 = vector.extract_strided_slice %186 {offsets = [6, 0], sizes = [3, 64], strides = [1, 1]} : vector<12x64xf32> to vector<3x64xf32>
    %196 = vector.extract_strided_slice %187 {offsets = [6, 0], sizes = [3, 64], strides = [1, 1]} : vector<12x64xf32> to vector<3x64xf32>
    %cst_100 = arith.constant dense<0.000000e+00> : vector<64x64xf32>
    %197 = tpu.matmul %195, %196, %cst_100 {dimension_numbers = #tpu.dot_dimension_numbers<[0], [0], [1], [1], [0, 1, 1, 1], [], []>} : vector<3x64xf32>, vector<3x64xf32>, vector<64x64xf32> -> vector<64x64xf32>
    %198 = vector.extract_strided_slice %186 {offsets = [9, 0], sizes = [3, 64], strides = [1, 1]} : vector<12x64xf32> to vector<3x64xf32>
    %199 = vector.extract_strided_slice %187 {offsets = [9, 0], sizes = [3, 64], strides = [1, 1]} : vector<12x64xf32> to vector<3x64xf32>
    %cst_101 = arith.constant dense<0.000000e+00> : vector<64x64xf32>
    %200 = tpu.matmul %198, %199, %cst_101 {dimension_numbers = #tpu.dot_dimension_numbers<[0], [0], [1], [1], [0, 1, 1, 1], [], []>} : vector<3x64xf32>, vector<3x64xf32>, vector<64x64xf32> -> vector<64x64xf32>
    %201 = tpu.concatenate %191, %194, %197, %200 in 0 : vector<64x64xf32>, vector<64x64xf32>, vector<64x64xf32>, vector<64x64xf32> -> vector<256x64xf32>
    %cst_102 = arith.constant dense<0xFF800000> : vector<256xf32>
    %202 = vector.multi_reduction <maximumf>, %201, %cst_102 [1] : vector<256x64xf32> to vector<256xf32>
    %203 = vector.shape_cast %202 : vector<256xf32> to vector<256x1xf32>
    %204 = vector.broadcast %203 : vector<256x1xf32> to vector<256x64xf32>
    %205 = arith.subf %201, %204 : vector<256x64xf32>
    %206 = math.exp %205 : vector<256x64xf32>
    %207 = vector.extract_strided_slice %188 {offsets = [0, 0], sizes = [3, 64], strides = [1, 1]} : vector<12x64xf32> to vector<3x64xf32>
    %208 = tpu.concatenate %207, %3 in 0 : vector<3x64xf32>, vector<1x64xf32> -> vector<4x64xf32>
    %209 = vector.extract_strided_slice %206 {offsets = [0, 0], sizes = [64, 64], strides = [1, 1]} : vector<256x64xf32> to vector<64x64xf32>
    %cst_103 = arith.constant dense<0.000000e+00> : vector<4x64xf32>
    %210 = tpu.matmul %208, %209, %cst_103 {dimension_numbers = #tpu.dot_dimension_numbers<[1], [1], [0], [0], [0, 0, 1, 0], [], []>} : vector<4x64xf32>, vector<64x64xf32>, vector<4x64xf32> -> vector<4x64xf32>
    %211 = vector.extract_strided_slice %210 {offsets = [3, 0], sizes = [1, 64], strides = [1, 1]} : vector<4x64xf32> to vector<1x64xf32>
    %212 = tpu.reciprocal %211 : vector<1x64xf32> -> vector<1x64xf32>
    %213 = vector.extract_strided_slice %210 {offsets = [0, 0], sizes = [3, 64], strides = [1, 1]} : vector<4x64xf32> to vector<3x64xf32>
    %214 = vector.broadcast %212 : vector<1x64xf32> to vector<3x64xf32>
    %215 = arith.mulf %213, %214 : vector<3x64xf32>
    %216 = vector.extract_strided_slice %188 {offsets = [3, 0], sizes = [3, 64], strides = [1, 1]} : vector<12x64xf32> to vector<3x64xf32>
    %217 = tpu.concatenate %216, %3 in 0 : vector<3x64xf32>, vector<1x64xf32> -> vector<4x64xf32>
    %218 = vector.extract_strided_slice %206 {offsets = [64, 0], sizes = [64, 64], strides = [1, 1]} : vector<256x64xf32> to vector<64x64xf32>
    %cst_104 = arith.constant dense<0.000000e+00> : vector<4x64xf32>
    %219 = tpu.matmul %217, %218, %cst_104 {dimension_numbers = #tpu.dot_dimension_numbers<[1], [1], [0], [0], [0, 0, 1, 0], [], []>} : vector<4x64xf32>, vector<64x64xf32>, vector<4x64xf32> -> vector<4x64xf32>
    %220 = vector.extract_strided_slice %219 {offsets = [3, 0], sizes = [1, 64], strides = [1, 1]} : vector<4x64xf32> to vector<1x64xf32>
    %221 = tpu.reciprocal %220 : vector<1x64xf32> -> vector<1x64xf32>
    %222 = vector.extract_strided_slice %219 {offsets = [0, 0], sizes = [3, 64], strides = [1, 1]} : vector<4x64xf32> to vector<3x64xf32>
    %223 = vector.broadcast %221 : vector<1x64xf32> to vector<3x64xf32>
    %224 = arith.mulf %222, %223 : vector<3x64xf32>
    %225 = vector.extract_strided_slice %188 {offsets = [6, 0], sizes = [3, 64], strides = [1, 1]} : vector<12x64xf32> to vector<3x64xf32>
    %226 = tpu.concatenate %225, %3 in 0 : vector<3x64xf32>, vector<1x64xf32> -> vector<4x64xf32>
    %227 = vector.extract_strided_slice %206 {offsets = [128, 0], sizes = [64, 64], strides = [1, 1]} : vector<256x64xf32> to vector<64x64xf32>
    %cst_105 = arith.constant dense<0.000000e+00> : vector<4x64xf32>
    %228 = tpu.matmul %226, %227, %cst_105 {dimension_numbers = #tpu.dot_dimension_numbers<[1], [1], [0], [0], [0, 0, 1, 0], [], []>} : vector<4x64xf32>, vector<64x64xf32>, vector<4x64xf32> -> vector<4x64xf32>
    %229 = vector.extract_strided_slice %228 {offsets = [3, 0], sizes = [1, 64], strides = [1, 1]} : vector<4x64xf32> to vector<1x64xf32>
    %230 = tpu.reciprocal %229 : vector<1x64xf32> -> vector<1x64xf32>
    %231 = vector.extract_strided_slice %228 {offsets = [0, 0], sizes = [3, 64], strides = [1, 1]} : vector<4x64xf32> to vector<3x64xf32>
    %232 = vector.broadcast %230 : vector<1x64xf32> to vector<3x64xf32>
    %233 = arith.mulf %231, %232 : vector<3x64xf32>
    %234 = vector.extract_strided_slice %188 {offsets = [9, 0], sizes = [3, 64], strides = [1, 1]} : vector<12x64xf32> to vector<3x64xf32>
    %235 = tpu.concatenate %234, %3 in 0 : vector<3x64xf32>, vector<1x64xf32> -> vector<4x64xf32>
    %236 = vector.extract_strided_slice %206 {offsets = [192, 0], sizes = [64, 64], strides = [1, 1]} : vector<256x64xf32> to vector<64x64xf32>
    %cst_106 = arith.constant dense<0.000000e+00> : vector<4x64xf32>
    %237 = tpu.matmul %235, %236, %cst_106 {dimension_numbers = #tpu.dot_dimension_numbers<[1], [1], [0], [0], [0, 0, 1, 0], [], []>} : vector<4x64xf32>, vector<64x64xf32>, vector<4x64xf32> -> vector<4x64xf32>
    %238 = vector.extract_strided_slice %237 {offsets = [3, 0], sizes = [1, 64], strides = [1, 1]} : vector<4x64xf32> to vector<1x64xf32>
    %239 = tpu.reciprocal %238 : vector<1x64xf32> -> vector<1x64xf32>
    %240 = vector.extract_strided_slice %237 {offsets = [0, 0], sizes = [3, 64], strides = [1, 1]} : vector<4x64xf32> to vector<3x64xf32>
    %241 = vector.broadcast %239 : vector<1x64xf32> to vector<3x64xf32>
    %242 = arith.mulf %240, %241 : vector<3x64xf32>
    %243 = tpu.concatenate %215, %224, %233, %242 in 0 : vector<3x64xf32>, vector<3x64xf32>, vector<3x64xf32>, vector<3x64xf32> -> vector<12x64xf32>
    %cst_107 = arith.constant 0.000000e+00 : f32
    %244 = vector.broadcast %cst_107 : f32 to vector<12x64xf32>
    %c0_108 = arith.constant 0 : index
    %c0_109 = arith.constant 0 : index
    %c0_110 = arith.constant 0 : index
    %245 = vector.load %arg4[%c0_108, %c0_109, %c0_110] : memref<12x12x64xf32, #tpu.memory_space<vmem>>, vector<1x12x64xf32>
    %246 = vector.shape_cast %245 : vector<1x12x64xf32> to vector<12x64xf32>
    %247 = vector.extract_strided_slice %243 {offsets = [0, 0], sizes = [1, 64], strides = [1, 1]} : vector<12x64xf32> to vector<1x64xf32>
    %248 = vector.broadcast %247 : vector<1x64xf32> to vector<12x64xf32>
    %249 = arith.mulf %246, %248 : vector<12x64xf32>
    %c0_111 = arith.constant 0 : index
    %c0_112 = arith.constant 0 : index
    %c0_113 = arith.constant 0 : index
    %250 = vector.load %arg5[%c0_111, %c0_112, %c0_113] : memref<12x64x64xf32, #tpu.memory_space<vmem>>, vector<1x64x64xf32>
    %251 = vector.shape_cast %250 : vector<1x64x64xf32> to vector<64x64xf32>
    %cst_114 = arith.constant dense<0.000000e+00> : vector<12x64xf32>
    %252 = tpu.matmul %249, %251, %cst_114 {dimension_numbers = #tpu.dot_dimension_numbers<[1], [0], [0], [1], [0, 0, 1, 1], [], []>} : vector<12x64xf32>, vector<64x64xf32>, vector<12x64xf32> -> vector<12x64xf32>
    %253 = arith.addf %244, %252 : vector<12x64xf32>
    %c1_115 = arith.constant 1 : index
    %c0_116 = arith.constant 0 : index
    %c0_117 = arith.constant 0 : index
    %254 = vector.load %arg4[%c1_115, %c0_116, %c0_117] : memref<12x12x64xf32, #tpu.memory_space<vmem>>, vector<1x12x64xf32>
    %255 = vector.shape_cast %254 : vector<1x12x64xf32> to vector<12x64xf32>
    %256 = vector.extract_strided_slice %243 {offsets = [1, 0], sizes = [1, 64], strides = [1, 1]} : vector<12x64xf32> to vector<1x64xf32>
    %257 = vector.broadcast %256 : vector<1x64xf32> to vector<12x64xf32>
    %258 = arith.mulf %255, %257 : vector<12x64xf32>
    %c1_118 = arith.constant 1 : index
    %c0_119 = arith.constant 0 : index
    %c0_120 = arith.constant 0 : index
    %259 = vector.load %arg5[%c1_118, %c0_119, %c0_120] : memref<12x64x64xf32, #tpu.memory_space<vmem>>, vector<1x64x64xf32>
    %260 = vector.shape_cast %259 : vector<1x64x64xf32> to vector<64x64xf32>
    %cst_121 = arith.constant dense<0.000000e+00> : vector<12x64xf32>
    %261 = tpu.matmul %258, %260, %cst_121 {dimension_numbers = #tpu.dot_dimension_numbers<[1], [0], [0], [1], [0, 0, 1, 1], [], []>} : vector<12x64xf32>, vector<64x64xf32>, vector<12x64xf32> -> vector<12x64xf32>
    %262 = arith.addf %253, %261 : vector<12x64xf32>
    %c2_122 = arith.constant 2 : index
    %c0_123 = arith.constant 0 : index
    %c0_124 = arith.constant 0 : index
    %263 = vector.load %arg4[%c2_122, %c0_123, %c0_124] : memref<12x12x64xf32, #tpu.memory_space<vmem>>, vector<1x12x64xf32>
    %264 = vector.shape_cast %263 : vector<1x12x64xf32> to vector<12x64xf32>
    %265 = vector.extract_strided_slice %243 {offsets = [2, 0], sizes = [1, 64], strides = [1, 1]} : vector<12x64xf32> to vector<1x64xf32>
    %266 = vector.broadcast %265 : vector<1x64xf32> to vector<12x64xf32>
    %267 = arith.mulf %264, %266 : vector<12x64xf32>
    %c2_125 = arith.constant 2 : index
    %c0_126 = arith.constant 0 : index
    %c0_127 = arith.constant 0 : index
    %268 = vector.load %arg5[%c2_125, %c0_126, %c0_127] : memref<12x64x64xf32, #tpu.memory_space<vmem>>, vector<1x64x64xf32>
    %269 = vector.shape_cast %268 : vector<1x64x64xf32> to vector<64x64xf32>
    %cst_128 = arith.constant dense<0.000000e+00> : vector<12x64xf32>
    %270 = tpu.matmul %267, %269, %cst_128 {dimension_numbers = #tpu.dot_dimension_numbers<[1], [0], [0], [1], [0, 0, 1, 1], [], []>} : vector<12x64xf32>, vector<64x64xf32>, vector<12x64xf32> -> vector<12x64xf32>
    %271 = arith.addf %262, %270 : vector<12x64xf32>
    %c3_129 = arith.constant 3 : index
    %c0_130 = arith.constant 0 : index
    %c0_131 = arith.constant 0 : index
    %272 = vector.load %arg4[%c3_129, %c0_130, %c0_131] : memref<12x12x64xf32, #tpu.memory_space<vmem>>, vector<1x12x64xf32>
    %273 = vector.shape_cast %272 : vector<1x12x64xf32> to vector<12x64xf32>
    %274 = vector.extract_strided_slice %243 {offsets = [3, 0], sizes = [1, 64], strides = [1, 1]} : vector<12x64xf32> to vector<1x64xf32>
    %275 = vector.broadcast %274 : vector<1x64xf32> to vector<12x64xf32>
    %276 = arith.mulf %273, %275 : vector<12x64xf32>
    %c3_132 = arith.constant 3 : index
    %c0_133 = arith.constant 0 : index
    %c0_134 = arith.constant 0 : index
    %277 = vector.load %arg5[%c3_132, %c0_133, %c0_134] : memref<12x64x64xf32, #tpu.memory_space<vmem>>, vector<1x64x64xf32>
    %278 = vector.shape_cast %277 : vector<1x64x64xf32> to vector<64x64xf32>
    %cst_135 = arith.constant dense<0.000000e+00> : vector<12x64xf32>
    %279 = tpu.matmul %276, %278, %cst_135 {dimension_numbers = #tpu.dot_dimension_numbers<[1], [0], [0], [1], [0, 0, 1, 1], [], []>} : vector<12x64xf32>, vector<64x64xf32>, vector<12x64xf32> -> vector<12x64xf32>
    %280 = arith.addf %271, %279 : vector<12x64xf32>
    %c4_136 = arith.constant 4 : index
    %c0_137 = arith.constant 0 : index
    %c0_138 = arith.constant 0 : index
    %281 = vector.load %arg4[%c4_136, %c0_137, %c0_138] : memref<12x12x64xf32, #tpu.memory_space<vmem>>, vector<1x12x64xf32>
    %282 = vector.shape_cast %281 : vector<1x12x64xf32> to vector<12x64xf32>
    %283 = vector.extract_strided_slice %243 {offsets = [4, 0], sizes = [1, 64], strides = [1, 1]} : vector<12x64xf32> to vector<1x64xf32>
    %284 = vector.broadcast %283 : vector<1x64xf32> to vector<12x64xf32>
    %285 = arith.mulf %282, %284 : vector<12x64xf32>
    %c4_139 = arith.constant 4 : index
    %c0_140 = arith.constant 0 : index
    %c0_141 = arith.constant 0 : index
    %286 = vector.load %arg5[%c4_139, %c0_140, %c0_141] : memref<12x64x64xf32, #tpu.memory_space<vmem>>, vector<1x64x64xf32>
    %287 = vector.shape_cast %286 : vector<1x64x64xf32> to vector<64x64xf32>
    %cst_142 = arith.constant dense<0.000000e+00> : vector<12x64xf32>
    %288 = tpu.matmul %285, %287, %cst_142 {dimension_numbers = #tpu.dot_dimension_numbers<[1], [0], [0], [1], [0, 0, 1, 1], [], []>} : vector<12x64xf32>, vector<64x64xf32>, vector<12x64xf32> -> vector<12x64xf32>
    %289 = arith.addf %280, %288 : vector<12x64xf32>
    %c5_143 = arith.constant 5 : index
    %c0_144 = arith.constant 0 : index
    %c0_145 = arith.constant 0 : index
    %290 = vector.load %arg4[%c5_143, %c0_144, %c0_145] : memref<12x12x64xf32, #tpu.memory_space<vmem>>, vector<1x12x64xf32>
    %291 = vector.shape_cast %290 : vector<1x12x64xf32> to vector<12x64xf32>
    %292 = vector.extract_strided_slice %243 {offsets = [5, 0], sizes = [1, 64], strides = [1, 1]} : vector<12x64xf32> to vector<1x64xf32>
    %293 = vector.broadcast %292 : vector<1x64xf32> to vector<12x64xf32>
    %294 = arith.mulf %291, %293 : vector<12x64xf32>
    %c5_146 = arith.constant 5 : index
    %c0_147 = arith.constant 0 : index
    %c0_148 = arith.constant 0 : index
    %295 = vector.load %arg5[%c5_146, %c0_147, %c0_148] : memref<12x64x64xf32, #tpu.memory_space<vmem>>, vector<1x64x64xf32>
    %296 = vector.shape_cast %295 : vector<1x64x64xf32> to vector<64x64xf32>
    %cst_149 = arith.constant dense<0.000000e+00> : vector<12x64xf32>
    %297 = tpu.matmul %294, %296, %cst_149 {dimension_numbers = #tpu.dot_dimension_numbers<[1], [0], [0], [1], [0, 0, 1, 1], [], []>} : vector<12x64xf32>, vector<64x64xf32>, vector<12x64xf32> -> vector<12x64xf32>
    %298 = arith.addf %289, %297 : vector<12x64xf32>
    %c6_150 = arith.constant 6 : index
    %c0_151 = arith.constant 0 : index
    %c0_152 = arith.constant 0 : index
    %299 = vector.load %arg4[%c6_150, %c0_151, %c0_152] : memref<12x12x64xf32, #tpu.memory_space<vmem>>, vector<1x12x64xf32>
    %300 = vector.shape_cast %299 : vector<1x12x64xf32> to vector<12x64xf32>
    %301 = vector.extract_strided_slice %243 {offsets = [6, 0], sizes = [1, 64], strides = [1, 1]} : vector<12x64xf32> to vector<1x64xf32>
    %302 = vector.broadcast %301 : vector<1x64xf32> to vector<12x64xf32>
    %303 = arith.mulf %300, %302 : vector<12x64xf32>
    %c6_153 = arith.constant 6 : index
    %c0_154 = arith.constant 0 : index
    %c0_155 = arith.constant 0 : index
    %304 = vector.load %arg5[%c6_153, %c0_154, %c0_155] : memref<12x64x64xf32, #tpu.memory_space<vmem>>, vector<1x64x64xf32>
    %305 = vector.shape_cast %304 : vector<1x64x64xf32> to vector<64x64xf32>
    %cst_156 = arith.constant dense<0.000000e+00> : vector<12x64xf32>
    %306 = tpu.matmul %303, %305, %cst_156 {dimension_numbers = #tpu.dot_dimension_numbers<[1], [0], [0], [1], [0, 0, 1, 1], [], []>} : vector<12x64xf32>, vector<64x64xf32>, vector<12x64xf32> -> vector<12x64xf32>
    %307 = arith.addf %298, %306 : vector<12x64xf32>
    %c7_157 = arith.constant 7 : index
    %c0_158 = arith.constant 0 : index
    %c0_159 = arith.constant 0 : index
    %308 = vector.load %arg4[%c7_157, %c0_158, %c0_159] : memref<12x12x64xf32, #tpu.memory_space<vmem>>, vector<1x12x64xf32>
    %309 = vector.shape_cast %308 : vector<1x12x64xf32> to vector<12x64xf32>
    %310 = vector.extract_strided_slice %243 {offsets = [7, 0], sizes = [1, 64], strides = [1, 1]} : vector<12x64xf32> to vector<1x64xf32>
    %311 = vector.broadcast %310 : vector<1x64xf32> to vector<12x64xf32>
    %312 = arith.mulf %309, %311 : vector<12x64xf32>
    %c7_160 = arith.constant 7 : index
    %c0_161 = arith.constant 0 : index
    %c0_162 = arith.constant 0 : index
    %313 = vector.load %arg5[%c7_160, %c0_161, %c0_162] : memref<12x64x64xf32, #tpu.memory_space<vmem>>, vector<1x64x64xf32>
    %314 = vector.shape_cast %313 : vector<1x64x64xf32> to vector<64x64xf32>
    %cst_163 = arith.constant dense<0.000000e+00> : vector<12x64xf32>
    %315 = tpu.matmul %312, %314, %cst_163 {dimension_numbers = #tpu.dot_dimension_numbers<[1], [0], [0], [1], [0, 0, 1, 1], [], []>} : vector<12x64xf32>, vector<64x64xf32>, vector<12x64xf32> -> vector<12x64xf32>
    %316 = arith.addf %307, %315 : vector<12x64xf32>
    %c8_164 = arith.constant 8 : index
    %c0_165 = arith.constant 0 : index
    %c0_166 = arith.constant 0 : index
    %317 = vector.load %arg4[%c8_164, %c0_165, %c0_166] : memref<12x12x64xf32, #tpu.memory_space<vmem>>, vector<1x12x64xf32>
    %318 = vector.shape_cast %317 : vector<1x12x64xf32> to vector<12x64xf32>
    %319 = vector.extract_strided_slice %243 {offsets = [8, 0], sizes = [1, 64], strides = [1, 1]} : vector<12x64xf32> to vector<1x64xf32>
    %320 = vector.broadcast %319 : vector<1x64xf32> to vector<12x64xf32>
    %321 = arith.mulf %318, %320 : vector<12x64xf32>
    %c8_167 = arith.constant 8 : index
    %c0_168 = arith.constant 0 : index
    %c0_169 = arith.constant 0 : index
    %322 = vector.load %arg5[%c8_167, %c0_168, %c0_169] : memref<12x64x64xf32, #tpu.memory_space<vmem>>, vector<1x64x64xf32>
    %323 = vector.shape_cast %322 : vector<1x64x64xf32> to vector<64x64xf32>
    %cst_170 = arith.constant dense<0.000000e+00> : vector<12x64xf32>
    %324 = tpu.matmul %321, %323, %cst_170 {dimension_numbers = #tpu.dot_dimension_numbers<[1], [0], [0], [1], [0, 0, 1, 1], [], []>} : vector<12x64xf32>, vector<64x64xf32>, vector<12x64xf32> -> vector<12x64xf32>
    %325 = arith.addf %316, %324 : vector<12x64xf32>
    %c9_171 = arith.constant 9 : index
    %c0_172 = arith.constant 0 : index
    %c0_173 = arith.constant 0 : index
    %326 = vector.load %arg4[%c9_171, %c0_172, %c0_173] : memref<12x12x64xf32, #tpu.memory_space<vmem>>, vector<1x12x64xf32>
    %327 = vector.shape_cast %326 : vector<1x12x64xf32> to vector<12x64xf32>
    %328 = vector.extract_strided_slice %243 {offsets = [9, 0], sizes = [1, 64], strides = [1, 1]} : vector<12x64xf32> to vector<1x64xf32>
    %329 = vector.broadcast %328 : vector<1x64xf32> to vector<12x64xf32>
    %330 = arith.mulf %327, %329 : vector<12x64xf32>
    %c9_174 = arith.constant 9 : index
    %c0_175 = arith.constant 0 : index
    %c0_176 = arith.constant 0 : index
    %331 = vector.load %arg5[%c9_174, %c0_175, %c0_176] : memref<12x64x64xf32, #tpu.memory_space<vmem>>, vector<1x64x64xf32>
    %332 = vector.shape_cast %331 : vector<1x64x64xf32> to vector<64x64xf32>
    %cst_177 = arith.constant dense<0.000000e+00> : vector<12x64xf32>
    %333 = tpu.matmul %330, %332, %cst_177 {dimension_numbers = #tpu.dot_dimension_numbers<[1], [0], [0], [1], [0, 0, 1, 1], [], []>} : vector<12x64xf32>, vector<64x64xf32>, vector<12x64xf32> -> vector<12x64xf32>
    %334 = arith.addf %325, %333 : vector<12x64xf32>
    %c10_178 = arith.constant 10 : index
    %c0_179 = arith.constant 0 : index
    %c0_180 = arith.constant 0 : index
    %335 = vector.load %arg4[%c10_178, %c0_179, %c0_180] : memref<12x12x64xf32, #tpu.memory_space<vmem>>, vector<1x12x64xf32>
    %336 = vector.shape_cast %335 : vector<1x12x64xf32> to vector<12x64xf32>
    %337 = vector.extract_strided_slice %243 {offsets = [10, 0], sizes = [1, 64], strides = [1, 1]} : vector<12x64xf32> to vector<1x64xf32>
    %338 = vector.broadcast %337 : vector<1x64xf32> to vector<12x64xf32>
    %339 = arith.mulf %336, %338 : vector<12x64xf32>
    %c10_181 = arith.constant 10 : index
    %c0_182 = arith.constant 0 : index
    %c0_183 = arith.constant 0 : index
    %340 = vector.load %arg5[%c10_181, %c0_182, %c0_183] : memref<12x64x64xf32, #tpu.memory_space<vmem>>, vector<1x64x64xf32>
    %341 = vector.shape_cast %340 : vector<1x64x64xf32> to vector<64x64xf32>
    %cst_184 = arith.constant dense<0.000000e+00> : vector<12x64xf32>
    %342 = tpu.matmul %339, %341, %cst_184 {dimension_numbers = #tpu.dot_dimension_numbers<[1], [0], [0], [1], [0, 0, 1, 1], [], []>} : vector<12x64xf32>, vector<64x64xf32>, vector<12x64xf32> -> vector<12x64xf32>
    %343 = arith.addf %334, %342 : vector<12x64xf32>
    %c11_185 = arith.constant 11 : index
    %c0_186 = arith.constant 0 : index
    %c0_187 = arith.constant 0 : index
    %344 = vector.load %arg4[%c11_185, %c0_186, %c0_187] : memref<12x12x64xf32, #tpu.memory_space<vmem>>, vector<1x12x64xf32>
    %345 = vector.shape_cast %344 : vector<1x12x64xf32> to vector<12x64xf32>
    %346 = vector.extract_strided_slice %243 {offsets = [11, 0], sizes = [1, 64], strides = [1, 1]} : vector<12x64xf32> to vector<1x64xf32>
    %347 = vector.broadcast %346 : vector<1x64xf32> to vector<12x64xf32>
    %348 = arith.mulf %345, %347 : vector<12x64xf32>
    %c11_188 = arith.constant 11 : index
    %c0_189 = arith.constant 0 : index
    %c0_190 = arith.constant 0 : index
    %349 = vector.load %arg5[%c11_188, %c0_189, %c0_190] : memref<12x64x64xf32, #tpu.memory_space<vmem>>, vector<1x64x64xf32>
    %350 = vector.shape_cast %349 : vector<1x64x64xf32> to vector<64x64xf32>
    %cst_191 = arith.constant dense<0.000000e+00> : vector<12x64xf32>
    %351 = tpu.matmul %348, %350, %cst_191 {dimension_numbers = #tpu.dot_dimension_numbers<[1], [0], [0], [1], [0, 0, 1, 1], [], []>} : vector<12x64xf32>, vector<64x64xf32>, vector<12x64xf32> -> vector<12x64xf32>
    %352 = arith.addf %343, %351 : vector<12x64xf32>
    %353 = vector.broadcast %2 : vector<12x1xf32> to vector<12x64xf32>
    %354 = arith.addf %352, %353 : vector<12x64xf32>
    %c1_192 = arith.constant 1 : index
    %c0_193 = arith.constant 0 : index
    %c0_194 = arith.constant 0 : index
    %355 = vector.load %arg7[%c1_192, %c0_193, %c0_194] : memref<2x12x64xf32, #tpu.memory_space<vmem>>, vector<1x12x64xf32>
    %356 = vector.shape_cast %355 : vector<1x12x64xf32> to vector<12x64xf32>
    %357 = vector.shape_cast %354 : vector<12x64xf32> to vector<1x12x64xf32>
    tpu.vector_store %arg7[%c1_192, %c0_193, %c0_194], %357 {strides = array<i32>} : memref<2x12x64xf32, #tpu.memory_space<vmem>>, vector<1x12x64xf32>,
    return
  }
  func.func @transform_0(%arg0: i32) -> (i32, i32, i32) {
    %c0_i32 = arith.constant 0 : i32
    %c0_i32_0 = arith.constant 0 : i32
    %c0_i32_1 = arith.constant 0 : i32
    return %arg0, %c0_i32, %c0_i32_0 : i32, i32, i32
  }
  func.func @transform_1(%arg0: i32) -> (i32, i32) {
    %c0_i32 = arith.constant 0 : i32
    %c0_i32_0 = arith.constant 0 : i32
    %c0_i32_1 = arith.constant 0 : i32
    return %c0_i32, %c0_i32_0 : i32, i32
  }
  func.func @transform_2(%arg0: i32) -> (i32, i32) {
    %c0_i32 = arith.constant 0 : i32
    %c0_i32_0 = arith.constant 0 : i32
    %c0_i32_1 = arith.constant 0 : i32
    return %c0_i32, %c0_i32_0 : i32, i32
  }
  func.func @transform_3(%arg0: i32) -> (i32, i32, i32) {
    %c0_i32 = arith.constant 0 : i32
    %c0_i32_0 = arith.constant 0 : i32
    %c0_i32_1 = arith.constant 0 : i32
    %c0_i32_2 = arith.constant 0 : i32
    return %c0_i32, %c0_i32_0, %c0_i32_1 : i32, i32, i32
  }
  func.func @transform_4(%arg0: i32) -> (i32, i32, i32) {
    %c0_i32 = arith.constant 0 : i32
    %c0_i32_0 = arith.constant 0 : i32
    %c0_i32_1 = arith.constant 0 : i32
    %c0_i32_2 = arith.constant 0 : i32
    return %c0_i32, %c0_i32_0, %c0_i32_1 : i32, i32, i32
  }
  func.func @transform_5(%arg0: i32) -> (i32, i32) {
    %c0_i32 = arith.constant 0 : i32
    %c0_i32_0 = arith.constant 0 : i32
    %c0_i32_1 = arith.constant 0 : i32
    return %c0_i32, %c0_i32_0 : i32, i32
  }
  func.func @transform_6(%arg0: i32) -> (i32, i32, i32) {
    %c0_i32 = arith.constant 0 : i32
    %c0_i32_0 = arith.constant 0 : i32
    %c0_i32_1 = arith.constant 0 : i32
    return %arg0, %c0_i32, %c0_i32_0 : i32, i32, i32
  }
}

</mosaic_0001>

<bundles_post_ra>
// kernel: squeeze.8
= control target key start
LH: loop header
LB: loop body
LE: loop exit
PB: predicated region body
PF: predicated region fallthrough
CT: control target
= control target key end

     0   :  { %vm3_vm0 = vcmask 97280   ;;  %s157_s0 = inlined_call_operand.vmem [shape: f32[36,12,1,1], index: 0, kind: input, shape index: {}]   ;;  %s158_s1 = inlined_call_operand.vmem [shape: f32[3,3,4,12], index: 1, kind: output, shape index: {}]  }
   0x1   :  { %v2_v0 = vld [vmem:[%s157_s0] sm:$0xff]   ;;  %v93_v1 = vld [vmem:[%s157_s0 + $0x8] sm:$0xff]   ;;  %v94_v2 = vld [vmem:[%s157_s0 + $0x10] sm:$0xff]  }
   0x2   :  { %4 = vst.msk [vmem:[#allocation0] sm:$0xf] %vm3_vm0, %v2_v0   ;;  %6 = vst.msk [vmem:[#allocation0 + $0x4] sm:$0xf0] %vm3_vm0, %v2_v0   ;;  %v95_v3 = vld [vmem:[%s157_s0 + $0x18] sm:$0xff]  }
   0x3   :  { %11 = vst.msk [vmem:[#allocation0 + $0x10] sm:$0xf] %vm3_vm0, %v93_v1   ;;  %13 = vst.msk [vmem:[#allocation0 + $0x14] sm:$0xf0] %vm3_vm0, %v93_v1   ;;  %v96_v4 = vld [vmem:[%s157_s0 + $0x20] sm:$0xf]  }
   0x4   :  { %18 = vst.msk [vmem:[#allocation0 + $0x20] sm:$0xf] %vm3_vm0, %v94_v2   ;;  %20 = vst.msk [vmem:[#allocation0 + $0x24] sm:$0xf0] %vm3_vm0, %v94_v2  }
   0x5   :  { %25 = vst.msk [vmem:[#allocation0 + $0x30] sm:$0xf] %vm3_vm0, %v95_v3   ;;  %27 = vst.msk [vmem:[#allocation0 + $0x34] sm:$0xf0] %vm3_vm0, %v95_v3  }
   0x6   :  { %32 = vst.msk [vmem:[#allocation0 + $0x40] sm:$0xf] %vm3_vm0, %v96_v4  }
   0x9   :  { %v36_v5 = vld [vmem:[#allocation0] sm:$0xf]  ;;  %v40_v6 = vld [vmem:[#allocation0 + $0x8] sm:$0xf] }
   0xa   :  { %v45_v7 = vld [vmem:[#allocation0 + $0x10] sm:$0xf]  ;;  %38 = vst [vmem:[%s158_s1] sm:$0xf] %v36_v5  ;;  %97 = vst [vmem:[%s158_s1 + $0x4] sm:$0xf] %v40_v6 }
   0xb   :  { %98 = vst [vmem:[%s158_s1 + $0x8] sm:$0xf] %v45_v7  ;;  %v51_v8 = vld [vmem:[#allocation0 + $0x18] sm:$0xf]  ;;  %v57_v9 = vld [vmem:[#allocation0 + $0x20] sm:$0xf] }
   0xc   :  { %v63_v10 = vld [vmem:[#allocation0 + $0x28] sm:$0xf]  ;;  %99 = vst [vmem:[%s158_s1 + $0xc] sm:$0xf] %v51_v8  ;;  %100 = vst [vmem:[%s158_s1 + $0x10] sm:$0xf] %v57_v9 }
   0xd   :  { %101 = vst [vmem:[%s158_s1 + $0x14] sm:$0xf] %v63_v10  ;;  %v69_v11 = vld [vmem:[#allocation0 + $0x30] sm:$0xf]  ;;  %v75_v12 = vld [vmem:[#allocation0 + $0x38] sm:$0xf] }
   0xe   :  { %v81_v13 = vld [vmem:[#allocation0 + $0x40] sm:$0xf]  ;;  %102 = vst [vmem:[%s158_s1 + $0x18] sm:$0xf] %v69_v11  ;;  %103 = vst [vmem:[%s158_s1 + $0x1c] sm:$0xf] %v75_v12 }
   0xf   :  { %104 = vst [vmem:[%s158_s1 + $0x20] sm:$0xf] %v81_v13 }

// kernel: self_attention_forward.1
= control target key start
LH: loop header
LB: loop body
LE: loop exit
PB: predicated region body
PF: predicated region fallthrough
CT: control target
= control target key end

     0   :  { %v7465_v2 = vmov 0.0|0.0   ;;  %vm7466_vm0 = vmmov 0   ;;  %v7467_v4 = vmov 0.0   ;;  %s7468_s25 = smov 64   ;;  %v7469_v5 = vmov 0   ;;  %s9121_s0 = inlined_call_operand.vmem [shape: f32[2,12,64], index: 0, kind: input, shape index: {}]   ;;  %s9122_s2 = inlined_call_operand.vmem [shape: f32[36,1], index: 2, kind: input, shape index: {}]   ;;  %s9123_s1 = inlined_call_operand.vmem [shape: f32[36,12], index: 1, kind: input, shape index: {}]   ;;  %s9124_s4 = inlined_call_operand.vmem [shape: f32[12,64,64], index: 4, kind: input, shape index: {}]   ;;  %s9125_s3 = inlined_call_operand.vmem [shape: f32[12,12,64], index: 3, kind: input, shape index: {}]   ;;  %s9126_s5 = inlined_call_operand.vmem [shape: f32[12,1], index: 5, kind: input, shape index: {}]   ;;  %s9127_s6 = inlined_call_operand.vmem [shape: f32[2,12,64], index: 6, kind: output, shape index: {}]  }
   0x1   :  { %v5196_v0 = vld [vmem:[%s9121_s0 + $0x10] sm:$0xff]  ;;  %v5197_v1 = vld [vmem:[%s9121_s0 + $0x18] sm:$0xf]  ;;  %6748 = vmatprep.subr.bf16.mxu0 %v7465_v2  ;;  %6013 = vmatprep.mubr.msk.f32.mxu0 %vm7466_vm0, %v7467_v4  ;;  %v28_v6 = vld [vmem:[%s9122_s2] sm:$0xff]  ;;  %vm48_vm1 = vcmask 523264   ;;  %vm92_vm2 = vcmask 1043456  }
   0x2   :  { %v7314_v3 = vpack.i.bf16 %v5197_v1, %v5196_v0  ;;  %7319 = vset.pattern.permute.xlu0 %v7469_v5  ;;  %7320 = vset.pattern.permute.xlu1 %v7469_v5  ;;  %v29_v7 = vld [vmem:[%s9122_s2 + $0x8] sm:$0xff]  ;;  %v30_v8 = vld [vmem:[%s9122_s2 + $0x10] sm:$0xff]  ;;  %v35_v10 = vld [vmem:[%s9121_s0] sm:$0xff]  ;;  %vm7470_vm3 = vmmov 1   ;;  %vm76_vm5 = vcmask 97280   ;;  %vm245_vm6 = vcmask 1042432  }
   0x3   :  { %58 = vperm.xlu1 %7320, %v29_v7   ;;  %v36_v11 = vld [vmem:[%s9121_s0 + $0x8] sm:$0xf]  ;;  %vm6750_vm4 = vmpackc.low %vm92_vm2, %vm7470_vm3  ;;  %v23_v17 = vld [vmem:[%s9123_s1] sm:$0xff]  ;;  %vm389_vm7 = vcmask 1040384   ;;  %vm524_vm8 = vcmask 1041408   ;;  %vm220_vm9 = vcmask 23552  }
   0x4   :  { %7315 = vrot.lane.b32.xlu0 %v7314_v3, %s7468_s25  ;;  %v24_v18 = vld [vmem:[%s9123_s1 + $0x8] sm:$0xff]  ;;  %v25_v19 = vld [vmem:[%s9123_s1 + $0x10] sm:$0xff]  ;;  %v26_v42 = vld [vmem:[%s9123_s1 + $0x18] sm:$0xff]  ;;  %vm1487_vm11 = vcmask 1045504   ;;  %vm2709_vm12 = vcmask 519168  }
   0x5   :  { %v27_v43 = vld [vmem:[%s9123_s1 + $0x20] sm:$0xf]  ;;  %vm7790_vm10 = vmpackc.low %vm48_vm1, %vm48_vm1 }
   0x7   :  { %63 = vperm.xlu1 %7320, %v30_v8  }
   0x8   :  { %53 = vperm.xlu0 %7319, %v28_v6  }
  0x76   :  { %v7316_v9 = vpop.permute.xlu0 %7315 }
  0x77   :  { %v7318_v12 = vunpack.i.h.bf16 %v7316_v9  ;;  %v7317_v13 = vunpack.i.l.bf16 %v7316_v9 }
  0x79   :  { %v49_v14 = vsel %vm48_vm1, %v35_v10, %v7317_v13  ;;  %v50_v15 = vsel %vm48_vm1, %v36_v11, %v7318_v12 }
  0x7a   :  { %v6749_v16 = vpack.c.bf16 %v50_v15, %v49_v14 }
  0x7c   :  { %6751 = vmatpush3.bf16.msk.msra.mxu0 %vm6750_vm4, %v6749_v16 }
  0x7f   :  { %6014 = vmatmul.mubr.msk.f32.vlgmr.msra.gmra.mrb[0].mxu0 %vm76_vm5, %v23_v17 }
  0x80   :  { %6016 = vmatprep.mubr.msk.f32.mxu0 %vm7466_vm0, %v7467_v4 }
  0x82   :  { %v59_v24 = vpop.permute.xlu1 %58 }
  0x83   :  { %6017 = vmatmul.mubr.msk.f32.gmra.mrb[2].mxu0 %vm76_vm5, %v24_v18 }
  0x84   :  { %6019 = vmatprep.mubr.msk.f32.mxu0 %vm7466_vm0, %v7467_v4 }
  0x86   :  { %v64_v29 = vpop.permute.xlu1 %63 }
  0x87   :  { %6020 = vmatmul.mubr.msk.f32.gmra.mrb[4].mxu0 %vm76_vm5, %v25_v19  ;;  %v54_v20 = vpop.permute.xlu0 %53 }
  0x88   :  { %6022 = vmatprep.mubr.msk.f32.mxu0 %vm7466_vm0, %v7467_v4 }
  0x8b   :  { %6023 = vmatmul.mubr.msk.f32.gmra.mrb[6].mxu0 %vm76_vm5, %v26_v42 }
  0x8c   :  { %6025 = vmatprep.mubr.msk.f32.mxu0 %vm7466_vm0, %v7467_v4 }
  0x8f   :  { %6026 = vmatmul.mubr.msk.f32.gmra.mrb[8].mxu0 %vm76_vm5, %v27_v43 }
 0x152   :  { %v162_v21 = vpop.f32.mrb[0].mxu0 }
 0x153   :  { %v7551_v22 = vadd.f32 %v162_v21, %v54_v20  ;;  %v6015_v23 = vpop.f32.mrb[1].mxu0 }
 0x155   :  { %186 = vxpose.xlu1.b32.start.end [1/1] (short) (narrow) %v7551_v22, 64  ;;  %v354_v25 = vrot.slane %v7551_v22, 3  ;;  %v525_v40 = vrot.slane %v7551_v22, 6 }
 0x156   :  { %v167_v26 = vpop.f32.mrb[2].mxu0 }
 0x157   :  { %v7555_v27 = vadd.f32 %v167_v26, %v59_v24  ;;  %356 = vxpose.xlu0.b32.start.end [1/1] (short) (narrow) %v354_v25, 64  ;;  %v6018_v28 = vpop.f32.mrb[3].mxu0 }
 0x159   :  { %v7560_v30 = vrot.slane %v7555_v27, 4  ;;  %v390_v33 = vrot.slane %v7555_v27, 7  ;;  %v693_v38 = vrot.slane %v7555_v27, 1  ;;  %v526_v39 = vrot.slane %v7555_v27, 6  ;;  %v5279_v27 = vld [vmem:[%s9124_s4 + $0x48] sm:$0xff] }
 0x15a   :  { %v172_v31 = vpop.f32.mrb[4].mxu0 }
 0x15b   :  { %v173_v32 = vadd.f32 %v172_v31, %v64_v29  ;;  %6028 = vmatprep.subr.msk.mxu1 %vm245_vm6, %v7560_v30  ;;  %v6021_v34 = vpop.f32.mrb[5].mxu0  ;;  %v7585_v41 = vsel %vm524_vm8, %v525_v40, %v526_v39 }
 0x15c   :  { %6029 = vmatpush3.msk.msra.mxu1 %vm245_vm6, %v7560_v30 }
 0x15d   :  { %v391_v35 = vrot.slane %v173_v32, 7  ;;  %v7567_v36 = vrot.slane %v173_v32, 2  ;;  %v7599_v47 = vrot.slane %v173_v32, 5 }
 0x15e   :  { %v7643_v15 = vpop.f32.mrb[6].mxu0 }
 0x15f   :  { %6056 = vmatprep.subr.msk.mxu0 %vm245_vm6, %v7567_v36  ;;  %v7572_v37 = vsel %vm389_vm7, %v390_v33, %v391_v35  ;;  %v6024_v16 = vpop.f32.mrb[7].mxu0 }
 0x160   :  { %6057 = vmatpush3.msk.msra.mxu0 %vm245_vm6, %v7567_v36  ;;  %6042 = vmatprep.subr.msk.mxu1 %vm245_vm6, %v7572_v37  ;;  %v31_v16 = vld [vmem:[%s9122_s2 + $0x18] sm:$0xff] }
 0x161   :  { %6752 = vmatprep.subr.bf16.mxu0 %v7465_v2 }
 0x162   :  { %v7645_v17 = vpop.f32.mrb[8].mxu0 }
 0x163   :  { %v6027_v18 = vpop.f32.mrb[9].mxu0 }
 0x172   :  { %695 = vxpose.xlu1.b32.start.end [1/1] (short) (narrow) %v693_v38, 64 }
 0x174   :  { %529 = vxpose.xlu0.b32.start.end [1/1] (short) (narrow) %v7585_v41, 64 }
 0x1d5   :  { %v202_v44 = vpop.trf.xlu1 }
 0x1d6   :  { %6030 = vmatprep.mubr.msk.f32.mxu1 %vm220_vm9, %v202_v44 }
 0x1d7   :  { %v372_v45 = vpop.trf.xlu0 }
 0x1d9   :  { %v203_v46 = vpop.trf.xlu1 }
 0x1da   :  { %6031 = vmatmul.mubr.msk.f32.vlgmr.msra.gmra.mrb[0].mxu1 %vm220_vm9, %v203_v46 }
 0x1db   :  { %6043 = vmatpush3.msk.msra.mxu1 %vm245_vm6, %v7572_v37  ;;  %v373_v48 = vpop.trf.xlu0 }
 0x1dc   :  { %6070 = vmatprep.subr.msk.mxu1 %vm245_vm6, %v7599_v47 }
 0x1dd   :  { %v204_v49 = vpop.trf.xlu1 }
 0x1de   :  { %6033 = vmatprep.mubr.msk.f32.mxu1 %vm220_vm9, %v204_v49 }
 0x1df   :  { %v374_v50 = vpop.trf.xlu0 }
 0x1e1   :  { %v205_v51 = vpop.trf.xlu1 }
 0x1e2   :  { %6034 = vmatmul.mubr.msk.f32.gmra.mrb[2].mxu1 %vm220_vm9, %v205_v51 }
 0x1e3   :  { %v375_v52 = vpop.trf.xlu0 }
 0x1e5   :  { %v206_v53 = vpop.trf.xlu1 }
 0x1e6   :  { %6036 = vmatprep.mubr.msk.f32.mxu1 %vm220_vm9, %v206_v53 }
 0x1e7   :  { %v376_v54 = vpop.trf.xlu0 }
 0x1e9   :  { %v207_v55 = vpop.trf.xlu1 }
 0x1ea   :  { %6037 = vmatmul.mubr.msk.f32.gmra.mrb[4].mxu1 %vm220_vm9, %v207_v55 }
 0x1eb   :  { %v377_v56 = vpop.trf.xlu0 }
 0x1ed   :  { %v208_v57 = vpop.trf.xlu1 }
 0x1ee   :  { %6039 = vmatprep.mubr.msk.f32.mxu1 %vm220_vm9, %v208_v57 }
 0x1ef   :  { %v378_v58 = vpop.trf.xlu0 }
 0x1f1   :  { %v209_v59 = vpop.trf.xlu1 }
 0x1f2   :  { %6040 = vmatmul.mubr.msk.f32.gmra.mrb[6].mxu1 %vm220_vm9, %v209_v59 }
 0x1f3   :  { %6044 = vmatprep.mubr.msk.f32.mxu1 %vm220_vm9, %v372_v45  ;;  %v379_v60 = vpop.trf.xlu0 }
 0x1f5   :  { %v711_v61 = vpop.trf.xlu1 }
 0x1f6   :  { %6045 = vmatmul.mubr.msk.f32.vlgmr.msra.gmra.mrb[8].mxu1 %vm220_vm9, %v373_v48 }
 0x1f7   :  { %6071 = vmatpush3.msk.msra.mxu1 %vm245_vm6, %v7599_v47  ;;  %6047 = vmatprep.mubr.msk.f32.mxu1 %vm220_vm9, %v374_v50  ;;  %v545_v62 = vpop.trf.xlu0 }
 0x1f8   :  { %6058 = vmatprep.mubr.msk.f32.mxu0 %vm220_vm9, %v545_v62  ;;  %6800 = vmatprep.subr.bf16.mxu1 %v7465_v2 }
 0x1f9   :  { %v712_v63 = vpop.trf.xlu1 }
 0x1fa   :  { %6048 = vmatmul.mubr.msk.f32.gmra.mrb[10].mxu1 %vm220_vm9, %v375_v52 }
 0x1fb   :  { %6050 = vmatprep.mubr.msk.f32.mxu1 %vm220_vm9, %v376_v54  ;;  %v546_v0 = vpop.trf.xlu0 }
 0x1fc   :  { %6059 = vmatmul.mubr.msk.f32.vlgmr.msra.gmra.mrb[10].mxu0 %vm220_vm9, %v546_v0 }
 0x1fd   :  { %v713_v1 = vpop.trf.xlu1 }
 0x1fe   :  { %6051 = vmatmul.mubr.msk.f32.gmra.mrb[12].mxu1 %vm220_vm9, %v377_v56 }
 0x1ff   :  { %6053 = vmatprep.mubr.msk.f32.mxu1 %vm220_vm9, %v378_v58  ;;  %v547_v3 = vpop.trf.xlu0 }
 0x200   :  { %6061 = vmatprep.mubr.msk.f32.mxu0 %vm220_vm9, %v547_v3 }
 0x201   :  { %v714_v5 = vpop.trf.xlu1 }
 0x202   :  { %6054 = vmatmul.mubr.msk.f32.gmra.mrb[14].mxu1 %vm220_vm9, %v379_v60 }
 0x203   :  { %v548_v6 = vpop.trf.xlu0  ;;  %6072 = vmatprep.mubr.msk.f32.mxu1 %vm220_vm9, %v711_v61 }
 0x204   :  { %6062 = vmatmul.mubr.msk.f32.gmra.mrb[12].mxu0 %vm220_vm9, %v548_v6 }
 0x205   :  { %v715_v7 = vpop.trf.xlu1 }
 0x206   :  { %6073 = vmatmul.mubr.msk.f32.vlgmr.msra.gmra.mrb[16].mxu1 %vm220_vm9, %v712_v63 }
 0x207   :  { %v549_v8 = vpop.trf.xlu0  ;;  %6075 = vmatprep.mubr.msk.f32.mxu1 %vm220_vm9, %v713_v1 }
 0x208   :  { %6064 = vmatprep.mubr.msk.f32.mxu0 %vm220_vm9, %v549_v8 }
 0x209   :  { %v716_v9 = vpop.trf.xlu1 }
 0x20a   :  { %6076 = vmatmul.mubr.msk.f32.gmra.mrb[18].mxu1 %vm220_vm9, %v714_v5 }
 0x20b   :  { %v550_v10 = vpop.trf.xlu0  ;;  %6078 = vmatprep.mubr.msk.f32.mxu1 %vm220_vm9, %v715_v7 }
 0x20c   :  { %6065 = vmatmul.mubr.msk.f32.gmra.mrb[14].mxu0 %vm220_vm9, %v550_v10 }
 0x20d   :  { %v717_v11 = vpop.trf.xlu1 }
 0x20e   :  { %6079 = vmatmul.mubr.msk.f32.gmra.mrb[20].mxu1 %vm220_vm9, %v716_v9 }
 0x20f   :  { %v551_v12 = vpop.trf.xlu0  ;;  %6081 = vmatprep.mubr.msk.f32.mxu1 %vm220_vm9, %v717_v11 }
 0x210   :  { %6067 = vmatprep.mubr.msk.f32.mxu0 %vm220_vm9, %v551_v12 }
 0x211   :  { %v718_v13 = vpop.trf.xlu1 }
 0x212   :  { %6082 = vmatmul.mubr.msk.f32.gmra.mrb[22].mxu1 %vm220_vm9, %v718_v13 }
 0x213   :  { %v552_v14 = vpop.trf.xlu0  ;;  %6157 = vmatprep.mubr.msk.f32.mxu1 %vm7466_vm0, %v7467_v4 }
 0x214   :  { %6068 = vmatmul.mubr.msk.f32.gmra.mrb[16].mxu0 %vm220_vm9, %v552_v14 }
 0x215   :  { %6100 = vmatprep.mubr.msk.f32.mxu0 %vm7466_vm0, %v7467_v4 }
 0x2ad   :  { %v7647_v19 = vpop.f32.mrb[0].mxu1 }
 0x2ae   :  { %v7649_v20 = vpop.f32.mrb[1].mxu1  ;;  %v862_v21 = vsel %vm48_vm1, %v7647_v19, -inf }
 0x2af   :  { %863 = vmax.xlane.f32.xlu1 %v862_v21  ;;  %v859_v23 = vsel %vm48_vm1, %v7649_v20, -inf }
 0x2b0   :  { %860 = vmax.xlane.f32.xlu0 %v859_v23 }
 0x2b5   :  { %v7655_v24 = vpop.f32.mrb[2].mxu1 }
 0x2b6   :  { %v7657_v26 = vpop.f32.mrb[3].mxu1  ;;  %v868_v28 = vsel %vm48_vm1, %v7655_v24, -inf }
 0x2b7   :  { %869 = vmax.xlane.f32.xlu1 %v868_v28  ;;  %v865_v29 = vsel %vm48_vm1, %v7657_v26, -inf }
 0x2b8   :  { %866 = vmax.xlane.f32.xlu0 %v865_v29 }
 0x2bd   :  { %v7663_v31 = vpop.f32.mrb[4].mxu1 }
 0x2be   :  { %v7665_v32 = vpop.f32.mrb[5].mxu1  ;;  %v874_v33 = vsel %vm48_vm1, %v7663_v31, -inf }
 0x2bf   :  { %875 = vmax.xlane.f32.xlu1 %v874_v33  ;;  %v871_v34 = vsel %vm48_vm1, %v7665_v32, -inf }
 0x2c0   :  { %872 = vmax.xlane.f32.xlu0 %v871_v34  ;;  %v32_v34 = vld [vmem:[%s9122_s2 + $0x20] sm:$0xf] }
 0x2c5   :  { %v7671_v35 = vpop.f32.mrb[6].mxu1 }
 0x2c6   :  { %v7673_v39 = vpop.f32.mrb[7].mxu1  ;;  %v880_v40 = vsel %vm48_vm1, %v7671_v35, -inf }
 0x2c7   :  { %881 = vmax.xlane.f32.xlu1 %v880_v40  ;;  %v877_v42 = vsel %vm48_vm1, %v7673_v39, -inf }
 0x2c8   :  { %878 = vmax.xlane.f32.xlu0 %v877_v42 }
 0x2c9   :  { %v7679_v43 = vpop.f32.mrb[8].mxu1 }
 0x2ca   :  { %v7681_v44 = vpop.f32.mrb[9].mxu1  ;;  %v886_v45 = vsel %vm48_vm1, %v7679_v43, -inf }
 0x2cb   :  { %887 = vmax.xlane.f32.xlu1 %v886_v45  ;;  %v883_v46 = vsel %vm48_vm1, %v7681_v44, -inf }
 0x2cc   :  { %884 = vmax.xlane.f32.xlu0 %v883_v46 }
 0x2cd   :  { %v7687_v48 = vpop.f32.mrb[10].mxu1 }
 0x2ce   :  { %v7689_v49 = vpop.f32.mrb[11].mxu1  ;;  %v892_v50 = vsel %vm48_vm1, %v7687_v48, -inf }
 0x2cf   :  { %893 = vmax.xlane.f32.xlu1 %v892_v50  ;;  %v889_v51 = vsel %vm48_vm1, %v7689_v49, -inf  ;;  %v7695_v52 = vpop.f32.mrb[10].mxu0 }
 0x2d0   :  { %890 = vmax.xlane.f32.xlu0 %v889_v51  ;;  %v7697_v53 = vpop.f32.mrb[11].mxu0  ;;  %v910_v10 = vsel %vm48_vm1, %v7695_v52, -inf }
 0x2d1   :  { %v7699_v54 = vpop.f32.mrb[12].mxu1  ;;  %v907_v58 = vsel %vm48_vm1, %v7697_v53, -inf }
 0x2d2   :  { %v7701_v55 = vpop.f32.mrb[13].mxu1  ;;  %v898_v56 = vsel %vm48_vm1, %v7699_v54, -inf }
 0x2d3   :  { %899 = vmax.xlane.f32.xlu1 %v898_v56  ;;  %v895_v57 = vsel %vm48_vm1, %v7701_v55, -inf }
 0x2d4   :  { %896 = vmax.xlane.f32.xlu0 %v895_v57 }
 0x2d5   :  { %v7709_v59 = vpop.f32.mrb[14].mxu1 }
 0x2d6   :  { %v7711_v60 = vpop.f32.mrb[15].mxu1  ;;  %v904_v0 = vsel %vm48_vm1, %v7709_v59, -inf }
 0x2d7   :  { %908 = vmax.xlane.f32.xlu1 %v907_v58  ;;  %v7713_v61 = vpop.f32.mrb[12].mxu0  ;;  %v901_v5 = vsel %vm48_vm1, %v7711_v60, -inf }
 0x2d8   :  { %v7715_v62 = vpop.f32.mrb[13].mxu0  ;;  %v916_v21 = vsel %vm48_vm1, %v7713_v61, -inf }
 0x2d9   :  { %v7717_v63 = vpop.f32.mrb[16].mxu1  ;;  %v913_v12 = vsel %vm48_vm1, %v7715_v62, -inf }
 0x2da   :  { %v7721_v1 = vpop.f32.mrb[17].mxu1  ;;  %v934_v42 = vsel %vm48_vm1, %v7717_v63, -inf }
 0x2db   :  { %905 = vmax.xlane.f32.xlu1 %v904_v0  ;;  %v931_v51 = vsel %vm48_vm1, %v7721_v1, -inf }
 0x2dd   :  { %v7723_v3 = vpop.f32.mrb[18].mxu1 }
 0x2de   :  { %v7727_v6 = vpop.f32.mrb[19].mxu1  ;;  %v940_v58 = vsel %vm48_vm1, %v7723_v3, -inf }
 0x2df   :  { %902 = vmax.xlane.f32.xlu1 %v901_v5  ;;  %v7729_v7 = vpop.f32.mrb[14].mxu0 }
 0x2e0   :  { %v7731_v8 = vpop.f32.mrb[15].mxu0  ;;  %v922_v28 = vsel %vm48_vm1, %v7729_v7, -inf }
 0x2e1   :  { %v7733_v9 = vpop.f32.mrb[20].mxu1  ;;  %v919_v40 = vsel %vm48_vm1, %v7731_v8, -inf }
 0x2e2   :  { %v7737_v11 = vpop.f32.mrb[21].mxu1 }
 0x2e3   :  { %911 = vmax.xlane.f32.xlu1 %v910_v10 }
 0x2e5   :  { %v7741_v13 = vpop.f32.mrb[22].mxu1 }
 0x2e6   :  { %v7743_v14 = vpop.f32.mrb[23].mxu1 }
 0x2e7   :  { %914 = vmax.xlane.f32.xlu1 %v913_v12  ;;  %v7748_v18 = vpop.f32.mrb[16].mxu0  ;;  %v946_v12 = vsel %vm48_vm1, %v7733_v9, -inf }
 0x2e8   :  { %v7752_v23 = vpop.f32.mrb[17].mxu0  ;;  %v928_v33 = vsel %vm48_vm1, %v7748_v18, -inf }
 0x2e9   :  { %v925_v29 = vsel %vm48_vm1, %v7752_v23, -inf }
 0x2ea   :  { %68 = vperm.xlu0 %7319, %v31_v16  }
 0x2eb   :  { %917 = vmax.xlane.f32.xlu1 %v916_v21 }
 0x2ef   :  { %923 = vmax.xlane.f32.xlu1 %v922_v28 }
 0x2f3   :  { %926 = vmax.xlane.f32.xlu1 %v925_v29  ;;  %v943_v29 = vsel %vm48_vm1, %v7737_v11, -inf }
 0x2f7   :  { %929 = vmax.xlane.f32.xlu1 %v928_v33 }
 0x308   :  { %73 = vperm.xlu1 %7320, %v32_v34  }
 0x309   :  { %920 = vmax.xlane.f32.xlu0 %v919_v40 }
 0x31f   :  { %2711 = vrot.lane.b32.xlu0 %v7551_v22, %s7468_s25 }
 0x32c   :  { %935 = vmax.xlane.f32.xlu1 %v934_v42  ;;  %v952_v42 = vsel %vm48_vm1, %v7741_v13, -inf }
 0x33c   :  { %v864_v45 = vpop.xlane.xlu1 %863 }
 0x33d   :  { %v956_v46 = vsub.f32 %v7647_v19, %v864_v45  ;;  %v861_v50 = vpop.xlane.xlu0 %860  ;;  %2879 = vrot.lane.b32.xlu1 %v354_v25, %s7468_s25 }
 0x33e   :  { %v955_v56 = vsub.f32 %v7649_v20, %v861_v50  ;;  %932 = vmax.xlane.f32.xlu0 %v931_v51  ;;  %v937_v20 = vsel %vm48_vm1, %v7727_v6, -inf }
 0x33f   :  { %v989_v57 = vmul.f32 1.442695, %v956_v46 }
 0x340   :  { %v987_v0 = vmul.f32 1.442695, %v955_v56  ;;  %v949_v56 = vsel %vm48_vm1, %v7743_v14, -inf }
 0x341   :  { %7321 = vpow2.f32 %v989_v57  ;;  %2914 = vrot.lane.b32.xlu1 %v7572_v37, %s7468_s25 }
 0x342   :  { %7323 = vpow2.f32 %v987_v0  ;;  %941 = vmax.xlane.f32.xlu0 %v940_v58 }
 0x344   :  { %v870_v19 = vpop.xlane.xlu1 %869 }
 0x345   :  { %v958_v22 = vsub.f32 %v7655_v24, %v870_v19  ;;  %v867_v25 = vpop.xlane.xlu0 %866  ;;  %3082 = vrot.lane.b32.xlu1 %v7567_v36, %s7468_s25  ;;  %v5489_v36 = vld [vmem:[%s9124_s4 + $0x68] sm:$0xff] }
 0x346   :  { %v957_v5 = vsub.f32 %v7657_v26, %v867_v25  ;;  %938 = vmax.xlane.f32.xlu0 %v937_v20 }
 0x347   :  { %v993_v10 = vmul.f32 1.442695, %v958_v22 }
 0x348   :  { %v991_v37 = vmul.f32 1.442695, %v957_v5 }
 0x349   :  { %7325 = vpow2.f32 %v993_v10 }
 0x34a   :  { %7327 = vpow2.f32 %v991_v37  ;;  %947 = vmax.xlane.f32.xlu0 %v946_v12 }
 0x34b   :  { %v7322_v16 = vpop.eup %7321 }
 0x34c   :  { %v7324_v24 = vpop.eup %7323  ;;  %v876_v21 = vpop.xlane.xlu1 %875 }
 0x34d   :  { %v960_v26 = vsub.f32 %v7663_v31, %v876_v21  ;;  %v873_v28 = vpop.xlane.xlu0 %872  ;;  %v6753_v33 = vpack.c.bf16 %v7322_v16, %v7324_v24 }
 0x34e   :  { %v959_v34 = vsub.f32 %v7665_v32, %v873_v28  ;;  %944 = vmax.xlane.f32.xlu0 %v943_v29 }
 0x34f   :  { %v997_v40 = vmul.f32 1.442695, %v960_v26  ;;  %6755 = vmatpush3.bf16.xpose.msk.msra.mxu0 %vm7790_vm10, %v6753_v33 }
 0x350   :  { %v995_v45 = vmul.f32 1.442695, %v959_v34  ;;  %6756 = vmatprep.subr.bf16.mxu0 %v7465_v2 }
 0x351   :  { %7329 = vpow2.f32 %v997_v40 }
 0x352   :  { %7331 = vpow2.f32 %v995_v45  ;;  %953 = vmax.xlane.f32.xlu0 %v952_v42 }
 0x353   :  { %v7326_v31 = vpop.eup %7325 }
 0x354   :  { %v7328_v46 = vpop.eup %7327  ;;  %v882_v50 = vpop.xlane.xlu1 %881 }
 0x355   :  { %v962_v51 = vsub.f32 %v7671_v35, %v882_v50  ;;  %v879_v32 = vpop.xlane.xlu0 %878  ;;  %v6757_v57 = vpack.c.bf16 %v7326_v31, %v7328_v46 }
 0x356   :  { %v961_v58 = vsub.f32 %v7673_v39, %v879_v32  ;;  %950 = vmax.xlane.f32.xlu0 %v949_v56 }
 0x357   :  { %v1001_v0 = vmul.f32 1.442695, %v962_v51  ;;  %6759 = vmatpush3.bf16.xpose.msk.msra.mxu0 %vm7790_vm10, %v6757_v57 }
 0x358   :  { %v999_v19 = vmul.f32 1.442695, %v961_v58  ;;  %v888_v22 = vpop.xlane.xlu1 %887  ;;  %6760 = vmatprep.subr.bf16.mxu0 %v7465_v2 }
 0x359   :  { %7333 = vpow2.f32 %v1001_v0  ;;  %v964_v25 = vsub.f32 %v7679_v43, %v888_v22  ;;  %v885_v35 = vpop.xlane.xlu0 %884 }
 0x35a   :  { %7335 = vpow2.f32 %v999_v19  ;;  %v963_v20 = vsub.f32 %v7681_v44, %v885_v35 }
 0x35b   :  { %v7330_v5 = vpop.eup %7329  ;;  %v1005_v10 = vmul.f32 1.442695, %v964_v25 }
 0x35c   :  { %v7332_v12 = vpop.eup %7331  ;;  %v1003_v39 = vmul.f32 1.442695, %v963_v20  ;;  %v894_v37 = vpop.xlane.xlu1 %893 }
 0x35d   :  { %7337 = vpow2.f32 %v1005_v10  ;;  %v966_v16 = vsub.f32 %v7687_v48, %v894_v37  ;;  %v891_v24 = vpop.xlane.xlu0 %890  ;;  %v6761_v21 = vpack.c.bf16 %v7330_v5, %v7332_v12 }
 0x35e   :  { %7339 = vpow2.f32 %v1003_v39  ;;  %v965_v26 = vsub.f32 %v7689_v49, %v891_v24 }
 0x35f   :  { %v1009_v28 = vmul.f32 1.442695, %v966_v16  ;;  %6763 = vmatpush3.bf16.xpose.msk.msra.mxu0 %vm7790_vm10, %v6761_v21 }
 0x360   :  { %v1007_v43 = vmul.f32 1.442695, %v965_v26  ;;  %v900_v29 = vpop.xlane.xlu1 %899  ;;  %6764 = vmatprep.subr.bf16.mxu0 %v7465_v2 }
 0x361   :  { %7341 = vpow2.f32 %v1009_v28  ;;  %v968_v44 = vsub.f32 %v7699_v54, %v900_v29  ;;  %v897_v33 = vpop.xlane.xlu0 %896 }
 0x362   :  { %7343 = vpow2.f32 %v1007_v43  ;;  %v967_v48 = vsub.f32 %v7701_v55, %v897_v33 }
 0x363   :  { %v7334_v34 = vpop.eup %7333  ;;  %v1013_v40 = vmul.f32 1.442695, %v968_v44 }
 0x364   :  { %v7336_v42 = vpop.eup %7335  ;;  %v1011_v45 = vmul.f32 1.442695, %v967_v48  ;;  %v909_v49 = vpop.xlane.xlu1 %908 }
 0x365   :  { %7345 = vpow2.f32 %v1013_v40  ;;  %v6765_v31 = vpack.c.bf16 %v7334_v34, %v7336_v42  ;;  %v971_v0 = vsub.f32 %v7697_v53, %v909_v49 }
 0x366   :  { %7347 = vpow2.f32 %v1011_v45 }
 0x367   :  { %v7338_v46 = vpop.eup %7337  ;;  %6767 = vmatpush3.bf16.xpose.msk.msra.mxu0 %vm7790_vm10, %v6765_v31  ;;  %v1019_v5 = vmul.f32 1.442695, %v971_v0 }
 0x368   :  { %v7340_v50 = vpop.eup %7339  ;;  %v906_v51 = vpop.xlane.xlu1 %905  ;;  %6768 = vmatprep.subr.bf16.mxu0 %v7465_v2 }
 0x369   :  { %v970_v54 = vsub.f32 %v7709_v59, %v906_v51  ;;  %v69_v32 = vpop.permute.xlu0 %68  ;;  %v6769_v55 = vpack.c.bf16 %v7338_v46, %v7340_v50 }
 0x36a   :  { %v7824_v56 = vadd.f32 %v7643_v15, %v69_v32 }
 0x36b   :  { %v7342_v57 = vpop.eup %7341  ;;  %v1017_v19 = vmul.f32 1.442695, %v970_v54 }
 0x36c   :  { %v7344_v58 = vpop.eup %7343  ;;  %v7829_v22 = vsel %vm245_vm6, %v7824_v56, 1.0  ;;  %v903_v25 = vpop.xlane.xlu1 %902  ;;  %3047 = vrot.lane.b32.xlu0 %v7585_v41, %s7468_s25  ;;  %v1156_v50 = vrot.slane %v7824_v56, 3  ;;  %v1263_v51 = vrot.slane %v7824_v56, 6 }
 0x36d   :  { %v969_v59 = vsub.f32 %v7711_v60, %v903_v25  ;;  %v6773_v35 = vpack.c.bf16 %v7342_v57, %v7344_v58  ;;  %7349 = vpow2.f32 %v1017_v19 }
 0x36e   :  { %6101 = vmatmul.mubr.msk.f32.vlgmr.msra.gmra.mrb[18].mxu0 %vm48_vm1, %v7829_v22  ;;  %v7864_v54 = vsel %vm245_vm6, %v1156_v50, 1.0 }
 0x36f   :  { %v7346_v15 = vpop.eup %7345  ;;  %v1015_v20 = vmul.f32 1.442695, %v969_v59  ;;  %6771 = vmatpush3.bf16.xpose.msk.msra.mxu0 %vm7790_vm10, %v6769_v55  ;;  %6119 = vmatprep.mubr.msk.f32.mxu0 %vm7466_vm0, %v7467_v4 }
 0x370   :  { %v7348_v53 = vpop.eup %7347  ;;  %v912_v10 = vpop.xlane.xlu1 %911  ;;  %2746 = vrot.lane.b32.xlu0 %v7560_v30, %s7468_s25  ;;  %6772 = vmatprep.subr.bf16.mxu0 %v7465_v2 }
 0x371   :  { %7351 = vpow2.f32 %v1015_v20  ;;  %v972_v41 = vsub.f32 %v7695_v52, %v912_v10  ;;  %v6777_v60 = vpack.c.bf16 %v7346_v15, %v7348_v53 }
 0x372   :  { %7353 = vpow2.f32 %v1019_v5 }
 0x373   :  { %v1021_v12 = vmul.f32 1.442695, %v972_v41 }
 0x374   :  { %v915_v39 = vpop.xlane.xlu1 %914 }
 0x375   :  { %7355 = vpow2.f32 %v1021_v12  ;;  %v973_v37 = vsub.f32 %v7715_v62, %v915_v39 }
 0x377   :  { %6775 = vmatpush3.bf16.xpose.msk.msra.mxu0 %vm7790_vm10, %v6773_v35  ;;  %v1023_v16 = vmul.f32 1.442695, %v973_v37  ;;  %v7350_v21 = vpop.eup %7349 }
 0x378   :  { %v918_v24 = vpop.xlane.xlu1 %917  ;;  %6776 = vmatprep.subr.bf16.mxu0 %v7465_v2 }
 0x379   :  { %v974_v30 = vsub.f32 %v7713_v61, %v918_v24  ;;  %7357 = vpow2.f32 %v1023_v16 }
 0x37b   :  { %v7352_v26 = vpop.eup %7351  ;;  %v1025_v28 = vmul.f32 1.442695, %v974_v30 }
 0x37c   :  { %v924_v52 = vpop.xlane.xlu1 %923  ;;  %v6781_v43 = vpack.c.bf16 %v7350_v21, %v7352_v26  ;;  %v7354_v29 = vpop.eup %7353 }
 0x37d   :  { %7359 = vpow2.f32 %v1025_v28  ;;  %v976_v55 = vsub.f32 %v7729_v7, %v924_v52 }
 0x37f   :  { %v7356_v44 = vpop.eup %7355  ;;  %6779 = vmatpush3.bf16.xpose.msk.msra.mxu0 %vm7790_vm10, %v6777_v60  ;;  %v1029_v58 = vmul.f32 1.442695, %v976_v55  ;;  %v5281_v55 = vld [vmem:[%s9124_s4 + $0x58] sm:$0xff] }
 0x380   :  { %v927_v62 = vpop.xlane.xlu1 %926  ;;  %6780 = vmatprep.subr.bf16.mxu0 %v7465_v2  ;;  %v6785_v33 = vpack.c.bf16 %v7356_v44, %v7354_v29 }
 0x381   :  { %v977_v48 = vsub.f32 %v7752_v23, %v927_v62 }
 0x383   :  { %v1031_v34 = vmul.f32 1.442695, %v977_v48  ;;  %v7358_v42 = vpop.eup %7357 }
 0x384   :  { %v930_v61 = vpop.xlane.xlu1 %929 }
 0x385   :  { %v978_v40 = vsub.f32 %v7748_v18, %v930_v61  ;;  %7361 = vpow2.f32 %v1031_v34 }
 0x387   :  { %v7360_v45 = vpop.eup %7359  ;;  %v1033_v49 = vmul.f32 1.442695, %v978_v40  ;;  %6783 = vmatpush3.bf16.xpose.msk.msra.mxu0 %vm7790_vm10, %v6781_v43 }
 0x388   :  { %v74_v31 = vpop.permute.xlu1 %73  ;;  %6784 = vmatprep.subr.bf16.mxu0 %v7465_v2  ;;  %v6789_v46 = vpack.c.bf16 %v7360_v45, %v7358_v42 }
 0x389   :  { %7363 = vpow2.f32 %v1033_v49  ;;  %v7859_v23 = vadd.f32 %v7645_v17, %v74_v31 }
 0x38a   :  { %7365 = vpow2.f32 %v1029_v58  ;;  %v5283_v58 = vld [vmem:[%s9124_s4 + $0x68] sm:$0xff] }
 0x38b   :  { %v1264_v18 = vrot.slane %v7859_v23, 6 }
 0x38d   :  { %v1265_v32 = vsel %vm524_vm8, %v1263_v51, %v1264_v18  ;;  %v1371_v51 = vrot.slane %v7859_v23, 1  ;;  %v5280_v23 = vld [vmem:[%s9124_s4 + $0x50] sm:$0xff] }
 0x38e   :  { %6120 = vmatmul.mubr.msk.f32.vlgmr.msra.gmra.mrb[20].mxu0 %vm48_vm1, %v7864_v54  ;;  %v7885_v7 = vsel %vm245_vm6, %v1265_v32, 1.0 }
 0x38f   :  { %6787 = vmatpush3.bf16.xpose.msk.msra.mxu0 %vm7790_vm10, %v6785_v33  ;;  %6138 = vmatprep.mubr.msk.f32.mxu0 %vm7466_vm0, %v7467_v4  ;;  %v7362_v17 = vpop.eup %7361  ;;  %v7914_v18 = vsel %vm245_vm6, %v1371_v51, 1.0 }
 0x390   :  { %6788 = vmatprep.subr.bf16.mxu0 %v7465_v2 }
 0x393   :  { %v7364_v56 = vpop.eup %7363 }
 0x394   :  { %v6797_v57 = vpack.c.bf16 %v7364_v56, %v7362_v17  ;;  %v7366_v35 = vpop.eup %7365  ;;  %v5278_v17 = vld [vmem:[%s9124_s4 + $0x40] sm:$0xff]  ;;  %v6820_v56 = vpack.c.bf16 %v5281_v55, %v5280_v23 }
 0x396   :  { %v921_v0 = vpop.xlane.xlu0 %920 }
 0x397   :  { %v975_v19 = vsub.f32 %v7731_v8, %v921_v0  ;;  %6791 = vmatpush3.bf16.xpose.msk.msra.mxu0 %vm7790_vm10, %v6789_v46 }
 0x398   :  { %6792 = vmatprep.subr.bf16.mxu0 %v7465_v2 }
 0x399   :  { %v1027_v25 = vmul.f32 1.442695, %v975_v19 }
 0x39a   :  { %v2712_v59 = vpop.permute.xlu0 %2711 }
 0x39b   :  { %7367 = vpow2.f32 %v1027_v25  ;;  %2714 = vxpose.xlu0.b32.start.end [1/1] (short) (narrow) %v2712_v59, 64  ;;  %v5284_v25 = vld [vmem:[%s9124_s4 + $0x70] sm:$0xff]  ;;  %v5285_v59 = vld [vmem:[%s9124_s4 + $0x78] sm:$0xff] }
 0x3a5   :  { %v7368_v15 = vpop.eup %7367 }
 0x3a6   :  { %v6793_v20 = vpack.c.bf16 %v7366_v35, %v7368_v15  ;;  %v6828_v35 = vpack.c.bf16 %v5285_v59, %v5284_v25 }
 0x3a8   :  { %6795 = vmatpush3.bf16.xpose.msk.msra.mxu0 %vm7790_vm10, %v6793_v20  ;;  %v1498_v20 = vld [vmem:[%s9124_s4] sm:$0xff] }
 0x3a9   :  { %6796 = vmatprep.subr.bf16.mxu0 %v7465_v2 }
 0x3b0   :  { %6799 = vmatpush3.bf16.xpose.msk.msra.mxu0 %vm7790_vm10, %v6797_v57  ;;  %v5282_v57 = vld [vmem:[%s9124_s4 + $0x60] sm:$0xff] }
 0x3b1   :  { %v6824_v0 = vpack.c.bf16 %v5283_v58, %v5282_v57 }
 0x3b7   :  { %6139 = vmatmul.mubr.msk.f32.vlgmr.msra.gmra.mrb[22].mxu0 %vm48_vm1, %v7885_v7 }
 0x3b9   :  { %v936_v8 = vpop.xlane.xlu1 %935 }
 0x3ba   :  { %v980_v5 = vsub.f32 %v7717_v63, %v936_v8  ;;  %v1499_v8 = vld [vmem:[%s9124_s4 + $0x8] sm:$0xff] }
 0x3bc   :  { %v1037_v10 = vmul.f32 1.442695, %v980_v5  ;;  %v7953_v5 = vpack.c.bf16 %v1499_v8, %v1498_v20  ;;  %v1490_v20 = vld [vmem:[%s9125_s3] sm:$0xff] }
 0x3bd   :  { %v2880_v53 = vpop.permute.xlu1 %2879 }
 0x3be   :  { %2882 = vxpose.xlu1.b32.start.end [1/1] (short) (narrow) %v2880_v53, 64  ;;  %7369 = vpow2.f32 %v1037_v10 }
 0x3c1   :  { %v2915_v32 = vpop.permute.xlu1 %2914 }
 0x3c5   :  { %v3083_v53 = vpop.permute.xlu1 %3082 }
 0x3c8   :  { %v7370_v28 = vpop.eup %7369 }
 0x3cb   :  { %v933_v41 = vpop.xlane.xlu0 %932 }
 0x3cc   :  { %v979_v60 = vsub.f32 %v7721_v1, %v933_v41 }
 0x3ce   :  { %v1035_v12 = vmul.f32 1.442695, %v979_v60 }
 0x3cf   :  { %v942_v39 = vpop.xlane.xlu0 %941 }
 0x3d0   :  { %7371 = vpow2.f32 %v1035_v12  ;;  %v982_v37 = vsub.f32 %v7723_v3, %v942_v39 }
 0x3d2   :  { %v1041_v16 = vmul.f32 1.442695, %v982_v37 }
 0x3d3   :  { %v939_v24 = vpop.xlane.xlu0 %938 }
 0x3d4   :  { %v981_v30 = vsub.f32 %v7727_v6, %v939_v24  ;;  %7373 = vpow2.f32 %v1041_v16 }
 0x3d6   :  { %v1039_v21 = vmul.f32 1.442695, %v981_v30 }
 0x3d7   :  { %v948_v26 = vpop.xlane.xlu0 %947 }
 0x3d8   :  { %7375 = vpow2.f32 %v1039_v21  ;;  %v984_v63 = vsub.f32 %v7733_v9, %v948_v26 }
 0x3da   :  { %v7372_v52 = vpop.eup %7371  ;;  %v1045_v43 = vmul.f32 1.442695, %v984_v63 }
 0x3db   :  { %v945_v1 = vpop.xlane.xlu0 %944  ;;  %v6801_v29 = vpack.c.bf16 %v7370_v28, %v7372_v52 }
 0x3dc   :  { %v983_v44 = vsub.f32 %v7737_v11, %v945_v1  ;;  %7377 = vpow2.f32 %v1045_v43  ;;  %v1150_v1 = vlaneseq }
 0x3dd   :  { %6803 = vmatpush3.bf16.xpose.msk.msra.mxu1 %vm7790_vm10, %v6801_v29 }
 0x3de   :  { %v1043_v3 = vmul.f32 1.442695, %v983_v44  ;;  %6804 = vmatprep.subr.bf16.mxu1 %v7465_v2  ;;  %v7374_v33 = vpop.eup %7373 }
 0x3df   :  { %v954_v6 = vpop.xlane.xlu0 %953 }
 0x3e0   :  { %7379 = vpow2.f32 %v1043_v3  ;;  %v986_v62 = vsub.f32 %v7741_v13, %v954_v6  ;;  %v7974_v3 = vshrl.u32 %v1150_v1, 7  ;;  %v5290_v1 = vld [vmem:[%s9125_s3 + $0x20] sm:$0xff] }
 0x3e2   :  { %v7376_v9 = vpop.eup %7375  ;;  %v1049_v48 = vmul.f32 1.442695, %v986_v62  ;;  %v7977_v62 = vsub.s32 3, %v7974_v3  ;;  %v7994_v55 = vsub.s32 1, %v7974_v3 }
 0x3e3   :  { %v951_v34 = vpop.xlane.xlu0 %950  ;;  %v6805_v61 = vpack.c.bf16 %v7374_v33, %v7376_v9 }
 0x3e4   :  { %v985_v40 = vsub.f32 %v7743_v14, %v951_v34  ;;  %7381 = vpow2.f32 %v1049_v48 }
 0x3e5   :  { %6807 = vmatpush3.bf16.xpose.msk.msra.mxu1 %vm7790_vm10, %v6805_v61 }
 0x3e6   :  { %v1047_v11 = vmul.f32 1.442695, %v985_v40  ;;  %6808 = vmatprep.subr.bf16.mxu1 %v7465_v2  ;;  %v7378_v45 = vpop.eup %7377 }
 0x3e7   :  { %v3048_v42 = vpop.permute.xlu0 %3047 }
 0x3e8   :  { %7383 = vpow2.f32 %v1047_v11  ;;  %3050 = vxpose.xlu0.b32.start.end [1/1] (short) (narrow) %v3048_v42, 64 }
 0x3ea   :  { %v7380_v49 = vpop.eup %7379 }
 0x3eb   :  { %v6809_v13 = vpack.c.bf16 %v7378_v45, %v7380_v49  ;;  %v2747_v50 = vpop.permute.xlu0 %2746 }
 0x3ed   :  { %6811 = vmatpush3.bf16.xpose.msk.msra.mxu1 %vm7790_vm10, %v6809_v13 }
 0x3ee   :  { %6812 = vmatprep.subr.bf16.mxu1 %v7465_v2  ;;  %v7382_v31 = vpop.eup %7381 }
 0x3f2   :  { %v7384_v14 = vpop.eup %7383 }
 0x3f3   :  { %v6813_v46 = vpack.c.bf16 %v7382_v31, %v7384_v14 }
 0x3f5   :  { %6815 = vmatpush3.bf16.xpose.msk.msra.mxu1 %vm7790_vm10, %v6813_v46 }
 0x3f6   :  { %6388 = vmatprep.subr.msk.mxu1 %vm245_vm6, %v2747_v50 }
 0x3f8   :  { %3215 = vrot.lane.b32.xlu1 %v693_v38, %s7468_s25  ;;  %v6816_v38 = vpack.c.bf16 %v5279_v27, %v5278_v17 }
 0x3fa   :  { %6817 = vmatprep.subr.bf16.mxu0 %v6816_v38 }
 0x3fb   :  { %6819 = vmatpush3.bf16.msra.mxu0 %v6816_v38 }
 0x3fc   :  { %6158 = vmatmul.mubr.msk.f32.vlgmr.msra.gmra.mrb[24].mxu1 %vm48_vm1, %v7914_v18  ;;  %6821 = vmatprep.subr.bf16.mxu0 %v6820_v56 }
 0x3fd   :  { %6389 = vmatpush3.msk.msra.mxu1 %vm245_vm6, %v2747_v50 }
 0x3fe   :  { %6402 = vmatprep.subr.msk.mxu1 %vm245_vm6, %v2915_v32 }
 0x3ff   :  { %6823 = vmatpush3.bf16.msra.mxu0 %v6820_v56  ;;  %v7997_v56 = vsub.s32 0, %v7974_v3 }
 0x400   :  { %6825 = vmatprep.subr.bf16.mxu0 %v6824_v0 }
 0x403   :  { %6827 = vmatpush3.bf16.msra.mxu0 %v6824_v0  ;;  %v5276_v0 = vld [vmem:[%s9125_s3 + $0x10] sm:$0xff] }
 0x404   :  { %6829 = vmatprep.subr.bf16.mxu0 %v6828_v35 }
 0x407   :  { %6831 = vmatpush3.bf16.msra.mxu0 %v6828_v35  ;;  %v1500_v35 = vld [vmem:[%s9124_s4 + $0x10] sm:$0xff] }
 0x408   :  { %6833 = vmatprep.subr.bf16.mxu0 %v7953_v5 }
 0x41b   :  { %v2730_v19 = vpop.trf.xlu0 }
 0x41c   :  { %6390 = vmatprep.mubr.msk.f32.mxu1 %vm220_vm9, %v2730_v19  ;;  %v5277_v19 = vld [vmem:[%s9125_s3 + $0x18] sm:$0xf] }
 0x41f   :  { %v2731_v15 = vpop.trf.xlu0 }
 0x420   :  { %6391 = vmatmul.mubr.msk.f32.vlgmr.msra.gmra.mrb[26].mxu1 %vm220_vm9, %v2731_v15  ;;  %v1501_v15 = vld [vmem:[%s9124_s4 + $0x18] sm:$0xff] }
 0x421   :  { %6403 = vmatpush3.msk.msra.mxu1 %vm245_vm6, %v2915_v32 }
 0x422   :  { %6416 = vmatprep.subr.msk.mxu1 %vm245_vm6, %v3083_v53 }
 0x423   :  { %v2732_v10 = vpop.trf.xlu0 }
 0x424   :  { %6393 = vmatprep.mubr.msk.f32.mxu1 %vm220_vm9, %v2732_v10 }
 0x427   :  { %v2733_v41 = vpop.trf.xlu0 }
 0x428   :  { %6394 = vmatmul.mubr.msk.f32.gmra.mrb[28].mxu1 %vm220_vm9, %v2733_v41  ;;  %v6836_v41 = vpack.c.bf16 %v1501_v15, %v1500_v35  ;;  %v5317_v35 = vld [vmem:[%s9124_s4 + $0x108] sm:$0xff]  ;;  %v1893_v15 = vsub.s32 4, %v7974_v3 }
 0x42b   :  { %v2734_v60 = vpop.trf.xlu0 }
 0x42c   :  { %6396 = vmatprep.mubr.msk.f32.mxu1 %vm220_vm9, %v2734_v60 }
 0x42d   :  { %3250 = vrot.lane.b32.xlu0 %v7599_v47, %s7468_s25 }
 0x42f   :  { %v2735_v12 = vpop.trf.xlu0 }
 0x430   :  { %6397 = vmatmul.mubr.msk.f32.gmra.mrb[30].mxu1 %vm220_vm9, %v2735_v12  ;;  %v1502_v12 = vld [vmem:[%s9124_s4 + $0x20] sm:$0xff] }
 0x433   :  { %v2736_v39 = vpop.trf.xlu0 }
 0x434   :  { %6399 = vmatprep.mubr.msk.f32.mxu1 %vm220_vm9, %v2736_v39  ;;  %v1503_v39 = vld [vmem:[%s9124_s4 + $0x28] sm:$0xff] }
 0x437   :  { %v2737_v37 = vpop.trf.xlu0 }
 0x438   :  { %6400 = vmatmul.mubr.msk.f32.gmra.mrb[32].mxu1 %vm220_vm9, %v2737_v37  ;;  %v6840_v37 = vpack.c.bf16 %v1503_v39, %v1502_v12 }
 0x43e   :  { %v2898_v16 = vpop.trf.xlu1 }
 0x43f   :  { %6404 = vmatprep.mubr.msk.f32.mxu1 %vm220_vm9, %v2898_v16  ;;  %v1504_v16 = vld [vmem:[%s9124_s4 + $0x30] sm:$0xff] }
 0x441   :  { %v1145_v24 = vpop.f32.mrb[18].mxu0 }
 0x442   :  { %v6102_v30 = vpop.f32.mrb[19].mxu0  ;;  %v2899_v21 = vpop.trf.xlu1  ;;  %7385 = vrcp.f32 %v1145_v24 }
 0x443   :  { %6405 = vmatmul.mubr.msk.f32.vlgmr.msra.gmra.mrb[34].mxu1 %vm220_vm9, %v2899_v21  ;;  %v5293_v21 = vld [vmem:[%s9124_s4 + $0x88] sm:$0xff] }
 0x444   :  { %6417 = vmatpush3.msk.msra.mxu1 %vm245_vm6, %v3083_v53 }
 0x446   :  { %v2900_v47 = vpop.trf.xlu1 }
 0x447   :  { %6407 = vmatprep.mubr.msk.f32.mxu1 %vm220_vm9, %v2900_v47  ;;  %v8050_v47 = vsub.s32 2, %v7974_v3 }
 0x44a   :  { %v2901_v26 = vpop.trf.xlu1 }
 0x44b   :  { %6408 = vmatmul.mubr.msk.f32.gmra.mrb[36].mxu1 %vm220_vm9, %v2901_v26 }
 0x44c   :  { %v7386_v33 = vpop.eup %7385 }
 0x44d   :  { %v1153_v61 = vrot.slane %v7386_v33, %v7977_v62  ;;  %v5296_v33 = vld [vmem:[%s9124_s4 + $0xa0] sm:$0xff] }
 0x44e   :  { %v2902_v63 = vpop.trf.xlu1 }
 0x44f   :  { %6410 = vmatprep.mubr.msk.f32.mxu1 %vm220_vm9, %v2902_v63  ;;  %v1154_v45 = vmul.f32 %v1153_v61, %v1145_v24  ;;  %v1505_v24 = vld [vmem:[%s9124_s4 + $0x38] sm:$0xff]  ;;  %v1491_v63 = vld [vmem:[%s9125_s3 + $0x8] sm:$0xf] }
 0x450   :  { %v6844_v30 = vpack.c.bf16 %v1505_v24, %v1504_v16  ;;  %v5299_v61 = vld [vmem:[%s9124_s4 + $0xb8] sm:$0xff] }
 0x452   :  { %v2903_v28 = vpop.trf.xlu1 }
 0x453   :  { %6411 = vmatmul.mubr.msk.f32.gmra.mrb[38].mxu1 %vm220_vm9, %v2903_v28 }
 0x456   :  { %v2904_v52 = vpop.trf.xlu1 }
 0x457   :  { %6413 = vmatprep.mubr.msk.f32.mxu1 %vm220_vm9, %v2904_v52  ;;  %v5294_v52 = vld [vmem:[%s9124_s4 + $0x90] sm:$0xff] }
 0x45a   :  { %v2905_v43 = vpop.trf.xlu1 }
 0x45b   :  { %6414 = vmatmul.mubr.msk.f32.gmra.mrb[40].mxu1 %vm220_vm9, %v2905_v43  ;;  %v5295_v43 = vld [vmem:[%s9124_s4 + $0x98] sm:$0xff] }
 0x461   :  { %v1252_v29 = vpop.f32.mrb[20].mxu0 }
 0x462   :  { %7387 = vrcp.f32 %v1252_v29  ;;  %v6121_v44 = vpop.f32.mrb[21].mxu0 }
 0x463   :  { %v6852_v44 = vpack.c.bf16 %v5295_v43, %v5294_v52  ;;  %v5328_v52 = vld [vmem:[%s9124_s4 + $0x140] sm:$0xff]  ;;  %v5329_v43 = vld [vmem:[%s9124_s4 + $0x148] sm:$0xff] }
 0x468   :  { %v3066_v6 = vpop.trf.xlu0 }
 0x469   :  { %6418 = vmatprep.mubr.msk.f32.mxu1 %vm220_vm9, %v3066_v6 }
 0x46a   :  { %v3216_v9 = vpop.permute.xlu1 %3215 }
 0x46b   :  { %3218 = vxpose.xlu1.b32.start.end [1/1] (short) (narrow) %v3216_v9, 64  ;;  %v5297_v9 = vld [vmem:[%s9124_s4 + $0xa8] sm:$0xff] }
 0x46c   :  { %v7388_v48 = vpop.eup %7387  ;;  %v3067_v34 = vpop.trf.xlu0 }
 0x46d   :  { %v1260_v40 = vrot.slane %v7388_v48, %v7977_v62  ;;  %6419 = vmatmul.mubr.msk.f32.vlgmr.msra.gmra.mrb[42].mxu1 %vm220_vm9, %v3067_v34  ;;  %v6856_v48 = vpack.c.bf16 %v5297_v9, %v5296_v33  ;;  %v5298_v34 = vld [vmem:[%s9124_s4 + $0xb0] sm:$0xff]  ;;  %v5331_v9 = vld [vmem:[%s9124_s4 + $0x158] sm:$0xff] }
 0x46e   :  { %v5330_v33 = vld [vmem:[%s9124_s4 + $0x150] sm:$0xff] }
 0x46f   :  { %v1261_v11 = vmul.f32 %v1260_v40, %v1252_v29  ;;  %v6860_v40 = vpack.c.bf16 %v5299_v61, %v5298_v34  ;;  %v6900_v61 = vpack.c.bf16 %v5331_v9, %v5330_v33  ;;  %v5339_v9 = vld [vmem:[%s9125_s3 + $0x68] sm:$0xf] }
 0x470   :  { %v3068_v42 = vpop.trf.xlu0 }
 0x471   :  { %v1478_v49 = vrot.slane %v1261_v11, 5  ;;  %6421 = vmatprep.mubr.msk.f32.mxu1 %vm220_vm9, %v3068_v42  ;;  %v5304_v11 = vld [vmem:[%s9124_s4 + $0xc0] sm:$0xff]  ;;  %v5305_v42 = vld [vmem:[%s9124_s4 + $0xc8] sm:$0xff] }
 0x473   :  { %v1486_v13 = vsel %vm245_vm6, %v1154_v45, %v1478_v49  ;;  %v6864_v45 = vpack.c.bf16 %v5305_v42, %v5304_v11  ;;  %v5291_v49 = vld [vmem:[%s9125_s3 + $0x28] sm:$0xf]  ;;  %v5332_v11 = vld [vmem:[%s9124_s4 + $0x160] sm:$0xff] }
 0x474   :  { %v3069_v31 = vpop.trf.xlu0  ;;  %v5333_v42 = vld [vmem:[%s9124_s4 + $0x168] sm:$0xff] }
 0x475   :  { %6422 = vmatmul.mubr.msk.f32.gmra.mrb[44].mxu1 %vm220_vm9, %v3069_v31  ;;  %v5306_v31 = vld [vmem:[%s9124_s4 + $0xd0] sm:$0xff] }
 0x478   :  { %v3070_v14 = vpop.trf.xlu0 }
 0x479   :  { %6424 = vmatprep.mubr.msk.f32.mxu1 %vm220_vm9, %v3070_v14  ;;  %v5307_v14 = vld [vmem:[%s9124_s4 + $0xd8] sm:$0xff] }
 0x47c   :  { %v3071_v46 = vpop.trf.xlu0 }
 0x47d   :  { %6425 = vmatmul.mubr.msk.f32.gmra.mrb[46].mxu1 %vm220_vm9, %v3071_v46  ;;  %v5302_v46 = vld [vmem:[%s9125_s3 + $0x30] sm:$0xff] }
 0x480   :  { %v3072_v50 = vpop.trf.xlu0 }
 0x481   :  { %6427 = vmatprep.mubr.msk.f32.mxu1 %vm220_vm9, %v3072_v50 }
 0x484   :  { %v3073_v51 = vpop.trf.xlu0 }
 0x485   :  { %6428 = vmatmul.mubr.msk.f32.gmra.mrb[48].mxu1 %vm220_vm9, %v3073_v51  ;;  %v6868_v51 = vpack.c.bf16 %v5307_v14, %v5306_v31  ;;  %v5340_v14 = vld [vmem:[%s9124_s4 + $0x180] sm:$0xff] }
 0x48a   :  { %v1361_v32 = vpop.f32.mrb[22].mxu0 }
 0x48b   :  { %7389 = vrcp.f32 %v1361_v32  ;;  %v6140_v17 = vpop.f32.mrb[23].mxu0 }
 0x48c   :  { %v5308_v17 = vld [vmem:[%s9124_s4 + $0xe0] sm:$0xff] }
 0x495   :  { %v7390_v27 = vpop.eup %7389 }
 0x496   :  { %v1369_v38 = vrot.slane %v7390_v27, %v7977_v62  ;;  %v5309_v27 = vld [vmem:[%s9124_s4 + $0xe8] sm:$0xff] }
 0x498   :  { %v7991_v23 = vmul.f32 %v1369_v38, %v1361_v32  ;;  %v6872_v38 = vpack.c.bf16 %v5309_v27, %v5308_v17  ;;  %v5327_v17 = vld [vmem:[%s9125_s3 + $0x58] sm:$0xf] }
 0x49a   :  { %v1481_v57 = vrot.slane %v7991_v23, 2 }
 0x49c   :  { %v8003_v58 = vsel %vm1487_vm11, %v1486_v13, %v1481_v57 }
 0x49d   :  { %v1512_v25 = vrot.slane %v8003_v58, %v7994_v55  ;;  %v1495_v59 = vrot.slane %v8003_v58, %v7997_v56  ;;  %v1692_v28 = vrot.slane %v8003_v58, %v8050_v47  ;;  %v1793_v13 = vrot.slane %v8003_v58, %v7977_v62 }
 0x49f   :  { %v3251_v8 = vpop.permute.xlu0 %3250  ;;  %v1513_v53 = vmul.f32 %v5276_v0, %v1512_v25  ;;  %v1514_v10 = vmul.f32 %v5277_v19, %v1512_v25  ;;  %v1496_v60 = vmul.f32 %v1495_v59, %v1490_v20  ;;  %v1497_v29 = vmul.f32 %v1495_v59, %v1491_v63  ;;  %v5310_v0 = vld [vmem:[%s9124_s4 + $0xf0] sm:$0xff]  ;;  %v5311_v19 = vld [vmem:[%s9124_s4 + $0xf8] sm:$0xff]  ;;  %v5316_v59 = vld [vmem:[%s9124_s4 + $0x100] sm:$0xff] }
 0x4a0   :  { %6430 = vmatprep.subr.msk.mxu1 %vm245_vm6, %v3251_v8  ;;  %v1693_v6 = vmul.f32 %v5290_v1, %v1692_v28  ;;  %v1694_v50 = vmul.f32 %v5291_v49, %v1692_v28  ;;  %v1794_v32 = vmul.f32 %v5302_v46, %v1793_v13  ;;  %v6876_v25 = vpack.c.bf16 %v5311_v19, %v5310_v0  ;;  %v5323_v63 = vld [vmem:[%s9124_s4 + $0x138] sm:$0xff]  ;;  %v5334_v49 = vld [vmem:[%s9124_s4 + $0x170] sm:$0xff]  ;;  %v5341_v46 = vld [vmem:[%s9124_s4 + $0x188] sm:$0xff] }
 0x4a1   :  { %6176 = vmatprep.mubr.msk.f32.mxu0 %vm48_vm1, %v1513_v53  ;;  %6431 = vmatpush3.msk.msra.mxu1 %vm245_vm6, %v3251_v8  ;;  %v6880_v20 = vpack.c.bf16 %v5317_v35, %v5316_v59  ;;  %v5303_v8 = vld [vmem:[%s9125_s3 + $0x38] sm:$0xf]  ;;  %v1894_v53 = vrot.slane %v8003_v58, %v1893_v15  ;;  %v1994_v1 = vsub.s32 5, %v7974_v3  ;;  %v5338_v19 = vld [vmem:[%s9125_s3 + $0x60] sm:$0xff] }
 0x4a2   :  { %6177 = vmatmul.mubr.msk.f32.vlgmr.msra.gmra.mrb[24].mxu0 %vm48_vm1, %v1514_v10  ;;  %7040 = vmatprep.subr.bf16.mxu1 %v7465_v2  ;;  %v5318_v10 = vld [vmem:[%s9124_s4 + $0x110] sm:$0xff]  ;;  %v1795_v39 = vmul.f32 %v5303_v8, %v1793_v13  ;;  %v5335_v13 = vld [vmem:[%s9124_s4 + $0x178] sm:$0xff]  ;;  %v5344_v8 = vld [vmem:[%s9124_s4 + $0x1a0] sm:$0xff] }
 0x4a3   :  { %6835 = vmatpush3.bf16.msra.mxu0 %v7953_v5  ;;  %6195 = vmatprep.mubr.msk.f32.mxu0 %vm48_vm1, %v1496_v60  ;;  %v5292_v5 = vld [vmem:[%s9124_s4 + $0x80] sm:$0xff]  ;;  %v6908_v31 = vpack.c.bf16 %v5335_v13, %v5334_v49  ;;  %v5343_v0 = vld [vmem:[%s9124_s4 + $0x198] sm:$0xff] }
 0x4a4   :  { %6837 = vmatprep.subr.bf16.mxu0 %v6836_v41  ;;  %v6848_v26 = vpack.c.bf16 %v5293_v21, %v5292_v5  ;;  %v5314_v60 = vld [vmem:[%s9125_s3 + $0x40] sm:$0xff]  ;;  %v5321_v5 = vld [vmem:[%s9124_s4 + $0x128] sm:$0xff] }
 0x4a5   :  { %v1895_v24 = vmul.f32 %v5314_v60, %v1894_v53 }
 0x4a7   :  { %6839 = vmatpush3.bf16.msra.mxu0 %v6836_v41  ;;  %v5319_v41 = vld [vmem:[%s9124_s4 + $0x118] sm:$0xff] }
 0x4a8   :  { %6841 = vmatprep.subr.bf16.mxu0 %v6840_v37  ;;  %v6884_v16 = vpack.c.bf16 %v5319_v41, %v5318_v10 }
 0x4ab   :  { %6843 = vmatpush3.bf16.msra.mxu0 %v6840_v37 }
 0x4ac   :  { %6845 = vmatprep.subr.bf16.mxu0 %v6844_v30 }
 0x4af   :  { %6847 = vmatpush3.bf16.msra.mxu0 %v6844_v30  ;;  %v5320_v30 = vld [vmem:[%s9124_s4 + $0x120] sm:$0xff] }
 0x4b0   :  { %6849 = vmatprep.subr.bf16.mxu0 %v6848_v26  ;;  %v6888_v21 = vpack.c.bf16 %v5321_v5, %v5320_v30  ;;  %v5347_v30 = vld [vmem:[%s9124_s4 + $0x1b8] sm:$0xff] }
 0x4b2   :  { %6196 = vmatmul.mubr.msk.f32.vlgmr.msra.gmra.mrb[24].mxu0 %vm48_vm1, %v1497_v29  ;;  %v6896_v29 = vpack.c.bf16 %v5329_v43, %v5328_v52 }
 0x4b3   :  { %6851 = vmatpush3.bf16.msra.mxu0 %v6848_v26  ;;  %6214 = vmatprep.mubr.msk.f32.mxu0 %vm48_vm1, %v1693_v6  ;;  %v5322_v26 = vld [vmem:[%s9124_s4 + $0x130] sm:$0xff]  ;;  %v1995_v6 = vrot.slane %v8003_v58, %v1994_v1 }
 0x4b4   :  { %6853 = vmatprep.subr.bf16.mxu0 %v6852_v44  ;;  %v6892_v28 = vpack.c.bf16 %v5323_v63, %v5322_v26  ;;  %v5352_v26 = vld [vmem:[%s9124_s4 + $0x1c0] sm:$0xff]  ;;  %v5353_v63 = vld [vmem:[%s9124_s4 + $0x1c8] sm:$0xff] }
 0x4b5   :  { %v1997_v59 = vmul.f32 %v5327_v17, %v1995_v6  ;;  %v6928_v33 = vpack.c.bf16 %v5353_v63, %v5352_v26 }
 0x4b7   :  { %6855 = vmatpush3.bf16.msra.mxu0 %v6852_v44  ;;  %v5315_v44 = vld [vmem:[%s9125_s3 + $0x48] sm:$0xf] }
 0x4b8   :  { %6857 = vmatprep.subr.bf16.mxu0 %v6856_v48  ;;  %v1896_v34 = vmul.f32 %v5315_v44, %v1894_v53  ;;  %v5345_v53 = vld [vmem:[%s9124_s4 + $0x1a8] sm:$0xff] }
 0x4bb   :  { %6859 = vmatpush3.bf16.msra.mxu0 %v6856_v48  ;;  %v5326_v48 = vld [vmem:[%s9125_s3 + $0x50] sm:$0xff] }
 0x4bc   :  { %6861 = vmatprep.subr.bf16.mxu0 %v6860_v40 }
 0x4bf   :  { %6863 = vmatpush3.bf16.msra.mxu0 %v6860_v40  ;;  %v1996_v40 = vmul.f32 %v5326_v48, %v1995_v6 }
 0x4c0   :  { %6865 = vmatprep.subr.bf16.mxu0 %v6864_v45 }
 0x4c2   :  { %6215 = vmatmul.mubr.msk.f32.vlgmr.msra.gmra.mrb[24].mxu0 %vm48_vm1, %v1694_v50  ;;  %v2095_v50 = vsub.s32 6, %v7974_v3 }
 0x4c3   :  { %6867 = vmatpush3.bf16.msra.mxu0 %v6864_v45  ;;  %6233 = vmatprep.mubr.msk.f32.mxu0 %vm48_vm1, %v1794_v32  ;;  %v6904_v45 = vpack.c.bf16 %v5333_v42, %v5332_v11  ;;  %v6912_v32 = vpack.c.bf16 %v5341_v46, %v5340_v14  ;;  %v5350_v42 = vld [vmem:[%s9125_s3 + $0x70] sm:$0xff]  ;;  %v5357_v14 = vld [vmem:[%s9124_s4 + $0x1e8] sm:$0xff] }
 0x4c4   :  { %6869 = vmatprep.subr.bf16.mxu0 %v6868_v51  ;;  %v2096_v27 = vrot.slane %v8003_v58, %v2095_v50 }
 0x4c7   :  { %6871 = vmatpush3.bf16.msra.mxu0 %v6868_v51 }
 0x4c8   :  { %6873 = vmatprep.subr.bf16.mxu0 %v6872_v38 }
 0x4cb   :  { %6875 = vmatpush3.bf16.msra.mxu0 %v6872_v38  ;;  %v5342_v38 = vld [vmem:[%s9124_s4 + $0x190] sm:$0xff] }
 0x4cc   :  { %6877 = vmatprep.subr.bf16.mxu0 %v6876_v25  ;;  %v6916_v35 = vpack.c.bf16 %v5343_v0, %v5342_v38  ;;  %v5359_v0 = vld [vmem:[%s9124_s4 + $0x1f8] sm:$0xff] }
 0x4cf   :  { %6879 = vmatpush3.bf16.msra.mxu0 %v6876_v25  ;;  %v8136_v12 = vpop.f32.mrb[24].mxu1 }
 0x4d0   :  { %v6159_v37 = vpop.f32.mrb[25].mxu1  ;;  %6881 = vmatprep.subr.bf16.mxu0 %v6880_v20  ;;  %7391 = vrcp.f32 %v8136_v12 }
 0x4d1   :  { %v6920_v37 = vpack.c.bf16 %v5345_v53, %v5344_v8  ;;  %v5365_v8 = vld [vmem:[%s9124_s4 + $0x208] sm:$0xff] }
 0x4d2   :  { %6234 = vmatmul.mubr.msk.f32.vlgmr.msra.gmra.mrb[24].mxu0 %vm48_vm1, %v1795_v39 }
 0x4d3   :  { %6883 = vmatpush3.bf16.msra.mxu0 %v6880_v20  ;;  %6252 = vmatprep.mubr.msk.f32.mxu0 %vm48_vm1, %v1895_v24  ;;  %v2097_v20 = vmul.f32 %v5338_v19, %v2096_v27  ;;  %v5346_v24 = vld [vmem:[%s9124_s4 + $0x1b0] sm:$0xff] }
 0x4d4   :  { %6885 = vmatprep.subr.bf16.mxu0 %v6884_v16 }
 0x4d7   :  { %6887 = vmatpush3.bf16.msra.mxu0 %v6884_v16 }
 0x4d8   :  { %6889 = vmatprep.subr.bf16.mxu0 %v6888_v21 }
 0x4da   :  { %v7392_v52 = vpop.eup %7391 }
 0x4db   :  { %6891 = vmatpush3.bf16.msra.mxu0 %v6888_v21  ;;  %v6924_v21 = vpack.c.bf16 %v5347_v30, %v5346_v24  ;;  %v5351_v24 = vld [vmem:[%s9125_s3 + $0x78] sm:$0xf] }
 0x4dc   :  { %6893 = vmatprep.subr.bf16.mxu0 %v6892_v28  ;;  %v5367_v30 = vld [vmem:[%s9124_s4 + $0x218] sm:$0xff] }
 0x4df   :  { %6895 = vmatpush3.bf16.msra.mxu0 %v6892_v28  ;;  %v2196_v28 = vsub.s32 7, %v7974_v3 }
 0x4e0   :  { %6897 = vmatprep.subr.bf16.mxu0 %v6896_v29 }
 0x4e1   :  { %v2197_v48 = vrot.slane %v8003_v58, %v2196_v28  ;;  %v2098_v58 = vmul.f32 %v5339_v9, %v2096_v27  ;;  %v5370_v9 = vld [vmem:[%s9124_s4 + $0x230] sm:$0xff] }
 0x4e2   :  { %6253 = vmatmul.mubr.msk.f32.vlgmr.msra.gmra.mrb[24].mxu0 %vm48_vm1, %v1896_v34  ;;  %v5354_v34 = vld [vmem:[%s9124_s4 + $0x1d0] sm:$0xff] }
 0x4e3   :  { %6899 = vmatpush3.bf16.msra.mxu0 %v6896_v29  ;;  %6271 = vmatprep.mubr.msk.f32.mxu0 %vm48_vm1, %v1996_v40  ;;  %v1475_v40 = vrot.slane %v7392_v52, %v7977_v62  ;;  %v2198_v13 = vmul.f32 %v5350_v42, %v2197_v48  ;;  %v2199_v26 = vmul.f32 %v5351_v24, %v2197_v48  ;;  %v5371_v48 = vld [vmem:[%s9124_s4 + $0x238] sm:$0xff] }
 0x4e4   :  { %6901 = vmatprep.subr.bf16.mxu0 %v6900_v61 }
 0x4e5   :  { %v1476_v46 = vmul.f32 %v1475_v40, %v8136_v12  ;;  %v5358_v12 = vld [vmem:[%s9124_s4 + $0x1f0] sm:$0xff] }
 0x4e7   :  { %6903 = vmatpush3.bf16.msra.mxu0 %v6900_v61  ;;  %v5355_v61 = vld [vmem:[%s9124_s4 + $0x1d8] sm:$0xff]  ;;  %v1484_v19 = vrot.slane %v1476_v46, 7 }
 0x4e8   :  { %6905 = vmatprep.subr.bf16.mxu0 %v6904_v45  ;;  %v6932_v49 = vpack.c.bf16 %v5355_v61, %v5354_v34  ;;  %v5379_v46 = vld [vmem:[%s9124_s4 + $0x258] sm:$0xff] }
 0x4e9   :  { %v8306_v53 = vsel %vm389_vm7, %v1481_v57, %v1484_v19  ;;  %v5366_v57 = vld [vmem:[%s9124_s4 + $0x210] sm:$0xff] }
 0x4ea   :  { %v2298_v23 = vrot.slane %v8306_v53, %v7997_v56  ;;  %v6948_v63 = vpack.c.bf16 %v5367_v30, %v5366_v57 }
 0x4eb   :  { %6907 = vmatpush3.bf16.msra.mxu0 %v6904_v45  ;;  %v3234_v51 = vpop.trf.xlu1 }
 0x4ec   :  { %6909 = vmatprep.subr.bf16.mxu0 %v6908_v31  ;;  %6432 = vmatprep.mubr.msk.f32.mxu1 %vm220_vm9, %v3234_v51 }
 0x4ef   :  { %6911 = vmatpush3.bf16.msra.mxu0 %v6908_v31  ;;  %v3235_v25 = vpop.trf.xlu1  ;;  %v5356_v31 = vld [vmem:[%s9124_s4 + $0x1e0] sm:$0xff] }
 0x4f0   :  { %6433 = vmatmul.mubr.msk.f32.vlgmr.msra.gmra.mrb[50].mxu1 %vm220_vm9, %v3235_v25  ;;  %6913 = vmatprep.subr.bf16.mxu0 %v6912_v32  ;;  %v6936_v38 = vpack.c.bf16 %v5357_v14, %v5356_v31  ;;  %v2399_v31 = vrot.slane %v8306_v53, %v7994_v55  ;;  %v5378_v14 = vld [vmem:[%s9124_s4 + $0x250] sm:$0xff] }
 0x4f1   :  { %v6964_v19 = vpack.c.bf16 %v5379_v46, %v5378_v14  ;;  %v5395_v14 = vld [vmem:[%s9124_s4 + $0x2b8] sm:$0xff] }
 0x4f2   :  { %6272 = vmatmul.mubr.msk.f32.vlgmr.msra.gmra.mrb[24].mxu0 %vm48_vm1, %v1997_v59 }
 0x4f3   :  { %6915 = vmatpush3.bf16.msra.mxu0 %v6912_v32  ;;  %6290 = vmatprep.mubr.msk.f32.mxu0 %vm48_vm1, %v2097_v20  ;;  %v8221_v10 = vpop.f32.mrb[26].mxu1  ;;  %v3236_v41 = vpop.trf.xlu1  ;;  %v5364_v20 = vld [vmem:[%s9124_s4 + $0x200] sm:$0xff] }
 0x4f4   :  { %v8223_v60 = vpop.f32.mrb[27].mxu1  ;;  %6917 = vmatprep.subr.bf16.mxu0 %v6916_v35  ;;  %v3386_v39 = vsel %vm48_vm1, %v8221_v10, -inf  ;;  %6435 = vmatprep.mubr.msk.f32.mxu1 %vm220_vm9, %v3236_v41 }
 0x4f5   :  { %3387 = vmax.xlane.f32.xlu1 %v3386_v39  ;;  %v3383_v16 = vsel %vm48_vm1, %v8223_v60, -inf }
 0x4f6   :  { %3384 = vmax.xlane.f32.xlu0 %v3383_v16  ;;  %v6944_v16 = vpack.c.bf16 %v5365_v8, %v5364_v20  ;;  %v5381_v20 = vld [vmem:[%s9124_s4 + $0x268] sm:$0xff] }
 0x4f7   :  { %6919 = vmatpush3.bf16.msra.mxu0 %v6916_v35  ;;  %v3237_v5 = vpop.trf.xlu1  ;;  %v6940_v35 = vpack.c.bf16 %v5359_v0, %v5358_v12 }
 0x4f8   :  { %6436 = vmatmul.mubr.msk.f32.gmra.mrb[52].mxu1 %vm220_vm9, %v3237_v5  ;;  %6921 = vmatprep.subr.bf16.mxu0 %v6920_v37 }
 0x4fb   :  { %6923 = vmatpush3.bf16.msra.mxu0 %v6920_v37  ;;  %v8244_v43 = vpop.f32.mrb[28].mxu1  ;;  %v3238_v29 = vpop.trf.xlu1 }
 0x4fc   :  { %6925 = vmatprep.subr.bf16.mxu0 %v6924_v21  ;;  %v3392_v44 = vsel %vm48_vm1, %v8244_v43, -inf  ;;  %v8248_v6 = vpop.f32.mrb[29].mxu1  ;;  %6438 = vmatprep.mubr.msk.f32.mxu1 %vm220_vm9, %v3238_v29  ;;  %v5368_v29 = vld [vmem:[%s9124_s4 + $0x220] sm:$0xff] }
 0x4fd   :  { %3393 = vmax.xlane.f32.xlu0 %v3392_v44  ;;  %v3389_v11 = vsel %vm48_vm1, %v8248_v6, -inf  ;;  %v5369_v44 = vld [vmem:[%s9124_s4 + $0x228] sm:$0xff] }
 0x4ff   :  { %6927 = vmatpush3.bf16.msra.mxu0 %v6924_v21  ;;  %v3239_v45 = vpop.trf.xlu1  ;;  %v5362_v21 = vld [vmem:[%s9125_s3 + $0x80] sm:$0xff] }
 0x500   :  { %6439 = vmatmul.mubr.msk.f32.gmra.mrb[54].mxu1 %vm220_vm9, %v3239_v45  ;;  %6929 = vmatprep.subr.bf16.mxu0 %v6928_v33  ;;  %v2299_v52 = vmul.f32 %v5362_v21, %v2298_v23  ;;  %v5376_v45 = vld [vmem:[%s9124_s4 + $0x240] sm:$0xff]  ;;  %v5389_v21 = vld [vmem:[%s9124_s4 + $0x288] sm:$0xff] }
 0x501   :  { %3390 = vmax.xlane.f32.xlu0 %v3389_v11  ;;  %v6956_v11 = vpack.c.bf16 %v5371_v48, %v5370_v9  ;;  %v5386_v9 = vld [vmem:[%s9125_s3 + $0xa0] sm:$0xff] }
 0x502   :  { %6291 = vmatmul.mubr.msk.f32.vlgmr.msra.gmra.mrb[24].mxu0 %vm48_vm1, %v2098_v58  ;;  %v5377_v58 = vld [vmem:[%s9124_s4 + $0x248] sm:$0xff] }
 0x503   :  { %6931 = vmatpush3.bf16.msra.mxu0 %v6928_v33  ;;  %6309 = vmatprep.mubr.msk.f32.mxu0 %vm48_vm1, %v2198_v13  ;;  %v8279_v51 = vpop.f32.mrb[30].mxu1  ;;  %v3240_v32 = vpop.trf.xlu1  ;;  %v6952_v33 = vpack.c.bf16 %v5369_v44, %v5368_v29  ;;  %v5363_v13 = vld [vmem:[%s9125_s3 + $0x88] sm:$0xf]  ;;  %v5390_v29 = vld [vmem:[%s9124_s4 + $0x290] sm:$0xff]  ;;  %v5391_v44 = vld [vmem:[%s9124_s4 + $0x298] sm:$0xff] }
 0x504   :  { %6933 = vmatprep.subr.bf16.mxu0 %v6932_v49  ;;  %v3398_v17 = vsel %vm48_vm1, %v8279_v51, -inf  ;;  %v8283_v27 = vpop.f32.mrb[31].mxu1  ;;  %6441 = vmatprep.mubr.msk.f32.mxu1 %vm220_vm9, %v3240_v32  ;;  %v2300_v0 = vmul.f32 %v5363_v13, %v2298_v23 }
 0x505   :  { %3399 = vmax.xlane.f32.xlu0 %v3398_v17  ;;  %v3395_v25 = vsel %vm48_vm1, %v8283_v27, -inf  ;;  %v5374_v17 = vld [vmem:[%s9125_s3 + $0x90] sm:$0xff] }
 0x507   :  { %6935 = vmatpush3.bf16.msra.mxu0 %v6932_v49  ;;  %v3241_v59 = vpop.trf.xlu1  ;;  %v6960_v49 = vpack.c.bf16 %v5377_v58, %v5376_v45  ;;  %v5392_v58 = vld [vmem:[%s9124_s4 + $0x2a0] sm:$0xff] }
 0x508   :  { %6442 = vmatmul.mubr.msk.f32.gmra.mrb[56].mxu1 %vm220_vm9, %v3241_v59  ;;  %6937 = vmatprep.subr.bf16.mxu0 %v6936_v38 }
 0x509   :  { %3396 = vmax.xlane.f32.xlu0 %v3395_v25  ;;  %6498 = vmatprep.mubr.msk.f32.mxu1 %vm7466_vm0, %v7467_v4  ;;  %v2400_v25 = vmul.f32 %v5374_v17, %v2399_v31  ;;  %v5400_v17 = vld [vmem:[%s9124_s4 + $0x2c0] sm:$0xff] }
 0x50b   :  { %6939 = vmatpush3.bf16.msra.mxu0 %v6936_v38  ;;  %v8308_v41 = vpop.f32.mrb[32].mxu1 }
 0x50c   :  { %6941 = vmatprep.subr.bf16.mxu0 %v6940_v35  ;;  %v3404_v39 = vsel %vm48_vm1, %v8308_v41, -inf  ;;  %v8312_v37 = vpop.f32.mrb[33].mxu1 }
 0x50d   :  { %3405 = vmax.xlane.f32.xlu0 %v3404_v39  ;;  %v3401_v5 = vsel %vm48_vm1, %v8312_v37, -inf  ;;  %v5382_v39 = vld [vmem:[%s9124_s4 + $0x270] sm:$0xff] }
 0x50f   :  { %6943 = vmatpush3.bf16.msra.mxu0 %v6940_v35  ;;  %v5380_v35 = vld [vmem:[%s9124_s4 + $0x260] sm:$0xff] }
 0x510   :  { %6945 = vmatprep.subr.bf16.mxu0 %v6944_v16  ;;  %v6968_v8 = vpack.c.bf16 %v5381_v20, %v5380_v35  ;;  %v5403_v35 = vld [vmem:[%s9124_s4 + $0x2d8] sm:$0xff]  ;;  %v5398_v20 = vld [vmem:[%s9125_s3 + $0xb0] sm:$0xff] }
 0x511   :  { %3402 = vmax.xlane.f32.xlu0 %v3401_v5  ;;  %v5388_v5 = vld [vmem:[%s9124_s4 + $0x280] sm:$0xff] }
 0x512   :  { %6310 = vmatmul.mubr.msk.f32.vlgmr.msra.gmra.mrb[24].mxu0 %vm48_vm1, %v2199_v26  ;;  %v6976_v26 = vpack.c.bf16 %v5389_v21, %v5388_v5  ;;  %v5404_v5 = vld [vmem:[%s9124_s4 + $0x2e0] sm:$0xff]  ;;  %v5405_v21 = vld [vmem:[%s9124_s4 + $0x2e8] sm:$0xff] }
 0x513   :  { %6947 = vmatpush3.bf16.msra.mxu0 %v6944_v16  ;;  %6328 = vmatprep.mubr.msk.f32.mxu0 %vm48_vm1, %v2299_v52  ;;  %v5383_v16 = vld [vmem:[%s9124_s4 + $0x278] sm:$0xff]  ;;  %v2500_v52 = vrot.slane %v8306_v53, %v8050_v47 }
 0x514   :  { %6949 = vmatprep.subr.bf16.mxu0 %v6948_v63  ;;  %v6972_v30 = vpack.c.bf16 %v5383_v16, %v5382_v39 }
 0x515   :  { %v2501_v45 = vmul.f32 %v5386_v9, %v2500_v52 }
 0x516   :  { %v8344_v34 = vpop.f32.mrb[34].mxu1 }
 0x517   :  { %6951 = vmatpush3.bf16.msra.mxu0 %v6948_v63  ;;  %v3410_v61 = vsel %vm48_vm1, %v8344_v34, -inf  ;;  %v8348_v40 = vpop.f32.mrb[35].mxu1  ;;  %v5375_v63 = vld [vmem:[%s9125_s3 + $0x98] sm:$0xf] }
 0x518   :  { %3411 = vmax.xlane.f32.xlu0 %v3410_v61  ;;  %6953 = vmatprep.subr.bf16.mxu0 %v6952_v33  ;;  %v3407_v42 = vsel %vm48_vm1, %v8348_v40, -inf  ;;  %v2401_v61 = vmul.f32 %v5375_v63, %v2399_v31  ;;  %v5394_v31 = vld [vmem:[%s9124_s4 + $0x2b0] sm:$0xff] }
 0x519   :  { %v6988_v46 = vpack.c.bf16 %v5395_v14, %v5394_v31 }
 0x51b   :  { %6955 = vmatpush3.bf16.msra.mxu0 %v6952_v33 }
 0x51c   :  { %3408 = vmax.xlane.f32.xlu0 %v3407_v42  ;;  %6957 = vmatprep.subr.bf16.mxu0 %v6956_v11  ;;  %v6980_v42 = vpack.c.bf16 %v5391_v44, %v5390_v29  ;;  %v5407_v29 = vld [vmem:[%s9124_s4 + $0x2f8] sm:$0xff] }
 0x51e   :  { %v8369_v32 = vpop.f32.mrb[36].mxu1 }
 0x51f   :  { %6959 = vmatpush3.bf16.msra.mxu0 %v6956_v11  ;;  %v3416_v38 = vsel %vm48_vm1, %v8369_v32, -inf  ;;  %v8376_v12 = vpop.f32.mrb[37].mxu1 }
 0x520   :  { %3417 = vmax.xlane.f32.xlu0 %v3416_v38  ;;  %6961 = vmatprep.subr.bf16.mxu0 %v6960_v49  ;;  %v3413_v59 = vsel %vm48_vm1, %v8376_v12, -inf  ;;  %v5401_v38 = vld [vmem:[%s9124_s4 + $0x2c8] sm:$0xff] }
 0x522   :  { %6329 = vmatmul.mubr.msk.f32.vlgmr.msra.gmra.mrb[24].mxu0 %vm48_vm1, %v2300_v0  ;;  %v6992_v0 = vpack.c.bf16 %v5401_v38, %v5400_v17 }
 0x523   :  { %6963 = vmatpush3.bf16.msra.mxu0 %v6960_v49  ;;  %6347 = vmatprep.mubr.msk.f32.mxu0 %vm48_vm1, %v2400_v25  ;;  %v5393_v49 = vld [vmem:[%s9124_s4 + $0x2a8] sm:$0xff]  ;;  %v2601_v25 = vrot.slane %v8306_v53, %v7977_v62 }
 0x524   :  { %3414 = vmax.xlane.f32.xlu0 %v3413_v59  ;;  %6965 = vmatprep.subr.bf16.mxu0 %v6964_v19  ;;  %v6984_v13 = vpack.c.bf16 %v5393_v49, %v5392_v58  ;;  %v5402_v59 = vld [vmem:[%s9124_s4 + $0x2d0] sm:$0xff] }
 0x525   :  { %v6996_v16 = vpack.c.bf16 %v5403_v35, %v5402_v59  ;;  %v2602_v53 = vmul.f32 %v5398_v20, %v2601_v25 }
 0x526   :  { %v8394_v24 = vpop.f32.mrb[38].mxu1 }
 0x527   :  { %6967 = vmatpush3.bf16.msra.mxu0 %v6964_v19  ;;  %v8396_v23 = vpop.f32.mrb[39].mxu1  ;;  %v5387_v19 = vld [vmem:[%s9125_s3 + $0xa8] sm:$0xf]  ;;  %v3422_v31 = vsel %vm48_vm1, %v8394_v24, -inf }
 0x528   :  { %6969 = vmatprep.subr.bf16.mxu0 %v6968_v8  ;;  %v3419_v57 = vsel %vm48_vm1, %v8396_v23, -inf }
 0x529   :  { %3420 = vmax.xlane.f32.xlu1 %v3419_v57 }
 0x52b   :  { %6971 = vmatpush3.bf16.msra.mxu0 %v6968_v8  ;;  %v2502_v8 = vmul.f32 %v5387_v19, %v2500_v52  ;;  %v5406_v52 = vld [vmem:[%s9124_s4 + $0x2f0] sm:$0xff] }
 0x52c   :  { %6973 = vmatprep.subr.bf16.mxu0 %v6972_v30  ;;  %v7004_v9 = vpack.c.bf16 %v5407_v29, %v5406_v52 }
 0x52e   :  { %v8417_v33 = vpop.f32.mrb[40].mxu1 }
 0x52f   :  { %6975 = vmatpush3.bf16.msra.mxu0 %v6972_v30  ;;  %v8422_v48 = vpop.f32.mrb[41].mxu1 }
 0x530   :  { %6977 = vmatprep.subr.bf16.mxu0 %v6976_v26  ;;  %v3425_v11 = vsel %vm48_vm1, %v8422_v48, -inf }
 0x531   :  { %3426 = vmax.xlane.f32.xlu1 %v3425_v11 }
 0x532   :  { %6348 = vmatmul.mubr.msk.f32.vlgmr.msra.gmra.mrb[24].mxu0 %vm48_vm1, %v2401_v61 }
 0x533   :  { %6979 = vmatpush3.bf16.msra.mxu0 %v6976_v26  ;;  %6366 = vmatprep.mubr.msk.f32.mxu0 %vm48_vm1, %v2501_v45  ;;  %v7000_v26 = vpack.c.bf16 %v5405_v21, %v5404_v5 }
 0x534   :  { %6981 = vmatprep.subr.bf16.mxu0 %v6980_v42 }
 0x537   :  { %6983 = vmatpush3.bf16.msra.mxu0 %v6980_v42  ;;  %v5399_v42 = vld [vmem:[%s9125_s3 + $0xb8] sm:$0xf] }
 0x538   :  { %6985 = vmatprep.subr.bf16.mxu0 %v6984_v13  ;;  %v2603_v58 = vmul.f32 %v5399_v42, %v2601_v25 }
 0x53b   :  { %6987 = vmatpush3.bf16.msra.mxu0 %v6984_v13 }
 0x53c   :  { %6989 = vmatprep.subr.bf16.mxu0 %v6988_v46 }
 0x53f   :  { %6991 = vmatpush3.bf16.msra.mxu0 %v6988_v46 }
 0x540   :  { %v8460_v39 = vpop.f32.mrb[42].mxu1  ;;  %6993 = vmatprep.subr.bf16.mxu0 %v6992_v0 }
 0x541   :  { %v8462_v57 = vpop.f32.mrb[43].mxu1  ;;  %v3434_v30 = vsel %vm48_vm1, %v8460_v39, -inf }
 0x542   :  { %6367 = vmatmul.mubr.msk.f32.vlgmr.msra.gmra.mrb[24].mxu0 %vm48_vm1, %v2502_v8  ;;  %3435 = vmax.xlane.f32.xlu0 %v3434_v30  ;;  %v3431_v63 = vsel %vm48_vm1, %v8462_v57, -inf }
 0x543   :  { %6995 = vmatpush3.bf16.msra.mxu0 %v6992_v0  ;;  %6385 = vmatprep.mubr.msk.f32.mxu0 %vm48_vm1, %v2602_v53  ;;  %v3428_v0 = vsel %vm48_vm1, %v8417_v33, -inf }
 0x544   :  { %6997 = vmatprep.subr.bf16.mxu0 %v6996_v16 }
 0x546   :  { %3432 = vmax.xlane.f32.xlu0 %v3431_v63 }
 0x547   :  { %6999 = vmatpush3.bf16.msra.mxu0 %v6996_v16 }
 0x548   :  { %v8482_v44 = vpop.f32.mrb[44].mxu1  ;;  %7001 = vmatprep.subr.bf16.mxu0 %v7000_v26 }
 0x549   :  { %v8484_v61 = vpop.f32.mrb[45].mxu1  ;;  %v3440_v11 = vsel %vm48_vm1, %v8482_v44, -inf }
 0x54a   :  { %3441 = vmax.xlane.f32.xlu0 %v3440_v11  ;;  %v3437_v45 = vsel %vm48_vm1, %v8484_v61, -inf }
 0x54b   :  { %7003 = vmatpush3.bf16.msra.mxu0 %v7000_v26 }
 0x54c   :  { %7005 = vmatprep.subr.bf16.mxu0 %v7004_v9 }
 0x54e   :  { %3438 = vmax.xlane.f32.xlu0 %v3437_v45 }
 0x54f   :  { %7007 = vmatpush3.bf16.msra.mxu0 %v7004_v9 }
 0x550   :  { %v8493_v49 = vpop.f32.mrb[46].mxu1  ;;  %7008 = vmatprep.subr.bf16.mxu0 %v7465_v2 }
 0x551   :  { %v8496_v13 = vpop.f32.mrb[47].mxu1  ;;  %v3446_v46 = vsel %vm48_vm1, %v8493_v49, -inf }
 0x552   :  { %6386 = vmatmul.mubr.msk.f32.vlgmr.msra.gmra.mrb[24].mxu0 %vm48_vm1, %v2603_v58  ;;  %3423 = vmax.xlane.f32.xlu0 %v3422_v31  ;;  %v3443_v14 = vsel %vm48_vm1, %v8496_v13, -inf }
 0x553   :  { %3444 = vmax.xlane.f32.xlu1 %v3443_v14  ;;  %6460 = vmatprep.mubr.msk.f32.mxu0 %vm7466_vm0, %v7467_v4 }
 0x556   :  { %3447 = vmax.xlane.f32.xlu0 %v3446_v46 }
 0x558   :  { %v8507_v17 = vpop.f32.mrb[48].mxu1 }
 0x559   :  { %v8509_v38 = vpop.f32.mrb[49].mxu1  ;;  %v3452_v25 = vsel %vm48_vm1, %v8507_v17, -inf }
 0x55a   :  { %3429 = vmax.xlane.f32.xlu0 %v3428_v0  ;;  %v3449_v19 = vsel %vm48_vm1, %v8509_v38, -inf }
 0x55b   :  { %3450 = vmax.xlane.f32.xlu1 %v3449_v19 }
 0x55e   :  { %3453 = vmax.xlane.f32.xlu0 %v3452_v25 }
 0x56c   :  { %3575 = vrot.lane.b32.xlu1 %v7829_v22, %s7468_s25 }
 0x570   :  { %3783 = vrot.lane.b32.xlu1 %v7885_v7, %s7468_s25 }
 0x574   :  { %3679 = vrot.lane.b32.xlu0 %v7864_v54, %s7468_s25 }
 0x582   :  { %v3388_v59 = vpop.xlane.xlu1 %3387 }
 0x583   :  { %v3480_v35 = vsub.f32 %v8221_v10, %v3388_v59  ;;  %v3385_v20 = vpop.xlane.xlu0 %3384 }
 0x584   :  { %v3479_v8 = vsub.f32 %v8223_v60, %v3385_v20 }
 0x585   :  { %v3513_v16 = vmul.f32 1.442695, %v3480_v35 }
 0x586   :  { %v3511_v53 = vmul.f32 1.442695, %v3479_v8 }
 0x587   :  { %7393 = vpow2.f32 %v3513_v16 }
 0x588   :  { %7395 = vpow2.f32 %v3511_v53 }
 0x58a   :  { %v3394_v30 = vpop.xlane.xlu0 %3393 }
 0x58b   :  { %v3482_v5 = vsub.f32 %v8244_v43, %v3394_v30 }
 0x58d   :  { %v3517_v22 = vmul.f32 1.442695, %v3482_v5 }
 0x58e   :  { %v3391_v21 = vpop.xlane.xlu0 %3390 }
 0x58f   :  { %v3481_v7 = vsub.f32 %v8248_v6, %v3391_v21  ;;  %7397 = vpow2.f32 %v3517_v22 }
 0x591   :  { %v7394_v26 = vpop.eup %7393  ;;  %v3515_v63 = vmul.f32 1.442695, %v3481_v7 }
 0x592   :  { %v7396_v54 = vpop.eup %7395  ;;  %v3400_v52 = vpop.xlane.xlu0 %3399 }
 0x593   :  { %7399 = vpow2.f32 %v3515_v63  ;;  %v3484_v10 = vsub.f32 %v8279_v51, %v3400_v52  ;;  %v7009_v60 = vpack.c.bf16 %v7394_v26, %v7396_v54 }
 0x595   :  { %7011 = vmatpush3.bf16.xpose.msk.msra.mxu0 %vm7790_vm10, %v7009_v60  ;;  %v3521_v29 = vmul.f32 1.442695, %v3484_v10 }
 0x596   :  { %v3397_v9 = vpop.xlane.xlu0 %3396  ;;  %7012 = vmatprep.subr.bf16.mxu0 %v7465_v2 }
 0x597   :  { %v3483_v43 = vsub.f32 %v8283_v27, %v3397_v9  ;;  %7401 = vpow2.f32 %v3521_v29 }
 0x599   :  { %v3519_v11 = vmul.f32 1.442695, %v3483_v43  ;;  %v7398_v45 = vpop.eup %7397 }
 0x59a   :  { %v3406_v6 = vpop.xlane.xlu0 %3405 }
 0x59b   :  { %7403 = vpow2.f32 %v3519_v11  ;;  %v3486_v42 = vsub.f32 %v8308_v41, %v3406_v6 }
 0x59d   :  { %v7400_v58 = vpop.eup %7399  ;;  %v3525_v31 = vmul.f32 1.442695, %v3486_v42 }
 0x59e   :  { %v3403_v51 = vpop.xlane.xlu0 %3402  ;;  %v7013_v14 = vpack.c.bf16 %v7398_v45, %v7400_v58 }
 0x59f   :  { %v3485_v46 = vsub.f32 %v8312_v37, %v3403_v51  ;;  %7405 = vpow2.f32 %v3525_v31 }
 0x5a0   :  { %7015 = vmatpush3.bf16.xpose.msk.msra.mxu0 %vm7790_vm10, %v7013_v14 }
 0x5a1   :  { %v3523_v0 = vmul.f32 1.442695, %v3485_v46  ;;  %7016 = vmatprep.subr.bf16.mxu0 %v7465_v2  ;;  %v7402_v27 = vpop.eup %7401 }
 0x5a3   :  { %7407 = vpow2.f32 %v3523_v0 }
 0x5a5   :  { %v7404_v19 = vpop.eup %7403  ;;  %v3412_v25 = vpop.xlane.xlu0 %3411 }
 0x5a6   :  { %v3488_v41 = vsub.f32 %v8344_v34, %v3412_v25  ;;  %v7017_v59 = vpack.c.bf16 %v7402_v27, %v7404_v19 }
 0x5a8   :  { %7019 = vmatpush3.bf16.xpose.msk.msra.mxu0 %vm7790_vm10, %v7017_v59  ;;  %v3529_v35 = vmul.f32 1.442695, %v3488_v41 }
 0x5a9   :  { %v3409_v20 = vpop.xlane.xlu0 %3408  ;;  %7020 = vmatprep.subr.bf16.mxu0 %v7465_v2  ;;  %v7406_v8 = vpop.eup %7405 }
 0x5aa   :  { %v3487_v37 = vsub.f32 %v8348_v40, %v3409_v20  ;;  %7409 = vpow2.f32 %v3529_v35 }
 0x5ac   :  { %v3527_v16 = vmul.f32 1.442695, %v3487_v37 }
 0x5ad   :  { %v7408_v53 = vpop.eup %7407  ;;  %v3418_v30 = vpop.xlane.xlu0 %3417 }
 0x5ae   :  { %7411 = vpow2.f32 %v3527_v16  ;;  %v3490_v5 = vsub.f32 %v8369_v32, %v3418_v30  ;;  %v7021_v22 = vpack.c.bf16 %v7406_v8, %v7408_v53 }
 0x5b0   :  { %7023 = vmatpush3.bf16.xpose.msk.msra.mxu0 %vm7790_vm10, %v7021_v22  ;;  %v3533_v34 = vmul.f32 1.442695, %v3490_v5 }
 0x5b1   :  { %v3415_v21 = vpop.xlane.xlu0 %3414  ;;  %7024 = vmatprep.subr.bf16.mxu0 %v7465_v2 }
 0x5b2   :  { %v3489_v7 = vsub.f32 %v8376_v12, %v3415_v21  ;;  %7413 = vpow2.f32 %v3533_v34 }
 0x5b4   :  { %v3531_v26 = vmul.f32 1.442695, %v3489_v7  ;;  %v8547_v40 = vpop.eup %7409 }
 0x5b6   :  { %7415 = vpow2.f32 %v3531_v26 }
 0x5b8   :  { %v8549_v63 = vpop.eup %7411 }
 0x5b9   :  { %v7025_v32 = vpack.c.bf16 %v8547_v40, %v8549_v63 }
 0x5bc   :  { %v8553_v54 = vpop.eup %7413 }
 0x5c0   :  { %v8555_v52 = vpop.eup %7415 }
 0x5c1   :  { %v7029_v10 = vpack.c.bf16 %v8553_v54, %v8555_v52 }
 0x5c3   :  { %v8559_v60 = vpop.f32.mrb[50].mxu1 }
 0x5c4   :  { %v8561_v12 = vpop.f32.mrb[51].mxu1  ;;  %v3458_v29 = vsel %vm48_vm1, %v8559_v60, -inf }
 0x5c5   :  { %3459 = vmax.xlane.f32.xlu0 %v3458_v29  ;;  %v3455_v9 = vsel %vm48_vm1, %v8561_v12, -inf }
 0x5c6   :  { %3456 = vmax.xlane.f32.xlu1 %v3455_v9 }
 0x5cb   :  { %v8567_v43 = vpop.f32.mrb[52].mxu1 }
 0x5cc   :  { %v8569_v11 = vpop.f32.mrb[53].mxu1  ;;  %v3464_v6 = vsel %vm48_vm1, %v8567_v43, -inf }
 0x5cd   :  { %3465 = vmax.xlane.f32.xlu1 %v3464_v6  ;;  %v3461_v42 = vsel %vm48_vm1, %v8569_v11, -inf }
 0x5ce   :  { %3462 = vmax.xlane.f32.xlu0 %v3461_v42 }
 0x5cf   :  { %v3436_v45 = vpop.xlane.xlu0 %3435 }
 0x5d0   :  { %v3496_v58 = vsub.f32 %v8460_v39, %v3436_v45  ;;  %v3421_v39 = vpop.xlane.xlu1 %3420 }
 0x5d1   :  { %v3491_v35 = vsub.f32 %v8396_v23, %v3421_v39 }
 0x5d2   :  { %v3545_v31 = vmul.f32 1.442695, %v3496_v58 }
 0x5d3   :  { %v3433_v51 = vpop.xlane.xlu0 %3432  ;;  %v8576_v14 = vpop.f32.mrb[54].mxu1 }
 0x5d4   :  { %v3495_v46 = vsub.f32 %v8462_v57, %v3433_v51  ;;  %v8579_v0 = vpop.f32.mrb[55].mxu1  ;;  %v3470_v27 = vsel %vm48_vm1, %v8576_v14, -inf  ;;  %7417 = vpow2.f32 %v3545_v31  ;;  %v3427_v8 = vpop.xlane.xlu1 %3426 }
 0x5d5   :  { %3471 = vmax.xlane.f32.xlu1 %v3470_v27  ;;  %v3467_v19 = vsel %vm48_vm1, %v8579_v0, -inf  ;;  %v3493_v9 = vsub.f32 %v8422_v48, %v3427_v8 }
 0x5d6   :  { %v3543_v25 = vmul.f32 1.442695, %v3495_v46  ;;  %3468 = vmax.xlane.f32.xlu0 %v3467_v19 }
 0x5d7   :  { %v3442_v41 = vpop.xlane.xlu0 %3441 }
 0x5d8   :  { %7419 = vpow2.f32 %v3543_v25  ;;  %v3498_v59 = vsub.f32 %v8482_v44, %v3442_v41  ;;  %v3535_v44 = vmul.f32 1.442695, %v3491_v35 }
 0x5da   :  { %v3549_v57 = vmul.f32 1.442695, %v3498_v59  ;;  %v33_v59 = vld [vmem:[%s9126_s5] sm:$0xff] }
 0x5db   :  { %v3439_v20 = vpop.xlane.xlu0 %3438  ;;  %v8587_v37 = vpop.f32.mrb[56].mxu1 }
 0x5dc   :  { %v3497_v16 = vsub.f32 %v8484_v61, %v3439_v20  ;;  %v8590_v53 = vpop.f32.mrb[57].mxu1  ;;  %v3476_v30 = vsel %vm48_vm1, %v8587_v37, -inf  ;;  %7421 = vpow2.f32 %v3549_v57 }
 0x5dd   :  { %3477 = vmax.xlane.f32.xlu1 %v3476_v30  ;;  %v3473_v5 = vsel %vm48_vm1, %v8590_v53, -inf }
 0x5de   :  { %v3547_v22 = vmul.f32 1.442695, %v3497_v16  ;;  %3474 = vmax.xlane.f32.xlu0 %v3473_v5  ;;  %v7418_v7 = vpop.eup %7417 }
 0x5df   :  { %v3424_v23 = vpop.xlane.xlu0 %3423 }
 0x5e0   :  { %7423 = vpow2.f32 %v3547_v22  ;;  %v3492_v34 = vsub.f32 %v8394_v24, %v3424_v23  ;;  %v3445_v21 = vpop.xlane.xlu1 %3444  ;;  %v3539_v24 = vmul.f32 1.442695, %v3493_v9 }
 0x5e1   :  { %v3499_v61 = vsub.f32 %v8496_v13, %v3445_v21  ;;  %7425 = vpow2.f32 %v3535_v44 }
 0x5e2   :  { %v7420_v26 = vpop.eup %7419  ;;  %v3537_v29 = vmul.f32 1.442695, %v3492_v34 }
 0x5e3   :  { %v3551_v6 = vmul.f32 1.442695, %v3499_v61  ;;  %v3448_v42 = vpop.xlane.xlu0 %3447  ;;  %v7041_v45 = vpack.c.bf16 %v7418_v7, %v7420_v26 }
 0x5e4   :  { %7427 = vpow2.f32 %v3537_v29  ;;  %v3500_v58 = vsub.f32 %v8493_v49, %v3448_v42 }
 0x5e5   :  { %7043 = vmatpush3.bf16.xpose.msk.msra.mxu1 %vm7790_vm10, %v7041_v45  ;;  %7429 = vpow2.f32 %v3551_v6 }
 0x5e6   :  { %v3553_v31 = vmul.f32 1.442695, %v3500_v58  ;;  %7044 = vmatprep.subr.bf16.mxu1 %v7465_v2  ;;  %v7422_v48 = vpop.eup %7421 }
 0x5e7   :  { %v3430_v13 = vpop.xlane.xlu0 %3429 }
 0x5e8   :  { %7431 = vpow2.f32 %v3553_v31  ;;  %v3494_v51 = vsub.f32 %v8417_v33, %v3430_v13  ;;  %v3451_v46 = vpop.xlane.xlu1 %3450 }
 0x5e9   :  { %v3501_v27 = vsub.f32 %v8509_v38, %v3451_v46  ;;  %7433 = vpow2.f32 %v3539_v24 }
 0x5ea   :  { %v7424_v19 = vpop.eup %7423  ;;  %v3541_v25 = vmul.f32 1.442695, %v3494_v51 }
 0x5eb   :  { %v3555_v49 = vmul.f32 1.442695, %v3501_v27  ;;  %v3454_v41 = vpop.xlane.xlu0 %3453  ;;  %v7045_v39 = vpack.c.bf16 %v7422_v48, %v7424_v19  ;;  %v7426_v20 = vpop.eup %7425 }
 0x5ec   :  { %7435 = vpow2.f32 %v3541_v25  ;;  %v3502_v35 = vsub.f32 %v8507_v17, %v3454_v41  ;;  %v3576_v57 = vpop.permute.xlu1 %3575  ;;  %v34_v17 = vld [vmem:[%s9126_s5 + $0x8] sm:$0xf] }
 0x5ed   :  { %6461 = vmatmul.mubr.msk.f32.vlgmr.msra.gmra.mrb[26].mxu0 %vm48_vm1, %v3576_v57  ;;  %7047 = vmatpush3.bf16.xpose.msk.msra.mxu1 %vm7790_vm10, %v7045_v39  ;;  %7437 = vpow2.f32 %v3555_v49 }
 0x5ee   :  { %v7428_v33 = vpop.eup %7427  ;;  %v3557_v38 = vmul.f32 1.442695, %v3502_v35  ;;  %7027 = vmatpush3.bf16.xpose.msk.msra.mxu0 %vm7790_vm10, %v7025_v32  ;;  %2698 = vperm.xlu1 %7320, %v33_v59  }
 0x5ef   :  { %7048 = vmatprep.subr.bf16.mxu1 %v7465_v2  ;;  %7028 = vmatprep.subr.bf16.mxu0 %v7465_v2  ;;  %v7033_v8 = vpack.c.bf16 %v7428_v33, %v7426_v20  ;;  %v7430_v16 = vpop.eup %7429  ;;  %v3680_v54 = vpop.permute.xlu0 %3679 }
 0x5f0   :  { %7439 = vpow2.f32 %v3557_v38  ;;  %6479 = vmatprep.mubr.msk.f32.mxu0 %vm7466_vm0, %v7467_v4  ;;  %v5484_v38 = vld [vmem:[%s9124_s4 + $0x40] sm:$0xff] }
 0x5f2   :  { %v7432_v40 = vpop.eup %7431  ;;  %2703 = vperm.xlu1 %7320, %v34_v17   ;;  %v5485_v17 = vld [vmem:[%s9124_s4 + $0x48] sm:$0xff] }
 0x5f3   :  { %v7049_v63 = vpack.c.bf16 %v7432_v40, %v7430_v16  ;;  %v7434_v32 = vpop.eup %7433  ;;  %v7072_v40 = vpack.c.bf16 %v5485_v17, %v5484_v38  ;;  %v4018_v38 = vld [vmem:[%s9124_s4 + $0x38] sm:$0xff] }
 0x5f4   :  { %3887 = vrot.lane.b32.xlu0 %v7914_v18, %s7468_s25  ;;  %v3784_v18 = vpop.permute.xlu1 %3783 }
 0x5f5   :  { %7051 = vmatpush3.bf16.xpose.msk.msra.mxu1 %vm7790_vm10, %v7049_v63 }
 0x5f6   :  { %v7436_v30 = vpop.eup %7435  ;;  %7031 = vmatpush3.bf16.xpose.msk.msra.mxu0 %vm7790_vm10, %v7029_v10  ;;  %7052 = vmatprep.subr.bf16.mxu1 %v7465_v2 }
 0x5f7   :  { %7032 = vmatprep.subr.bf16.mxu0 %v7465_v2  ;;  %v7037_v5 = vpack.c.bf16 %v7436_v30, %v7434_v32  ;;  %v7438_v22 = vpop.eup %7437  ;;  %v5487_v32 = vld [vmem:[%s9124_s4 + $0x58] sm:$0xff] }
 0x5fa   :  { %v7440_v44 = vpop.eup %7439 }
 0x5fb   :  { %v7053_v23 = vpack.c.bf16 %v7440_v44, %v7438_v22  ;;  %v5488_v22 = vld [vmem:[%s9124_s4 + $0x60] sm:$0xff] }
 0x5fc   :  { %v7080_v44 = vpack.c.bf16 %v5489_v36, %v5488_v22 }
 0x5fd   :  { %7055 = vmatpush3.bf16.xpose.msk.msra.mxu1 %vm7790_vm10, %v7053_v23  ;;  %v5490_v23 = vld [vmem:[%s9124_s4 + $0x70] sm:$0xff] }
 0x5fe   :  { %7035 = vmatpush3.bf16.xpose.msk.msra.mxu0 %vm7790_vm10, %v7033_v8  ;;  %7056 = vmatprep.subr.bf16.mxu1 %v7465_v2 }
 0x5ff   :  { %7036 = vmatprep.subr.bf16.mxu0 %v7465_v2 }
 0x604   :  { %6499 = vmatmul.mubr.msk.f32.vlgmr.msra.gmra.mrb[58].mxu1 %vm48_vm1, %v3784_v18  ;;  %v5491_v18 = vld [vmem:[%s9124_s4 + $0x78] sm:$0xff] }
 0x605   :  { %6517 = vmatprep.mubr.msk.f32.mxu1 %vm7466_vm0, %v7467_v4 }
 0x606   :  { %7039 = vmatpush3.bf16.xpose.msk.msra.mxu0 %vm7790_vm10, %v7037_v5 }
 0x60d   :  { %6480 = vmatmul.mubr.msk.f32.vlgmr.msra.gmra.mrb[28].mxu0 %vm48_vm1, %v3680_v54  ;;  %v7084_v54 = vpack.c.bf16 %v5491_v18, %v5490_v23  ;;  %v5502_v23 = vld [vmem:[%s9124_s4 + $0xa0] sm:$0xff]  ;;  %v5503_v18 = vld [vmem:[%s9124_s4 + $0xa8] sm:$0xff] }
 0x625   :  { %v6387_v52 = vpop.f32.mrb[24].mxu0 }
 0x626   :  { %v2685_v10 = vpop.f32.mrb[25].mxu0 }
 0x652   :  { %v3460_v34 = vpop.xlane.xlu0 %3459 }
 0x653   :  { %v3504_v21 = vsub.f32 %v8559_v60, %v3460_v34  ;;  %v3457_v7 = vpop.xlane.xlu1 %3456 }
 0x654   :  { %v3503_v61 = vsub.f32 %v8561_v12, %v3457_v7 }
 0x655   :  { %v3561_v26 = vmul.f32 1.442695, %v3504_v21 }
 0x656   :  { %v3559_v29 = vmul.f32 1.442695, %v3503_v61 }
 0x657   :  { %7441 = vpow2.f32 %v3561_v26 }
 0x658   :  { %7443 = vpow2.f32 %v3559_v29 }
 0x65a   :  { %v3466_v9 = vpop.xlane.xlu1 %3465 }
 0x65b   :  { %v3506_v4 = vsub.f32 %v8567_v43, %v3466_v9  ;;  %v3463_v6 = vpop.xlane.xlu0 %3462 }
 0x65c   :  { %v3505_v42 = vsub.f32 %v8569_v11, %v3463_v6 }
 0x65d   :  { %v3565_v45 = vmul.f32 1.442695, %v3506_v4 }
 0x65e   :  { %v3563_v58 = vmul.f32 1.442695, %v3505_v42 }
 0x65f   :  { %7445 = vpow2.f32 %v3565_v45 }
 0x660   :  { %7447 = vpow2.f32 %v3563_v58 }
 0x661   :  { %v7442_v31 = vpop.eup %7441 }
 0x662   :  { %v7444_v24 = vpop.eup %7443  ;;  %v3472_v60 = vpop.xlane.xlu1 %3471 }
 0x663   :  { %v3508_v13 = vsub.f32 %v8576_v14, %v3472_v60  ;;  %v3469_v12 = vpop.xlane.xlu0 %3468  ;;  %v7057_v51 = vpack.c.bf16 %v7442_v31, %v7444_v24 }
 0x664   :  { %v3507_v46 = vsub.f32 %v8579_v0, %v3469_v12 }
 0x665   :  { %v3569_v48 = vmul.f32 1.442695, %v3508_v13  ;;  %7059 = vmatpush3.bf16.xpose.msk.msra.mxu1 %vm7790_vm10, %v7057_v51 }
 0x666   :  { %v3567_v43 = vmul.f32 1.442695, %v3507_v46  ;;  %7060 = vmatprep.subr.bf16.mxu1 %v7465_v2 }
 0x667   :  { %7449 = vpow2.f32 %v3569_v48 }
 0x668   :  { %7451 = vpow2.f32 %v3567_v43  ;;  %v5482_v43 = vld [vmem:[%s9125_s3 + $0x10] sm:$0xff] }
 0x669   :  { %v7446_v11 = vpop.eup %7445 }
 0x66a   :  { %v7448_v27 = vpop.eup %7447  ;;  %v3478_v19 = vpop.xlane.xlu1 %3477 }
 0x66b   :  { %v3510_v25 = vsub.f32 %v8587_v37, %v3478_v19  ;;  %v3475_v49 = vpop.xlane.xlu0 %3474  ;;  %v7061_v14 = vpack.c.bf16 %v7446_v11, %v7448_v27  ;;  %v5483_v11 = vld [vmem:[%s9125_s3 + $0x18] sm:$0xf] }
 0x66c   :  { %v3509_v41 = vsub.f32 %v8590_v53, %v3475_v49  ;;  %v4014_v49 = vld [vmem:[%s9124_s4 + $0x18] sm:$0xff] }
 0x66d   :  { %v3573_v39 = vmul.f32 1.442695, %v3510_v25  ;;  %7063 = vmatpush3.bf16.xpose.msk.msra.mxu1 %vm7790_vm10, %v7061_v14  ;;  %v4013_v25 = vld [vmem:[%s9124_s4 + $0x10] sm:$0xff]  ;;  %v4003_v14 = vld [vmem:[%s9125_s3] sm:$0xff] }
 0x66e   :  { %v3571_v0 = vmul.f32 1.442695, %v3509_v41  ;;  %v8660_v59 = vpop.permute.xlu1 %2698  ;;  %7064 = vmatprep.subr.bf16.mxu1 %v7465_v2 }
 0x66f   :  { %7453 = vpow2.f32 %v3573_v39  ;;  %v2706_v35 = vadd.f32 %v8660_v59, %v2685_v10  ;;  %v3888_v5 = vpop.permute.xlu0 %3887  ;;  %v4012_v10 = vld [vmem:[%s9124_s4 + $0x8] sm:$0xff] }
 0x670   :  { %7455 = vpow2.f32 %v3571_v0  ;;  %v7092_v0 = vpack.c.bf16 %v4014_v49, %v4013_v25  ;;  %v5509_v25 = vld [vmem:[%s9125_s3 + $0x38] sm:$0xf] }
 0x671   :  { %v7450_v57 = vpop.eup %7449  ;;  %2708 = vst.msk [vmem:[%s9127_s6] sm:$0xff] %vm48_vm1, %v2706_v35 }
 0x672   :  { %v7452_v37 = vpop.eup %7451  ;;  %v8668_v53 = vpop.permute.xlu1 %2703 }
 0x673   :  { %v2707_v20 = vadd.f32 %v6387_v52, %v8668_v53  ;;  %v7065_v33 = vpack.c.bf16 %v7450_v57, %v7452_v37  ;;  %v4011_v52 = vld [vmem:[%s9124_s4] sm:$0xff]  ;;  %v4016_v37 = vld [vmem:[%s9124_s4 + $0x28] sm:$0xff] }
 0x674   :  { %v7088_v34 = vpack.c.bf16 %v4012_v10, %v4011_v52  ;;  %v4015_v57 = vld [vmem:[%s9124_s4 + $0x20] sm:$0xff]  ;;  %v5504_v52 = vld [vmem:[%s9124_s4 + $0xb0] sm:$0xff]  ;;  %v5505_v10 = vld [vmem:[%s9124_s4 + $0xb8] sm:$0xff] }
 0x675   :  { %2710 = vst.msk [vmem:[%s9127_s6 + $0x8] sm:$0xf] %vm2709_vm12, %v2707_v20  ;;  %7067 = vmatpush3.bf16.xpose.msk.msra.mxu1 %vm7790_vm10, %v7065_v33  ;;  %v7096_v20 = vpack.c.bf16 %v4016_v37, %v4015_v57  ;;  %v4017_v33 = vld [vmem:[%s9124_s4 + $0x30] sm:$0xff]  ;;  %v5527_v37 = vld [vmem:[%s9124_s4 + $0x128] sm:$0xff] }
 0x676   :  { %7068 = vmatprep.subr.bf16.mxu1 %v7465_v2  ;;  %v5486_v2 = vld [vmem:[%s9124_s4 + $0x50] sm:$0xff]  ;;  %v7100_v17 = vpack.c.bf16 %v4018_v38, %v4017_v33  ;;  %v5529_v38 = vld [vmem:[%s9124_s4 + $0x138] sm:$0xff] }
 0x677   :  { %v7076_v30 = vpack.c.bf16 %v5487_v32, %v5486_v2  ;;  %v5500_v32 = vld [vmem:[%s9124_s4 + $0x90] sm:$0xff] }
 0x678   :  { %v5528_v33 = vld [vmem:[%s9124_s4 + $0x130] sm:$0xff] }
 0x679   :  { %v7454_v8 = vpop.eup %7453 }
 0x67a   :  { %v7456_v16 = vpop.eup %7455 }
 0x67b   :  { %v7069_v63 = vpack.c.bf16 %v7454_v8, %v7456_v16  ;;  %v5498_v8 = vld [vmem:[%s9124_s4 + $0x80] sm:$0xff]  ;;  %v5499_v16 = vld [vmem:[%s9124_s4 + $0x88] sm:$0xff] }
 0x67d   :  { %7071 = vmatpush3.bf16.xpose.msk.msra.mxu1 %vm7790_vm10, %v7069_v63  ;;  %v4004_v63 = vld [vmem:[%s9125_s3 + $0x8] sm:$0xf] }
 0x67e   :  { %7073 = vmatprep.subr.bf16.mxu1 %v7072_v40 }
 0x684   :  { %6518 = vmatmul.mubr.msk.f32.vlgmr.msra.gmra.mrb[60].mxu1 %vm48_vm1, %v3888_v5  ;;  %v5496_v5 = vld [vmem:[%s9125_s3 + $0x20] sm:$0xff] }
 0x685   :  { %7075 = vmatpush3.bf16.msra.mxu1 %v7072_v40  ;;  %v7104_v40 = vpack.c.bf16 %v5499_v16, %v5498_v8  ;;  %v5534_v8 = vld [vmem:[%s9124_s4 + $0x140] sm:$0xff]  ;;  %v5535_v16 = vld [vmem:[%s9124_s4 + $0x148] sm:$0xff] }
 0x686   :  { %7077 = vmatprep.subr.bf16.mxu1 %v7076_v30 }
 0x689   :  { %7079 = vmatpush3.bf16.msra.mxu1 %v7076_v30  ;;  %v5501_v30 = vld [vmem:[%s9124_s4 + $0x98] sm:$0xff] }
 0x68a   :  { %7081 = vmatprep.subr.bf16.mxu1 %v7080_v44  ;;  %v7108_v36 = vpack.c.bf16 %v5501_v30, %v5500_v32  ;;  %v5536_v32 = vld [vmem:[%s9124_s4 + $0x150] sm:$0xff]  ;;  %v5537_v30 = vld [vmem:[%s9124_s4 + $0x158] sm:$0xff] }
 0x68d   :  { %7083 = vmatpush3.bf16.msra.mxu1 %v7080_v44 }
 0x68e   :  { %7085 = vmatprep.subr.bf16.mxu1 %v7084_v54 }
 0x691   :  { %7087 = vmatpush3.bf16.msra.mxu1 %v7084_v54  ;;  %v7112_v54 = vpack.c.bf16 %v5503_v18, %v5502_v23  ;;  %v5539_v23 = vld [vmem:[%s9124_s4 + $0x168] sm:$0xff] }
 0x692   :  { %7089 = vmatprep.subr.bf16.mxu1 %v7088_v34 }
 0x6c0   :  { %v3669_v21 = vpop.f32.mrb[26].mxu0 }
 0x6c1   :  { %v6462_v7 = vpop.f32.mrb[27].mxu0 }
 0x6c2   :  { %v5511_v7 = vld [vmem:[%s9124_s4 + $0xc8] sm:$0xff] }
 0x6d7   :  { %v3877_v61 = vpop.f32.mrb[58].mxu1 }
 0x6d8   :  { %v6500_v26 = vpop.f32.mrb[59].mxu1  ;;  %7457 = vrcp.f32 %v3877_v61 }
 0x6d9   :  { %7459 = vrcp.f32 %v3669_v21  ;;  %v5497_v26 = vld [vmem:[%s9125_s3 + $0x28] sm:$0xf] }
 0x6e0   :  { %v3773_v29 = vpop.f32.mrb[28].mxu0 }
 0x6e1   :  { %7461 = vrcp.f32 %v3773_v29  ;;  %v6481_v9 = vpop.f32.mrb[29].mxu0 }
 0x6e2   :  { %v7458_v4 = vpop.eup %7457  ;;  %v5512_v9 = vld [vmem:[%s9124_s4 + $0xd0] sm:$0xff] }
 0x6e3   :  { %v7460_v6 = vpop.eup %7459  ;;  %v3885_v42 = vrot.slane %v7458_v4, %v7977_v62  ;;  %v5513_v4 = vld [vmem:[%s9124_s4 + $0xd8] sm:$0xff] }
 0x6e4   :  { %v3677_v58 = vrot.slane %v7460_v6, %v7977_v62  ;;  %v5508_v6 = vld [vmem:[%s9125_s3 + $0x30] sm:$0xff] }
 0x6e5   :  { %v8714_v24 = vmul.f32 %v3885_v42, %v3877_v61 }
 0x6e6   :  { %v3678_v13 = vmul.f32 %v3677_v58, %v3669_v21  ;;  %v5510_v21 = vld [vmem:[%s9124_s4 + $0xc0] sm:$0xff] }
 0x6e7   :  { %v3995_v51 = vrot.slane %v8714_v24, 2  ;;  %v7120_v61 = vpack.c.bf16 %v5511_v7, %v5510_v21  ;;  %v5547_v21 = vld [vmem:[%s9124_s4 + $0x188] sm:$0xff]  ;;  %v5576_v24 = vld [vmem:[%s9124_s4 + $0x230] sm:$0xff] }
 0x6eb   :  { %v7462_v45 = vpop.eup %7461 }
 0x6ec   :  { %v3781_v31 = vrot.slane %v7462_v45, %v7977_v62  ;;  %v7124_v45 = vpack.c.bf16 %v5513_v4, %v5512_v9  ;;  %v5549_v9 = vld [vmem:[%s9124_s4 + $0x198] sm:$0xff]  ;;  %v5544_v4 = vld [vmem:[%s9125_s3 + $0x60] sm:$0xff] }
 0x6ee   :  { %v3782_v60 = vmul.f32 %v3781_v31, %v3773_v29  ;;  %v5514_v31 = vld [vmem:[%s9124_s4 + $0xe0] sm:$0xff] }
 0x6f0   :  { %v3992_v12 = vrot.slane %v3782_v60, 5  ;;  %v5515_v60 = vld [vmem:[%s9124_s4 + $0xe8] sm:$0xff] }
 0x6f2   :  { %v4000_v46 = vsel %vm245_vm6, %v3678_v13, %v3992_v12  ;;  %v7128_v13 = vpack.c.bf16 %v5515_v60, %v5514_v31  ;;  %v5516_v12 = vld [vmem:[%s9124_s4 + $0xf0] sm:$0xff] }
 0x6f3   :  { %v8721_v48 = vsel %vm1487_vm11, %v4000_v46, %v3995_v51  ;;  %v5517_v46 = vld [vmem:[%s9124_s4 + $0xf8] sm:$0xff]  ;;  %v5552_v60 = vld [vmem:[%s9124_s4 + $0x1b0] sm:$0xff] }
 0x6f4   :  { %v4024_v27 = vrot.slane %v8721_v48, %v7994_v55  ;;  %v4008_v19 = vrot.slane %v8721_v48, %v7997_v56  ;;  %v4202_v2 = vrot.slane %v8721_v48, %v8050_v47  ;;  %v4301_v29 = vrot.slane %v8721_v48, %v7977_v62 }
 0x6f5   :  { %v4400_v49 = vrot.slane %v8721_v48, %v1893_v15  ;;  %v5526_v15 = vld [vmem:[%s9124_s4 + $0x120] sm:$0xff] }
 0x6f6   :  { %v4025_v41 = vmul.f32 %v5482_v43, %v4024_v27  ;;  %v4026_v39 = vmul.f32 %v5483_v11, %v4024_v27  ;;  %v4009_v35 = vmul.f32 %v4008_v19, %v4003_v14  ;;  %v4010_v22 = vmul.f32 %v4008_v19, %v4004_v63  ;;  %v5522_v11 = vld [vmem:[%s9124_s4 + $0x100] sm:$0xff]  ;;  %v5523_v27 = vld [vmem:[%s9124_s4 + $0x108] sm:$0xff]  ;;  %v5524_v14 = vld [vmem:[%s9124_s4 + $0x110] sm:$0xff] }
 0x6f7   :  { %v4203_v44 = vmul.f32 %v5496_v5, %v4202_v2  ;;  %v4204_v42 = vmul.f32 %v5497_v26, %v4202_v2  ;;  %v4302_v58 = vmul.f32 %v5508_v6, %v4301_v29  ;;  %v7132_v43 = vpack.c.bf16 %v5517_v46, %v5516_v12  ;;  %v5521_v63 = vld [vmem:[%s9125_s3 + $0x48] sm:$0xf]  ;;  %v5532_v5 = vld [vmem:[%s9125_s3 + $0x50] sm:$0xff]  ;;  %v5558_v46 = vld [vmem:[%s9124_s4 + $0x1c0] sm:$0xff] }
 0x6f8   :  { %6536 = vmatprep.mubr.msk.f32.mxu1 %vm48_vm1, %v4025_v41  ;;  %v7136_v19 = vpack.c.bf16 %v5523_v27, %v5522_v11  ;;  %v5525_v41 = vld [vmem:[%s9124_s4 + $0x118] sm:$0xff]  ;;  %v4499_v2 = vrot.slane %v8721_v48, %v1994_v1  ;;  %v5538_v1 = vld [vmem:[%s9124_s4 + $0x160] sm:$0xff]  ;;  %v4598_v26 = vrot.slane %v8721_v48, %v2095_v50  ;;  %v5545_v27 = vld [vmem:[%s9125_s3 + $0x68] sm:$0xf] }
 0x6f9   :  { %6537 = vmatmul.mubr.msk.f32.vlgmr.msra.gmra.mrb[62].mxu1 %vm48_vm1, %v4026_v39  ;;  %v5520_v39 = vld [vmem:[%s9125_s3 + $0x40] sm:$0xff]  ;;  %v7160_v18 = vpack.c.bf16 %v5539_v23, %v5538_v1 }
 0x6fa   :  { %7091 = vmatpush3.bf16.msra.mxu1 %v7088_v34  ;;  %6555 = vmatprep.mubr.msk.f32.mxu1 %vm48_vm1, %v4009_v35  ;;  %v7116_v34 = vpack.c.bf16 %v5505_v10, %v5504_v52  ;;  %v7140_v35 = vpack.c.bf16 %v5525_v41, %v5524_v14  ;;  %v4401_v57 = vmul.f32 %v5520_v39, %v4400_v49  ;;  %v5541_v52 = vld [vmem:[%s9124_s4 + $0x178] sm:$0xff]  ;;  %v5550_v50 = vld [vmem:[%s9124_s4 + $0x1a0] sm:$0xff]  ;;  %v5556_v14 = vld [vmem:[%s9125_s3 + $0x70] sm:$0xff] }
 0x6fb   :  { %7093 = vmatprep.subr.bf16.mxu1 %v7092_v0  ;;  %v4600_v41 = vmul.f32 %v5545_v27, %v4598_v26  ;;  %v5568_v23 = vld [vmem:[%s9125_s3 + $0x80] sm:$0xff]  ;;  %v5596_v27 = vld [vmem:[%s9124_s4 + $0x290] sm:$0xff] }
 0x6fe   :  { %7095 = vmatpush3.bf16.msra.mxu1 %v7092_v0  ;;  %v4303_v0 = vmul.f32 %v5509_v25, %v4301_v29  ;;  %v5548_v29 = vld [vmem:[%s9124_s4 + $0x190] sm:$0xff] }
 0x6ff   :  { %7097 = vmatprep.subr.bf16.mxu1 %v7096_v20  ;;  %v5560_v25 = vld [vmem:[%s9124_s4 + $0x1d0] sm:$0xff] }
 0x702   :  { %7099 = vmatpush3.bf16.msra.mxu1 %v7096_v20  ;;  %v7144_v20 = vpack.c.bf16 %v5527_v37, %v5526_v15  ;;  %v5564_v15 = vld [vmem:[%s9124_s4 + $0x1f0] sm:$0xff]  ;;  %v5565_v37 = vld [vmem:[%s9124_s4 + $0x1f8] sm:$0xff] }
 0x703   :  { %7101 = vmatprep.subr.bf16.mxu1 %v7100_v17 }
 0x706   :  { %7103 = vmatpush3.bf16.msra.mxu1 %v7100_v17  ;;  %v7148_v17 = vpack.c.bf16 %v5529_v38, %v5528_v33  ;;  %v5570_v33 = vld [vmem:[%s9124_s4 + $0x200] sm:$0xff]  ;;  %v5571_v38 = vld [vmem:[%s9124_s4 + $0x208] sm:$0xff] }
 0x707   :  { %7105 = vmatprep.subr.bf16.mxu1 %v7104_v40 }
 0x709   :  { %6556 = vmatmul.mubr.msk.f32.vlgmr.msra.gmra.mrb[62].mxu1 %vm48_vm1, %v4010_v22  ;;  %v4402_v22 = vmul.f32 %v5521_v63, %v4400_v49  ;;  %v5561_v49 = vld [vmem:[%s9124_s4 + $0x1d8] sm:$0xff]  ;;  %v5572_v63 = vld [vmem:[%s9124_s4 + $0x210] sm:$0xff] }
 0x70a   :  { %7107 = vmatpush3.bf16.msra.mxu1 %v7104_v40  ;;  %6574 = vmatprep.mubr.msk.f32.mxu1 %vm48_vm1, %v4203_v44  ;;  %v7152_v40 = vpack.c.bf16 %v5535_v16, %v5534_v8  ;;  %v4500_v44 = vmul.f32 %v5532_v5, %v4499_v2  ;;  %v7200_v16 = vpack.c.bf16 %v5571_v38, %v5570_v33  ;;  %v5608_v33 = vld [vmem:[%s9124_s4 + $0x2d0] sm:$0xff]  ;;  %v5609_v38 = vld [vmem:[%s9124_s4 + $0x2d8] sm:$0xff] }
 0x70b   :  { %7109 = vmatprep.subr.bf16.mxu1 %v7108_v36 }
 0x70e   :  { %7111 = vmatpush3.bf16.msra.mxu1 %v7108_v36  ;;  %v7156_v36 = vpack.c.bf16 %v5537_v30, %v5536_v32 }
 0x70f   :  { %7113 = vmatprep.subr.bf16.mxu1 %v7112_v54 }
 0x712   :  { %7115 = vmatpush3.bf16.msra.mxu1 %v7112_v54  ;;  %v5540_v54 = vld [vmem:[%s9124_s4 + $0x170] sm:$0xff] }
 0x713   :  { %7117 = vmatprep.subr.bf16.mxu1 %v7116_v34  ;;  %v7164_v10 = vpack.c.bf16 %v5541_v52, %v5540_v54 }
 0x716   :  { %7119 = vmatpush3.bf16.msra.mxu1 %v7116_v34  ;;  %v5546_v34 = vld [vmem:[%s9124_s4 + $0x180] sm:$0xff] }
 0x717   :  { %7121 = vmatprep.subr.bf16.mxu1 %v7120_v61  ;;  %v7168_v7 = vpack.c.bf16 %v5547_v21, %v5546_v34  ;;  %v5583_v34 = vld [vmem:[%s9124_s4 + $0x248] sm:$0xff] }
 0x719   :  { %6575 = vmatmul.mubr.msk.f32.vlgmr.msra.gmra.mrb[62].mxu1 %vm48_vm1, %v4204_v42  ;;  %v7172_v42 = vpack.c.bf16 %v5549_v9, %v5548_v29  ;;  %v5585_v29 = vld [vmem:[%s9124_s4 + $0x258] sm:$0xff]  ;;  %v5580_v9 = vld [vmem:[%s9125_s3 + $0x90] sm:$0xff] }
 0x71a   :  { %7123 = vmatpush3.bf16.msra.mxu1 %v7120_v61  ;;  %6593 = vmatprep.mubr.msk.f32.mxu1 %vm48_vm1, %v4302_v58  ;;  %v5533_v61 = vld [vmem:[%s9125_s3 + $0x58] sm:$0xf]  ;;  %v5551_v58 = vld [vmem:[%s9124_s4 + $0x1a8] sm:$0xff] }
 0x71b   :  { %7125 = vmatprep.subr.bf16.mxu1 %v7124_v45  ;;  %v4501_v6 = vmul.f32 %v5533_v61, %v4499_v2  ;;  %v7176_v31 = vpack.c.bf16 %v5551_v58, %v5550_v50  ;;  %v5573_v2 = vld [vmem:[%s9124_s4 + $0x218] sm:$0xff]  ;;  %v5588_v58 = vld [vmem:[%s9124_s4 + $0x270] sm:$0xff] }
 0x71e   :  { %7127 = vmatpush3.bf16.msra.mxu1 %v7124_v45  ;;  %v4599_v45 = vmul.f32 %v5544_v4, %v4598_v26  ;;  %v5584_v26 = vld [vmem:[%s9124_s4 + $0x250] sm:$0xff] }
 0x71f   :  { %7129 = vmatprep.subr.bf16.mxu1 %v7128_v13 }
 0x722   :  { %7131 = vmatpush3.bf16.msra.mxu1 %v7128_v13  ;;  %v5553_v13 = vld [vmem:[%s9124_s4 + $0x1b8] sm:$0xff] }
 0x723   :  { %7133 = vmatprep.subr.bf16.mxu1 %v7132_v43  ;;  %v7180_v12 = vpack.c.bf16 %v5553_v13, %v5552_v60  ;;  %v5594_v13 = vld [vmem:[%s9124_s4 + $0x280] sm:$0xff] }
 0x726   :  { %7135 = vmatpush3.bf16.msra.mxu1 %v7132_v43  ;;  %v5559_v43 = vld [vmem:[%s9124_s4 + $0x1c8] sm:$0xff] }
 0x727   :  { %7137 = vmatprep.subr.bf16.mxu1 %v7136_v19  ;;  %v7184_v11 = vpack.c.bf16 %v5559_v43, %v5558_v46  ;;  %v5581_v43 = vld [vmem:[%s9125_s3 + $0x98] sm:$0xf] }
 0x729   :  { %6594 = vmatmul.mubr.msk.f32.vlgmr.msra.gmra.mrb[62].mxu1 %vm48_vm1, %v4303_v0  ;;  %v7188_v0 = vpack.c.bf16 %v5561_v49, %v5560_v25  ;;  %v5592_v25 = vld [vmem:[%s9125_s3 + $0xa0] sm:$0xff] }
 0x72a   :  { %7139 = vmatpush3.bf16.msra.mxu1 %v7136_v19  ;;  %6612 = vmatprep.mubr.msk.f32.mxu1 %vm48_vm1, %v4401_v57  ;;  %v4697_v19 = vrot.slane %v8721_v48, %v2196_v28  ;;  %v5562_v48 = vld [vmem:[%s9124_s4 + $0x1e0] sm:$0xff] }
 0x72b   :  { %7141 = vmatprep.subr.bf16.mxu1 %v7140_v35 }
 0x72c   :  { %v4698_v28 = vmul.f32 %v5556_v14, %v4697_v19 }
 0x72e   :  { %7143 = vmatpush3.bf16.msra.mxu1 %v7140_v35  ;;  %v5563_v35 = vld [vmem:[%s9124_s4 + $0x1e8] sm:$0xff] }
 0x72f   :  { %7145 = vmatprep.subr.bf16.mxu1 %v7144_v20  ;;  %v7192_v57 = vpack.c.bf16 %v5563_v35, %v5562_v48  ;;  %v5606_v35 = vld [vmem:[%s9124_s4 + $0x2c0] sm:$0xff] }
 0x732   :  { %7147 = vmatpush3.bf16.msra.mxu1 %v7144_v20  ;;  %v7196_v20 = vpack.c.bf16 %v5565_v37, %v5564_v15  ;;  %v5593_v37 = vld [vmem:[%s9125_s3 + $0xa8] sm:$0xf] }
 0x733   :  { %7149 = vmatprep.subr.bf16.mxu1 %v7148_v17 }
 0x736   :  { %7151 = vmatpush3.bf16.msra.mxu1 %v7148_v17 }
 0x737   :  { %7153 = vmatprep.subr.bf16.mxu1 %v7152_v40 }
 0x739   :  { %6613 = vmatmul.mubr.msk.f32.vlgmr.msra.gmra.mrb[62].mxu1 %vm48_vm1, %v4402_v22  ;;  %v7204_v22 = vpack.c.bf16 %v5573_v2, %v5572_v63  ;;  %v5611_v63 = vld [vmem:[%s9124_s4 + $0x2e8] sm:$0xff] }
 0x73a   :  { %7155 = vmatpush3.bf16.msra.mxu1 %v7152_v40  ;;  %6631 = vmatprep.mubr.msk.f32.mxu1 %vm48_vm1, %v4500_v44  ;;  %v5557_v40 = vld [vmem:[%s9125_s3 + $0x78] sm:$0xf]  ;;  %v5575_v44 = vld [vmem:[%s9124_s4 + $0x228] sm:$0xff] }
 0x73b   :  { %7157 = vmatprep.subr.bf16.mxu1 %v7156_v36  ;;  %v4699_v5 = vmul.f32 %v5557_v40, %v4697_v19  ;;  %v5597_v19 = vld [vmem:[%s9124_s4 + $0x298] sm:$0xff] }
 0x73c   :  { %v7236_v14 = vpack.c.bf16 %v5597_v19, %v5596_v27 }
 0x73e   :  { %7159 = vmatpush3.bf16.msra.mxu1 %v7156_v36  ;;  %v5574_v36 = vld [vmem:[%s9124_s4 + $0x220] sm:$0xff] }
 0x73f   :  { %7161 = vmatprep.subr.bf16.mxu1 %v7160_v18  ;;  %v7208_v54 = vpack.c.bf16 %v5575_v44, %v5574_v36 }
 0x742   :  { %7163 = vmatpush3.bf16.msra.mxu1 %v7160_v18 }
 0x743   :  { %7165 = vmatprep.subr.bf16.mxu1 %v7164_v10 }
 0x746   :  { %7167 = vmatpush3.bf16.msra.mxu1 %v7164_v10 }
 0x747   :  { %7169 = vmatprep.subr.bf16.mxu1 %v7168_v7 }
 0x749   :  { %6632 = vmatmul.mubr.msk.f32.vlgmr.msra.gmra.mrb[62].mxu1 %vm48_vm1, %v4501_v6  ;;  %v7220_v6 = vpack.c.bf16 %v5585_v29, %v5584_v26 }
 0x74a   :  { %7171 = vmatpush3.bf16.msra.mxu1 %v7168_v7  ;;  %6650 = vmatprep.mubr.msk.f32.mxu1 %vm48_vm1, %v4599_v45  ;;  %v5569_v7 = vld [vmem:[%s9125_s3 + $0x88] sm:$0xf] }
 0x74b   :  { %7173 = vmatprep.subr.bf16.mxu1 %v7172_v42  ;;  %v5587_v45 = vld [vmem:[%s9124_s4 + $0x268] sm:$0xff] }
 0x74e   :  { %7175 = vmatpush3.bf16.msra.mxu1 %v7172_v42 }
 0x74f   :  { %7177 = vmatprep.subr.bf16.mxu1 %v7176_v31 }
 0x752   :  { %7179 = vmatpush3.bf16.msra.mxu1 %v7176_v31  ;;  %v5589_v31 = vld [vmem:[%s9124_s4 + $0x278] sm:$0xff] }
 0x753   :  { %7181 = vmatprep.subr.bf16.mxu1 %v7180_v12  ;;  %v7228_v60 = vpack.c.bf16 %v5589_v31, %v5588_v58 }
 0x756   :  { %7183 = vmatpush3.bf16.msra.mxu1 %v7180_v12  ;;  %v5595_v12 = vld [vmem:[%s9124_s4 + $0x288] sm:$0xff] }
 0x757   :  { %v3981_v39 = vpop.f32.mrb[60].mxu1  ;;  %7185 = vmatprep.subr.bf16.mxu1 %v7184_v11  ;;  %v7232_v46 = vpack.c.bf16 %v5595_v12, %v5594_v13 }
 0x758   :  { %7463 = vrcp.f32 %v3981_v39  ;;  %v6519_v3 = vpop.f32.mrb[61].mxu1 }
 0x759   :  { %6651 = vmatmul.mubr.msk.f32.vlgmr.msra.gmra.mrb[62].mxu1 %vm48_vm1, %v4600_v41  ;;  %v5600_v3 = vld [vmem:[%s9124_s4 + $0x2b0] sm:$0xff] }
 0x75a   :  { %7187 = vmatpush3.bf16.msra.mxu1 %v7184_v11  ;;  %6669 = vmatprep.mubr.msk.f32.mxu1 %vm48_vm1, %v4698_v28  ;;  %v5601_v28 = vld [vmem:[%s9124_s4 + $0x2b8] sm:$0xff] }
 0x75b   :  { %7189 = vmatprep.subr.bf16.mxu1 %v7188_v0  ;;  %v7244_v48 = vpack.c.bf16 %v5601_v28, %v5600_v3 }
 0x75e   :  { %7191 = vmatpush3.bf16.msra.mxu1 %v7188_v0 }
 0x75f   :  { %7193 = vmatprep.subr.bf16.mxu1 %v7192_v57 }
 0x762   :  { %v7464_v17 = vpop.eup %7463  ;;  %7195 = vmatpush3.bf16.msra.mxu1 %v7192_v57  ;;  %v5607_v57 = vld [vmem:[%s9124_s4 + $0x2c8] sm:$0xff] }
 0x763   :  { %v3989_v8 = vrot.slane %v7464_v17, %v7977_v62  ;;  %7197 = vmatprep.subr.bf16.mxu1 %v7196_v20  ;;  %v7248_v15 = vpack.c.bf16 %v5607_v57, %v5606_v35  ;;  %v5604_v17 = vld [vmem:[%s9125_s3 + $0xb0] sm:$0xff] }
 0x765   :  { %v3990_v32 = vmul.f32 %v3989_v8, %v3981_v39  ;;  %v5599_v39 = vld [vmem:[%s9124_s4 + $0x2a8] sm:$0xff] }
 0x766   :  { %7199 = vmatpush3.bf16.msra.mxu1 %v7196_v20 }
 0x767   :  { %v3998_v30 = vrot.slane %v3990_v32, 7  ;;  %7201 = vmatprep.subr.bf16.mxu1 %v7200_v16  ;;  %v5612_v32 = vld [vmem:[%s9124_s4 + $0x2f0] sm:$0xff] }
 0x769   :  { %v8990_v1 = vsel %vm389_vm7, %v3995_v51, %v3998_v30  ;;  %6670 = vmatmul.mubr.msk.f32.vlgmr.msra.gmra.mrb[62].mxu1 %vm48_vm1, %v4699_v5  ;;  %v5577_v51 = vld [vmem:[%s9124_s4 + $0x238] sm:$0xff] }
 0x76a   :  { %7203 = vmatpush3.bf16.msra.mxu1 %v7200_v16  ;;  %v4796_v18 = vrot.slane %v8990_v1, %v7997_v56  ;;  %v7212_v10 = vpack.c.bf16 %v5577_v51, %v5576_v24  ;;  %v5582_v56 = vld [vmem:[%s9124_s4 + $0x240] sm:$0xff]  ;;  %v4895_v61 = vrot.slane %v8990_v1, %v7994_v55  ;;  %v4994_v11 = vrot.slane %v8990_v1, %v8050_v47  ;;  %v5613_v30 = vld [vmem:[%s9124_s4 + $0x2f8] sm:$0xff] }
 0x76b   :  { %7205 = vmatprep.subr.bf16.mxu1 %v7204_v22  ;;  %v7216_v21 = vpack.c.bf16 %v5583_v34, %v5582_v56  ;;  %v5586_v55 = vld [vmem:[%s9124_s4 + $0x260] sm:$0xff]  ;;  %v5093_v20 = vrot.slane %v8990_v1, %v7977_v62  ;;  %v7252_v16 = vpack.c.bf16 %v5609_v38, %v5608_v33  ;;  %v7260_v5 = vpack.c.bf16 %v5613_v30, %v5612_v32 }
 0x76c   :  { %v4797_v52 = vmul.f32 %v5568_v23, %v4796_v18  ;;  %v4798_v4 = vmul.f32 %v5569_v7, %v4796_v18  ;;  %v4896_v42 = vmul.f32 %v5580_v9, %v4895_v61  ;;  %v7224_v50 = vpack.c.bf16 %v5587_v45, %v5586_v55  ;;  %v5598_v47 = vld [vmem:[%s9124_s4 + $0x2a0] sm:$0xff] }
 0x76d   :  { %v4897_v49 = vmul.f32 %v5581_v43, %v4895_v61  ;;  %v4995_v41 = vmul.f32 %v5592_v25, %v4994_v11  ;;  %v7240_v0 = vpack.c.bf16 %v5599_v39, %v5598_v47  ;;  %v4996_v8 = vmul.f32 %v5593_v37, %v4994_v11  ;;  %v5610_v62 = vld [vmem:[%s9124_s4 + $0x2e0] sm:$0xff] }
 0x76e   :  { %7207 = vmatpush3.bf16.msra.mxu1 %v7204_v22  ;;  %6688 = vmatprep.mubr.msk.f32.mxu1 %vm48_vm1, %v4797_v52  ;;  %v5094_v40 = vmul.f32 %v5604_v17, %v5093_v20  ;;  %v7256_v2 = vpack.c.bf16 %v5611_v63, %v5610_v62  ;;  %v5605_v22 = vld [vmem:[%s9125_s3 + $0xb8] sm:$0xf] }
 0x76f   :  { %7209 = vmatprep.subr.bf16.mxu1 %v7208_v54  ;;  %v5095_v36 = vmul.f32 %v5605_v22, %v5093_v20 }
 0x772   :  { %7211 = vmatpush3.bf16.msra.mxu1 %v7208_v54 }
 0x773   :  { %7213 = vmatprep.subr.bf16.mxu1 %v7212_v10 }
 0x776   :  { %7215 = vmatpush3.bf16.msra.mxu1 %v7212_v10 }
 0x777   :  { %7217 = vmatprep.subr.bf16.mxu1 %v7216_v21 }
 0x779   :  { %6689 = vmatmul.mubr.msk.f32.vlgmr.msra.gmra.mrb[62].mxu1 %vm48_vm1, %v4798_v4 }
 0x77a   :  { %7219 = vmatpush3.bf16.msra.mxu1 %v7216_v21  ;;  %6707 = vmatprep.mubr.msk.f32.mxu1 %vm48_vm1, %v4896_v42 }
 0x77b   :  { %7221 = vmatprep.subr.bf16.mxu1 %v7220_v6 }
 0x77e   :  { %7223 = vmatpush3.bf16.msra.mxu1 %v7220_v6 }
 0x77f   :  { %7225 = vmatprep.subr.bf16.mxu1 %v7224_v50 }
 0x782   :  { %7227 = vmatpush3.bf16.msra.mxu1 %v7224_v50 }
 0x783   :  { %7229 = vmatprep.subr.bf16.mxu1 %v7228_v60 }
 0x786   :  { %7231 = vmatpush3.bf16.msra.mxu1 %v7228_v60 }
 0x787   :  { %7233 = vmatprep.subr.bf16.mxu1 %v7232_v46 }
 0x789   :  { %6708 = vmatmul.mubr.msk.f32.vlgmr.msra.gmra.mrb[62].mxu1 %vm48_vm1, %v4897_v49 }
 0x78a   :  { %7235 = vmatpush3.bf16.msra.mxu1 %v7232_v46  ;;  %6726 = vmatprep.mubr.msk.f32.mxu1 %vm48_vm1, %v4995_v41 }
 0x78b   :  { %7237 = vmatprep.subr.bf16.mxu1 %v7236_v14 }
 0x78e   :  { %7239 = vmatpush3.bf16.msra.mxu1 %v7236_v14 }
 0x78f   :  { %7241 = vmatprep.subr.bf16.mxu1 %v7240_v0 }
 0x792   :  { %7243 = vmatpush3.bf16.msra.mxu1 %v7240_v0 }
 0x793   :  { %7245 = vmatprep.subr.bf16.mxu1 %v7244_v48 }
 0x796   :  { %7247 = vmatpush3.bf16.msra.mxu1 %v7244_v48 }
 0x797   :  { %7249 = vmatprep.subr.bf16.mxu1 %v7248_v15 }
 0x799   :  { %6727 = vmatmul.mubr.msk.f32.vlgmr.msra.gmra.mrb[62].mxu1 %vm48_vm1, %v4996_v8 }
 0x79a   :  { %7251 = vmatpush3.bf16.msra.mxu1 %v7248_v15  ;;  %6745 = vmatprep.mubr.msk.f32.mxu1 %vm48_vm1, %v5094_v40 }
 0x79b   :  { %7253 = vmatprep.subr.bf16.mxu1 %v7252_v16 }
 0x79e   :  { %7255 = vmatpush3.bf16.msra.mxu1 %v7252_v16 }
 0x79f   :  { %7257 = vmatprep.subr.bf16.mxu1 %v7256_v2 }
 0x7a2   :  { %7259 = vmatpush3.bf16.msra.mxu1 %v7256_v2 }
 0x7a3   :  { %7261 = vmatprep.subr.bf16.mxu1 %v7260_v5 }
 0x7a6   :  { %7263 = vmatpush3.bf16.msra.mxu1 %v7260_v5 }
 0x7a9   :  { %6746 = vmatmul.mubr.msk.f32.vlgmr.msra.gmra.mrb[62].mxu1 %vm48_vm1, %v5095_v36 }
 0x87c   :  { %v6747_v44 = vpop.f32.mrb[62].mxu1 }
 0x87d   :  { %v5188_v1 = vadd.f32 %v6747_v44, %v8668_v53  ;;  %v5176_v23 = vpop.f32.mrb[63].mxu1 }
 0x87e   :  { %v5187_v18 = vadd.f32 %v5176_v23, %v8660_v59 }
 0x87f   :  { %5617 = vst.msk [vmem:[%s9127_s6 + $0x18] sm:$0xf] %vm2709_vm12, %v5188_v1 }
 0x880   :  { %5616 = vst.msk [vmem:[%s9127_s6 + $0x10] sm:$0xff] %vm48_vm1, %v5187_v18 }

</bundles_post_ra>
